<compile_context>
chip_gen: v5e
topology: v5e:2x2
jax: 0.10.0
libtpu: 0.0.40
codegen_flags: <defaults>
</compile_context>

<pallas_src>
import functools

import numpy as np
import jax
import jax.numpy as jnp
from jax.experimental import pallas as pl
from jax.experimental.pallas import tpu as pltpu


_LANE = 128   # lane width: channel dims are zero-padded to a multiple of this


def _round_up(x, m):
    return (x + m - 1) // m * m


# ---------------------------------------------------------------------------
# Fused Bottleneck kernel (one image per grid step)
# ---------------------------------------------------------------------------
def _bottleneck_kernel(x_ref, w1_ref, b1_ref, w2_ref, b2_ref, w3_ref, b3_ref,
                       o_ref, h1p_ref):
    # x_ref : (1, H, W, Cin_p)   compute dtype (also the residual)
    # w*_ref: BN-scale-folded conv weights, compute dtype.
    #         w2_ref is (3, 3*P, P): the 3 kw taps concatenated along K per kh.
    # b*_ref: (1, C) f32 folded BN biases
    # h1p_ref: VMEM scratch (3, H+2, W, P) compute dtype -- three column-
    #          pre-shifted, row-halo'd copies of the conv1 output.
    _, H, W, Cin = x_ref.shape
    P = w1_ref.shape[1]
    Cout = w3_ref.shape[1]
    M = H * W
    cdt = w1_ref.dtype                        # MXU compute dtype

    # ---- conv1 (1x1) + bn1 + relu ------------------------------------------
    h1 = jnp.dot(x_ref[...].reshape(M, Cin), w1_ref[...],
                 preferred_element_type=jnp.float32)
    h1 = jnp.maximum(h1 + b1_ref[...], 0.0)   # (M, P) f32

    # Build the three kw-shifted copies (zero at the left/right image borders)
    # in f32 registers, cast once each, and store them 8-aligned.
    h1_3d = h1.reshape(H, W, P)
    zcol = jnp.zeros((H, 1, P), jnp.float32)
    shifted = (
        jnp.concatenate([zcol, h1_3d[:, :W - 1, :]], axis=1),   # kw=0 tap: h1[h, w-1]
        h1_3d,                                                  # kw=1 tap: h1[h, w  ]
        jnp.concatenate([h1_3d[:, 1:, :], zcol], axis=1),       # kw=2 tap: h1[h, w+1]
    )
    # Zero only the top/bottom halo rows, every step (safe under megacore).
    zrow = jnp.zeros((3, 1, W, P), cdt)
    h1p_ref[:, 0:1, :, :] = zrow
    h1p_ref[:, H + 1:H + 2, :, :] = zrow
    for s in range(3):
        h1p_ref[s:s + 1, 1:H + 1, :, :] = shifted[s].astype(cdt).reshape(1, H, W, P)

    # ---- conv2 (3x3, pad=1) + bn2 + relu: 3 matmuls with K = 3*P -----------
    acc = None
    for kh in range(3):
        taps = [h1p_ref[s:s + 1, kh:kh + H, :, :].reshape(M, P) for s in range(3)]
        winc = jnp.concatenate(taps, axis=-1)                   # (M, 3*P)
        contrib = jnp.dot(winc, w2_ref[kh], preferred_element_type=jnp.float32)
        acc = contrib if acc is None else acc + contrib         # traced accumulator
    h2 = jnp.maximum(acc + b2_ref[...], 0.0).astype(cdt)

    # ---- conv3 (1x1) + bn3 + residual add + relu ---------------------------
    y = jnp.dot(h2, w3_ref[...], preferred_element_type=jnp.float32)
    res = x_ref[...].reshape(M, Cout).astype(jnp.float32)       # late re-read
    y = jnp.maximum(y + b3_ref[...] + res, 0.0)                 # Cin_p == Cout_p
    o_ref[...] = y.reshape(1, H, W, Cout).astype(o_ref.dtype)


# ---------------------------------------------------------------------------
# Wrapper: layout, channel padding, BN folding, pallas_call
# ---------------------------------------------------------------------------
def bottleneck_forward(x_nchw, params, *, stride=1, compute_dtype=jnp.bfloat16):
    N, Cin, H, W = x_nchw.shape
    planes = params["w1"].shape[1]
    Cout = params["w3"].shape[1]
    # downsample is None in this module -> identity residual.
    assert stride == 1 and Cin == Cout, "identity residual requires stride=1, Cin==Cout"

    Cin_p = _round_up(Cin, _LANE)
    P_p = _round_up(planes, _LANE)
    Cout_p = _round_up(Cout, _LANE)

    # NCHW -> NHWC (channels last => lanes), stream in compute dtype, pad chans.
    x = jnp.transpose(x_nchw, (0, 2, 3, 1)).astype(compute_dtype)
    if Cin_p != Cin:
        x = jnp.pad(x, ((0, 0), (0, 0), (0, 0), (0, Cin_p - Cin)))

    # Fold eval-mode BN scale into conv weight output-channel columns.
    w1 = (params["w1"] * params["s1"].reshape(1, -1)).astype(compute_dtype)
    w2 = (params["w2"] * params["s2"].reshape(1, 1, 1, -1)).astype(compute_dtype)
    w3 = (params["w3"] * params["s3"].reshape(1, -1)).astype(compute_dtype)

    w1p = jnp.zeros((Cin_p, P_p), compute_dtype).at[:Cin, :planes].set(w1)
    # conv2 weights laid out as (kh, kw*P_p + cin, cout): K-concatenated taps.
    w2p = jnp.zeros((3, 3 * P_p, P_p), compute_dtype)
    for kw in range(3):
        w2p = w2p.at[:, kw * P_p:kw * P_p + planes, :planes].set(w2[:, kw])
    w3p = jnp.zeros((P_p, Cout_p), compute_dtype).at[:planes, :Cout].set(w3)
    b1p = jnp.zeros((1, P_p), jnp.float32).at[:, :planes].set(params["b1"].reshape(1, -1))
    b2p = jnp.zeros((1, P_p), jnp.float32).at[:, :planes].set(params["b2"].reshape(1, -1))
    b3p = jnp.zeros((1, Cout_p), jnp.float32).at[:, :Cout].set(params["b3"].reshape(1, -1))

    # VMEM budget derived from the actual buffers (+ headroom), clamped so it
    # also fits v7x's 64 MiB per-core VMEM.
    isz = jnp.dtype(compute_dtype).itemsize
    resident = (2 * H * W * (Cin_p + Cout_p) * isz                       # dbl-buffered I/O
                + 2 * ((Cin_p * P_p + 9 * P_p * P_p + P_p * Cout_p) * isz
                       + (2 * P_p + Cout_p) * 4)                         # weights + biases
                + 3 * (H + 2) * W * P_p * isz)                           # shifted h1 scratch
    temporaries = H * W * (4 * P_p + 2 * Cout_p + Cin_p) * 4
    vmem_limit = int(min(64 * 2 ** 20, max(32 * 2 ** 20, 2 * (resident + temporaries))))

    out = pl.pallas_call(
        _bottleneck_kernel,
        out_shape=jax.ShapeDtypeStruct((N, H, W, Cout_p), compute_dtype),
        grid_spec=pltpu.PrefetchScalarGridSpec(
            num_scalar_prefetch=0,
            grid=(N,),
            in_specs=[
                pl.BlockSpec((1, H, W, Cin_p), lambda n: (n, 0, 0, 0)),   # x / residual
                pl.BlockSpec((Cin_p, P_p), lambda n: (0, 0)),             # w1 (resident)
                pl.BlockSpec((1, P_p), lambda n: (0, 0)),                 # b1
                pl.BlockSpec((3, 3 * P_p, P_p), lambda n: (0, 0, 0)),     # w2 (resident)
                pl.BlockSpec((1, P_p), lambda n: (0, 0)),                 # b2
                pl.BlockSpec((P_p, Cout_p), lambda n: (0, 0)),            # w3 (resident)
                pl.BlockSpec((1, Cout_p), lambda n: (0, 0)),              # b3
            ],
            out_specs=pl.BlockSpec((1, H, W, Cout_p), lambda n: (n, 0, 0, 0)),
            scratch_shapes=[
                pltpu.VMEM((3, H + 2, W, P_p), compute_dtype),            # shifted h1 copies
            ],
        ),
        compiler_params=pltpu.CompilerParams(
            dimension_semantics=("parallel",),          # megacore over batch
            vmem_limit_bytes=vmem_limit,
        ),
    )(x, w1p, b1p, w2p, b2p, w3p, b3p)

    out = out[..., :Cout].astype(jnp.float32)           # drop channel padding
    return jnp.transpose(out, (0, 3, 1, 2))             # back to NCHW


# ---------------------------------------------------------------------------
# Deterministic parameter init (shapes per nn.Conv2d / nn.BatchNorm2d)
# ---------------------------------------------------------------------------
def init_params(key, inplanes, planes, eps=1e-5):
    expansion = 4
    ks = jax.random.split(key, 15)

    def bn_fold(kg, kb, km, kv, c):
        gamma = jax.random.uniform(kg, (c,), jnp.float32, 0.5, 1.5)
        beta = jax.random.normal(kb, (c,), jnp.float32) * 0.1
        mean = jax.random.normal(km, (c,), jnp.float32) * 0.1
        var = jax.random.uniform(kv, (c,), jnp.float32, 0.5, 1.5)
        scale = gamma / jnp.sqrt(var + eps)
        bias = beta - mean * scale
        return scale.reshape(1, c), bias.reshape(1, c)

    w1 = jax.random.normal(ks[0], (inplanes, planes), jnp.float32) / np.sqrt(inplanes)
    w2 = jax.random.normal(ks[1], (3, 3, planes, planes), jnp.float32) / np.sqrt(9 * planes)
    w3 = jax.random.normal(ks[2], (planes, planes * expansion), jnp.float32) / np.sqrt(planes)
    s1, b1 = bn_fold(ks[3], ks[4], ks[5], ks[6], planes)
    s2, b2 = bn_fold(ks[7], ks[8], ks[9], ks[10], planes)
    s3, b3 = bn_fold(ks[11], ks[12], ks[13], ks[14], planes * expansion)
    return dict(w1=w1, w2=w2, w3=w3, s1=s1, b1=b1, s2=s2, b2=b2, s3=s3, b3=b3)


# ---------------------------------------------------------------------------
# Pure-JAX reference (correctness check)
# ---------------------------------------------------------------------------
def reference(x_nchw, params, *, stride=1):
    dn = ("NHWC", "HWIO", "NHWC")
    x = jnp.transpose(x_nchw, (0, 2, 3, 1)).astype(jnp.float32)
    Cin, planes = params["w1"].shape

    def bn(h, s, b):
        return h * s.reshape(1, 1, 1, -1) + b.reshape(1, 1, 1, -1)

    h = jax.lax.conv_general_dilated(x, params["w1"].reshape(1, 1, Cin, planes),
                                     (1, 1), "VALID", dimension_numbers=dn)
    h = jnp.maximum(bn(h, params["s1"], params["b1"]), 0.0)
    h = jax.lax.conv_general_dilated(h, params["w2"], (stride, stride),
                                     ((1, 1), (1, 1)), dimension_numbers=dn)
    h = jnp.maximum(bn(h, params["s2"], params["b2"]), 0.0)
    h = jax.lax.conv_general_dilated(h, params["w3"].reshape(1, 1, planes, -1),
                                     (1, 1), "VALID", dimension_numbers=dn)
    h = bn(h, params["s3"], params["b3"]) + x
    h = jnp.maximum(h, 0.0)
    return jnp.transpose(h, (0, 3, 1, 2))


if __name__ == "__main__":
    N, planes, H, W = 2, 4, 16, 16
    inplanes = planes * 4          # downsample is None -> identity residual path
    key = jax.random.PRNGKey(0)
    kx, kp = jax.random.split(key)
    x = jax.random.normal(kx, (N, inplanes, H, W), jnp.float32)
    params = init_params(kp, inplanes, planes)

    ref = reference(x, params, stride=1)

    # f32 compute path: tight check of the fused-kernel math.
    fwd_f32 = jax.jit(functools.partial(bottleneck_forward, stride=1,
                                        compute_dtype=jnp.float32))
    out_f32 = jax.block_until_ready(fwd_f32(x, params))
    assert out_f32.shape == (N, inplanes, H, W)
    np.testing.assert_allclose(np.asarray(out_f32), np.asarray(ref),
                               rtol=5e-3, atol=5e-3)

    # bf16 MXU / bf16-streaming path (default config): looser tolerance.
    fwd_bf16 = jax.jit(functools.partial(bottleneck_forward, stride=1))
    out_bf16 = jax.block_until_ready(fwd_bf16(x, params))
    assert out_bf16.shape == (N, inplanes, H, W)
    np.testing.assert_allclose(np.asarray(out_bf16), np.asarray(ref),
                               rtol=5e-2, atol=5e-2)

    print("KERNEL_OK")
</pallas_src>

<mosaic_0001>
module attributes {stable_mosaic.version = 11 : i64} {
  func.func @_bottleneck_kernel(%arg0: i32, %arg1: memref<1x16x16x128xf32, #tpu.memory_space<vmem>>, %arg2: memref<128x128xf32, #tpu.memory_space<vmem>>, %arg3: memref<1x128xf32, #tpu.memory_space<vmem>>, %arg4: memref<3x384x128xf32, #tpu.memory_space<vmem>>, %arg5: memref<1x128xf32, #tpu.memory_space<vmem>>, %arg6: memref<128x128xf32, #tpu.memory_space<vmem>>, %arg7: memref<1x128xf32, #tpu.memory_space<vmem>>, %arg8: memref<1x16x16x128xf32, #tpu.memory_space<vmem>>, %arg9: memref<3x18x16x128xf32, #tpu.memory_space<vmem>>) attributes {dimension_semantics = [#tpu.dimension_semantics<parallel>], iteration_bounds = array<i64: 2>, scalar_prefetch = 0 : i64, scratch_operands = 1 : i64, tpu.core_type = #tpu.core_type<tc>, window_params = [{transform_indices = @transform_0, window_bounds = array<i64: 1, 16, 16, 128>}, {pipeline_mode = #tpu.pipeline_mode<synchronous>, transform_indices = @transform_1, window_bounds = array<i64: 128, 128>}, {pipeline_mode = #tpu.pipeline_mode<synchronous>, transform_indices = @transform_2, window_bounds = array<i64: 1, 128>}, {pipeline_mode = #tpu.pipeline_mode<synchronous>, transform_indices = @transform_3, window_bounds = array<i64: 3, 384, 128>}, {pipeline_mode = #tpu.pipeline_mode<synchronous>, transform_indices = @transform_4, window_bounds = array<i64: 1, 128>}, {pipeline_mode = #tpu.pipeline_mode<synchronous>, transform_indices = @transform_5, window_bounds = array<i64: 128, 128>}, {pipeline_mode = #tpu.pipeline_mode<synchronous>, transform_indices = @transform_6, window_bounds = array<i64: 1, 128>}, {transform_indices = @transform_7, window_bounds = array<i64: 1, 16, 16, 128>}]} {
    %c0 = arith.constant 0 : index
    %c0_0 = arith.constant 0 : index
    %c0_1 = arith.constant 0 : index
    %c0_2 = arith.constant 0 : index
    %0 = vector.load %arg1[%c0, %c0_0, %c0_1, %c0_2] : memref<1x16x16x128xf32, #tpu.memory_space<vmem>>, vector<1x16x16x128xf32>
    %1 = vector.shape_cast %0 : vector<1x16x16x128xf32> to vector<256x128xf32>
    %c0_3 = arith.constant 0 : index
    %c0_4 = arith.constant 0 : index
    %2 = vector.load %arg2[%c0_3, %c0_4] : memref<128x128xf32, #tpu.memory_space<vmem>>, vector<128x128xf32>
    %cst = arith.constant dense<0.000000e+00> : vector<256x128xf32>
    %3 = tpu.matmul %1, %2, %cst {dimension_numbers = #tpu.dot_dimension_numbers<[1], [0], [0], [1], [0, 0, 1, 1], [], []>} : vector<256x128xf32>, vector<128x128xf32>, vector<256x128xf32> -> vector<256x128xf32>
    %c0_5 = arith.constant 0 : index
    %c0_6 = arith.constant 0 : index
    %4 = vector.load %arg3[%c0_5, %c0_6] : memref<1x128xf32, #tpu.memory_space<vmem>>, vector<1x128xf32>
    %5 = vector.broadcast %4 : vector<1x128xf32> to vector<256x128xf32>
    %6 = arith.addf %3, %5 : vector<256x128xf32>
    %cst_7 = arith.constant 0.000000e+00 : f32
    %7 = vector.broadcast %cst_7 : f32 to vector<256x128xf32>
    %8 = arith.maximumf %6, %7 : vector<256x128xf32>
    %9 = vector.shape_cast %8 : vector<256x128xf32> to vector<16x16x128xf32>
    %cst_8 = arith.constant 0.000000e+00 : f32
    %10 = vector.broadcast %cst_8 : f32 to vector<16x1x128xf32>
    %11 = vector.extract_strided_slice %9 {offsets = [0, 0, 0], sizes = [16, 15, 128], strides = [1, 1, 1]} : vector<16x16x128xf32> to vector<16x15x128xf32>
    %12 = tpu.concatenate %10, %11 in 1 : vector<16x1x128xf32>, vector<16x15x128xf32> -> vector<16x16x128xf32>
    %13 = vector.extract_strided_slice %9 {offsets = [0, 1, 0], sizes = [16, 15, 128], strides = [1, 1, 1]} : vector<16x16x128xf32> to vector<16x15x128xf32>
    %14 = tpu.concatenate %13, %10 in 1 : vector<16x15x128xf32>, vector<16x1x128xf32> -> vector<16x16x128xf32>
    %cst_9 = arith.constant 0.000000e+00 : f32
    %15 = vector.broadcast %cst_9 : f32 to vector<3x1x16x128xf32>
    %c0_10 = arith.constant 0 : index
    %c0_11 = arith.constant 0 : index
    %c0_12 = arith.constant 0 : index
    %c0_13 = arith.constant 0 : index
    %16 = vector.load %arg9[%c0_10, %c0_11, %c0_12, %c0_13] : memref<3x18x16x128xf32, #tpu.memory_space<vmem>>, vector<3x1x16x128xf32>
    tpu.vector_store %arg9[%c0_10, %c0_11, %c0_12, %c0_13], %15 {strides = array<i32>} : memref<3x18x16x128xf32, #tpu.memory_space<vmem>>, vector<3x1x16x128xf32>,
    %c0_14 = arith.constant 0 : index
    %c17 = arith.constant 17 : index
    %c0_15 = arith.constant 0 : index
    %c0_16 = arith.constant 0 : index
    %17 = vector.load %arg9[%c0_14, %c17, %c0_15, %c0_16] : memref<3x18x16x128xf32, #tpu.memory_space<vmem>>, vector<3x1x16x128xf32>
    tpu.vector_store %arg9[%c0_14, %c17, %c0_15, %c0_16], %15 {strides = array<i32>} : memref<3x18x16x128xf32, #tpu.memory_space<vmem>>, vector<3x1x16x128xf32>,
    %18 = vector.shape_cast %12 : vector<16x16x128xf32> to vector<1x16x16x128xf32>
    %c0_17 = arith.constant 0 : index
    %c1 = arith.constant 1 : index
    %c0_18 = arith.constant 0 : index
    %c0_19 = arith.constant 0 : index
    %19 = vector.load %arg9[%c0_17, %c1, %c0_18, %c0_19] : memref<3x18x16x128xf32, #tpu.memory_space<vmem>>, vector<1x16x16x128xf32>
    tpu.vector_store %arg9[%c0_17, %c1, %c0_18, %c0_19], %18 {strides = array<i32>} : memref<3x18x16x128xf32, #tpu.memory_space<vmem>>, vector<1x16x16x128xf32>,
    %20 = vector.shape_cast %9 : vector<16x16x128xf32> to vector<1x16x16x128xf32>
    %c1_20 = arith.constant 1 : index
    %c1_21 = arith.constant 1 : index
    %c0_22 = arith.constant 0 : index
    %c0_23 = arith.constant 0 : index
    %21 = vector.load %arg9[%c1_20, %c1_21, %c0_22, %c0_23] : memref<3x18x16x128xf32, #tpu.memory_space<vmem>>, vector<1x16x16x128xf32>
    tpu.vector_store %arg9[%c1_20, %c1_21, %c0_22, %c0_23], %20 {strides = array<i32>} : memref<3x18x16x128xf32, #tpu.memory_space<vmem>>, vector<1x16x16x128xf32>,
    %22 = vector.shape_cast %14 : vector<16x16x128xf32> to vector<1x16x16x128xf32>
    %c2 = arith.constant 2 : index
    %c1_24 = arith.constant 1 : index
    %c0_25 = arith.constant 0 : index
    %c0_26 = arith.constant 0 : index
    %23 = vector.load %arg9[%c2, %c1_24, %c0_25, %c0_26] : memref<3x18x16x128xf32, #tpu.memory_space<vmem>>, vector<1x16x16x128xf32>
    tpu.vector_store %arg9[%c2, %c1_24, %c0_25, %c0_26], %22 {strides = array<i32>} : memref<3x18x16x128xf32, #tpu.memory_space<vmem>>, vector<1x16x16x128xf32>,
    %c0_27 = arith.constant 0 : index
    %c0_28 = arith.constant 0 : index
    %c0_29 = arith.constant 0 : index
    %c0_30 = arith.constant 0 : index
    %24 = vector.load %arg9[%c0_27, %c0_28, %c0_29, %c0_30] : memref<3x18x16x128xf32, #tpu.memory_space<vmem>>, vector<1x16x16x128xf32>
    %25 = vector.shape_cast %24 : vector<1x16x16x128xf32> to vector<256x128xf32>
    %c1_31 = arith.constant 1 : index
    %c0_32 = arith.constant 0 : index
    %c0_33 = arith.constant 0 : index
    %c0_34 = arith.constant 0 : index
    %26 = vector.load %arg9[%c1_31, %c0_32, %c0_33, %c0_34] : memref<3x18x16x128xf32, #tpu.memory_space<vmem>>, vector<1x16x16x128xf32>
    %27 = vector.shape_cast %26 : vector<1x16x16x128xf32> to vector<256x128xf32>
    %c2_35 = arith.constant 2 : index
    %c0_36 = arith.constant 0 : index
    %c0_37 = arith.constant 0 : index
    %c0_38 = arith.constant 0 : index
    %28 = vector.load %arg9[%c2_35, %c0_36, %c0_37, %c0_38] : memref<3x18x16x128xf32, #tpu.memory_space<vmem>>, vector<1x16x16x128xf32>
    %29 = vector.shape_cast %28 : vector<1x16x16x128xf32> to vector<256x128xf32>
    %30 = tpu.concatenate %25, %27, %29 in 1 : vector<256x128xf32>, vector<256x128xf32>, vector<256x128xf32> -> vector<256x384xf32>
    %c0_39 = arith.constant 0 : index
    %c0_40 = arith.constant 0 : index
    %c0_41 = arith.constant 0 : index
    %31 = vector.load %arg4[%c0_39, %c0_40, %c0_41] : memref<3x384x128xf32, #tpu.memory_space<vmem>>, vector<1x384x128xf32>
    %32 = vector.shape_cast %31 : vector<1x384x128xf32> to vector<384x128xf32>
    %cst_42 = arith.constant dense<0.000000e+00> : vector<256x128xf32>
    %33 = tpu.matmul %30, %32, %cst_42 {dimension_numbers = #tpu.dot_dimension_numbers<[1], [0], [0], [1], [0, 0, 1, 1], [], []>} : vector<256x384xf32>, vector<384x128xf32>, vector<256x128xf32> -> vector<256x128xf32>
    %c0_43 = arith.constant 0 : index
    %c1_44 = arith.constant 1 : index
    %c0_45 = arith.constant 0 : index
    %c0_46 = arith.constant 0 : index
    %34 = vector.load %arg9[%c0_43, %c1_44, %c0_45, %c0_46] : memref<3x18x16x128xf32, #tpu.memory_space<vmem>>, vector<1x16x16x128xf32>
    %35 = vector.shape_cast %34 : vector<1x16x16x128xf32> to vector<256x128xf32>
    %c1_47 = arith.constant 1 : index
    %c1_48 = arith.constant 1 : index
    %c0_49 = arith.constant 0 : index
    %c0_50 = arith.constant 0 : index
    %36 = vector.load %arg9[%c1_47, %c1_48, %c0_49, %c0_50] : memref<3x18x16x128xf32, #tpu.memory_space<vmem>>, vector<1x16x16x128xf32>
    %37 = vector.shape_cast %36 : vector<1x16x16x128xf32> to vector<256x128xf32>
    %c2_51 = arith.constant 2 : index
    %c1_52 = arith.constant 1 : index
    %c0_53 = arith.constant 0 : index
    %c0_54 = arith.constant 0 : index
    %38 = vector.load %arg9[%c2_51, %c1_52, %c0_53, %c0_54] : memref<3x18x16x128xf32, #tpu.memory_space<vmem>>, vector<1x16x16x128xf32>
    %39 = vector.shape_cast %38 : vector<1x16x16x128xf32> to vector<256x128xf32>
    %40 = tpu.concatenate %35, %37, %39 in 1 : vector<256x128xf32>, vector<256x128xf32>, vector<256x128xf32> -> vector<256x384xf32>
    %c1_55 = arith.constant 1 : index
    %c0_56 = arith.constant 0 : index
    %c0_57 = arith.constant 0 : index
    %41 = vector.load %arg4[%c1_55, %c0_56, %c0_57] : memref<3x384x128xf32, #tpu.memory_space<vmem>>, vector<1x384x128xf32>
    %42 = vector.shape_cast %41 : vector<1x384x128xf32> to vector<384x128xf32>
    %cst_58 = arith.constant dense<0.000000e+00> : vector<256x128xf32>
    %43 = tpu.matmul %40, %42, %cst_58 {dimension_numbers = #tpu.dot_dimension_numbers<[1], [0], [0], [1], [0, 0, 1, 1], [], []>} : vector<256x384xf32>, vector<384x128xf32>, vector<256x128xf32> -> vector<256x128xf32>
    %44 = arith.addf %33, %43 : vector<256x128xf32>
    %c0_59 = arith.constant 0 : index
    %c2_60 = arith.constant 2 : index
    %c0_61 = arith.constant 0 : index
    %c0_62 = arith.constant 0 : index
    %45 = vector.load %arg9[%c0_59, %c2_60, %c0_61, %c0_62] : memref<3x18x16x128xf32, #tpu.memory_space<vmem>>, vector<1x16x16x128xf32>
    %46 = vector.shape_cast %45 : vector<1x16x16x128xf32> to vector<256x128xf32>
    %c1_63 = arith.constant 1 : index
    %c2_64 = arith.constant 2 : index
    %c0_65 = arith.constant 0 : index
    %c0_66 = arith.constant 0 : index
    %47 = vector.load %arg9[%c1_63, %c2_64, %c0_65, %c0_66] : memref<3x18x16x128xf32, #tpu.memory_space<vmem>>, vector<1x16x16x128xf32>
    %48 = vector.shape_cast %47 : vector<1x16x16x128xf32> to vector<256x128xf32>
    %c2_67 = arith.constant 2 : index
    %c2_68 = arith.constant 2 : index
    %c0_69 = arith.constant 0 : index
    %c0_70 = arith.constant 0 : index
    %49 = vector.load %arg9[%c2_67, %c2_68, %c0_69, %c0_70] : memref<3x18x16x128xf32, #tpu.memory_space<vmem>>, vector<1x16x16x128xf32>
    %50 = vector.shape_cast %49 : vector<1x16x16x128xf32> to vector<256x128xf32>
    %51 = tpu.concatenate %46, %48, %50 in 1 : vector<256x128xf32>, vector<256x128xf32>, vector<256x128xf32> -> vector<256x384xf32>
    %c2_71 = arith.constant 2 : index
    %c0_72 = arith.constant 0 : index
    %c0_73 = arith.constant 0 : index
    %52 = vector.load %arg4[%c2_71, %c0_72, %c0_73] : memref<3x384x128xf32, #tpu.memory_space<vmem>>, vector<1x384x128xf32>
    %53 = vector.shape_cast %52 : vector<1x384x128xf32> to vector<384x128xf32>
    %cst_74 = arith.constant dense<0.000000e+00> : vector<256x128xf32>
    %54 = tpu.matmul %51, %53, %cst_74 {dimension_numbers = #tpu.dot_dimension_numbers<[1], [0], [0], [1], [0, 0, 1, 1], [], []>} : vector<256x384xf32>, vector<384x128xf32>, vector<256x128xf32> -> vector<256x128xf32>
    %55 = arith.addf %44, %54 : vector<256x128xf32>
    %c0_75 = arith.constant 0 : index
    %c0_76 = arith.constant 0 : index
    %56 = vector.load %arg5[%c0_75, %c0_76] : memref<1x128xf32, #tpu.memory_space<vmem>>, vector<1x128xf32>
    %57 = vector.broadcast %56 : vector<1x128xf32> to vector<256x128xf32>
    %58 = arith.addf %55, %57 : vector<256x128xf32>
    %cst_77 = arith.constant 0.000000e+00 : f32
    %59 = vector.broadcast %cst_77 : f32 to vector<256x128xf32>
    %60 = arith.maximumf %58, %59 : vector<256x128xf32>
    %c0_78 = arith.constant 0 : index
    %c0_79 = arith.constant 0 : index
    %61 = vector.load %arg6[%c0_78, %c0_79] : memref<128x128xf32, #tpu.memory_space<vmem>>, vector<128x128xf32>
    %cst_80 = arith.constant dense<0.000000e+00> : vector<256x128xf32>
    %62 = tpu.matmul %60, %61, %cst_80 {dimension_numbers = #tpu.dot_dimension_numbers<[1], [0], [0], [1], [0, 0, 1, 1], [], []>} : vector<256x128xf32>, vector<128x128xf32>, vector<256x128xf32> -> vector<256x128xf32>
    %c0_81 = arith.constant 0 : index
    %c0_82 = arith.constant 0 : index
    %c0_83 = arith.constant 0 : index
    %c0_84 = arith.constant 0 : index
    %63 = vector.load %arg1[%c0_81, %c0_82, %c0_83, %c0_84] : memref<1x16x16x128xf32, #tpu.memory_space<vmem>>, vector<1x16x16x128xf32>
    %64 = vector.shape_cast %63 : vector<1x16x16x128xf32> to vector<256x128xf32>
    %c0_85 = arith.constant 0 : index
    %c0_86 = arith.constant 0 : index
    %65 = vector.load %arg7[%c0_85, %c0_86] : memref<1x128xf32, #tpu.memory_space<vmem>>, vector<1x128xf32>
    %66 = vector.broadcast %65 : vector<1x128xf32> to vector<256x128xf32>
    %67 = arith.addf %62, %66 : vector<256x128xf32>
    %68 = arith.addf %67, %64 : vector<256x128xf32>
    %cst_87 = arith.constant 0.000000e+00 : f32
    %69 = vector.broadcast %cst_87 : f32 to vector<256x128xf32>
    %70 = arith.maximumf %68, %69 : vector<256x128xf32>
    %71 = vector.shape_cast %70 : vector<256x128xf32> to vector<1x16x16x128xf32>
    %c0_88 = arith.constant 0 : index
    %c0_89 = arith.constant 0 : index
    %c0_90 = arith.constant 0 : index
    %c0_91 = arith.constant 0 : index
    %72 = vector.load %arg8[%c0_88, %c0_89, %c0_90, %c0_91] : memref<1x16x16x128xf32, #tpu.memory_space<vmem>>, vector<1x16x16x128xf32>
    tpu.vector_store %arg8[%c0_88, %c0_89, %c0_90, %c0_91], %71 {strides = array<i32>} : memref<1x16x16x128xf32, #tpu.memory_space<vmem>>, vector<1x16x16x128xf32>,
    return
  }
  func.func @transform_0(%arg0: i32) -> (i32, i32, i32, i32) {
    %c0_i32 = arith.constant 0 : i32
    %c0_i32_0 = arith.constant 0 : i32
    %c0_i32_1 = arith.constant 0 : i32
    %c0_i32_2 = arith.constant 0 : i32
    return %arg0, %c0_i32, %c0_i32_0, %c0_i32_1 : i32, i32, i32, i32
  }
  func.func @transform_1(%arg0: i32) -> (i32, i32) {
    %c0_i32 = arith.constant 0 : i32
    %c0_i32_0 = arith.constant 0 : i32
    %c0_i32_1 = arith.constant 0 : i32
    return %c0_i32, %c0_i32_0 : i32, i32
  }
  func.func @transform_2(%arg0: i32) -> (i32, i32) {
    %c0_i32 = arith.constant 0 : i32
    %c0_i32_0 = arith.constant 0 : i32
    %c0_i32_1 = arith.constant 0 : i32
    return %c0_i32, %c0_i32_0 : i32, i32
  }
  func.func @transform_3(%arg0: i32) -> (i32, i32, i32) {
    %c0_i32 = arith.constant 0 : i32
    %c0_i32_0 = arith.constant 0 : i32
    %c0_i32_1 = arith.constant 0 : i32
    %c0_i32_2 = arith.constant 0 : i32
    return %c0_i32, %c0_i32_0, %c0_i32_1 : i32, i32, i32
  }
  func.func @transform_4(%arg0: i32) -> (i32, i32) {
    %c0_i32 = arith.constant 0 : i32
    %c0_i32_0 = arith.constant 0 : i32
    %c0_i32_1 = arith.constant 0 : i32
    return %c0_i32, %c0_i32_0 : i32, i32
  }
  func.func @transform_5(%arg0: i32) -> (i32, i32) {
    %c0_i32 = arith.constant 0 : i32
    %c0_i32_0 = arith.constant 0 : i32
    %c0_i32_1 = arith.constant 0 : i32
    return %c0_i32, %c0_i32_0 : i32, i32
  }
  func.func @transform_6(%arg0: i32) -> (i32, i32) {
    %c0_i32 = arith.constant 0 : i32
    %c0_i32_0 = arith.constant 0 : i32
    %c0_i32_1 = arith.constant 0 : i32
    return %c0_i32, %c0_i32_0 : i32, i32
  }
  func.func @transform_7(%arg0: i32) -> (i32, i32, i32, i32) {
    %c0_i32 = arith.constant 0 : i32
    %c0_i32_0 = arith.constant 0 : i32
    %c0_i32_1 = arith.constant 0 : i32
    %c0_i32_2 = arith.constant 0 : i32
    return %arg0, %c0_i32, %c0_i32_0, %c0_i32_1 : i32, i32, i32, i32
  }
}

</mosaic_0001>

<bundles_post_ra>
// kernel: bottleneck_forward.1
= control target key start
LH: loop header
LB: loop body
LE: loop exit
PB: predicated region body
PF: predicated region fallthrough
CT: control target
= control target key end

     0   :  { %s3042_s24 = smov 0   ;;  %s5153_s0 = inlined_call_operand.vmem [shape: f32[2,16,16,128], index: 0, kind: input, shape index: {}]   ;;  %s5154_s1 = inlined_call_operand.vmem [shape: f32[128,128], index: 1, kind: input, shape index: {}]   ;;  %s5155_s2 = inlined_call_operand.vmem [shape: f32[1,128], index: 2, kind: input, shape index: {}]   ;;  %s5156_s3 = inlined_call_operand.vmem [shape: f32[3,384,128], index: 3, kind: input, shape index: {}]   ;;  %s5157_s4 = inlined_call_operand.vmem [shape: f32[1,128], index: 4, kind: input, shape index: {}]   ;;  %s5158_s5 = inlined_call_operand.vmem [shape: f32[128,128], index: 5, kind: input, shape index: {}]   ;;  %s5159_s6 = inlined_call_operand.vmem [shape: f32[1,128], index: 6, kind: input, shape index: {}]   ;;  %s5160_s7 = inlined_call_operand.vmem [shape: f32[2,16,16,128], index: 7, kind: output, shape index: {}]  }
   0x1 LB: > { %s2686_s25 = sadd.s32 4294967295, %s2999_s24   ;;  %p2690_p0 = scmp.ge.s32.totalorder %s2999_s24, 1  ;;  %s2999_s24 = sphi %s3042_s24, %s17_s24  }
   0x2   : > { %p237_p1 = scmp.lt.s32.totalorder %s2999_s24, 3 }
   0x4   : > { %p238_p2 = pnand %p2690_p0, %p237_p1 }
   0x6   : > { %241 = sbr.rel (%p238_p2) target bundleno = 1145 (0x479), region = 48 }
   0xb   : > { %v326_v0 = vld [vmem:[%s5154_s1 + $0x78] sm:$0xff]  ;;  %v325_v1 = vld [vmem:[%s5154_s1 + $0x70] sm:$0xff]  ;;  %v324_v2 = vld [vmem:[%s5154_s1 + $0x68] sm:$0xff]  ;;  %p269_p3 = scmp.lt.s32.totalorder %s2686_s25, 1  ;;  %vm508_vm0 = vcmask 1040384   ;;  %vm605_vm2 = vcmask 1046528  }
   0xc   : > { %331 = vmatpush.msra.mxu0 %v326_v0  ;;  %2933 = vmatpush.msra.mxu3 %v326_v0  ;;  %v323_v3 = vld [vmem:[%s5154_s1 + $0x60] sm:$0xff]  ;;  %v322_v4 = vld [vmem:[%s5154_s1 + $0x58] sm:$0xff]  ;;  %v321_v5 = vld [vmem:[%s5154_s1 + $0x50] sm:$0xff] }
   0xd   : > { %v320_v6 = vld [vmem:[%s5154_s1 + $0x48] sm:$0xff]  ;;  %v319_v7 = vld [vmem:[%s5154_s1 + $0x40] sm:$0xff]  ;;  %v318_v8 = vld [vmem:[%s5154_s1 + $0x38] sm:$0xff]  ;;  %s5532_s25 = smov (!%p269_p3, %s2686_s25), 1 }
   0xe   : > { %332 = vmatpush.msra.mxu0 %v325_v1  ;;  %2934 = vmatpush.msra.mxu3 %v325_v1  ;;  %v317_v9 = vld [vmem:[%s5154_s1 + $0x30] sm:$0xff]  ;;  %v316_v10 = vld [vmem:[%s5154_s1 + $0x28] sm:$0xff]  ;;  %v315_v11 = vld [vmem:[%s5154_s1 + $0x20] sm:$0xff]  ;;  %s2793_s8 = sshll.u32 %s5532_s25, 8 }
   0xf   : > { %v314_v12 = vld [vmem:[%s5154_s1 + $0x18] sm:$0xff]  ;;  %v313_v13 = vld [vmem:[%s5154_s1 + $0x10] sm:$0xff]  ;;  %v312_v14 = vld [vmem:[%s5154_s1 + $0x8] sm:$0xff]  ;;  %s3107_s15 = scalar_lea.vmem %s5153_s0, %s2793_s8  ;;  %s4987_s23 = scalar_lea.vmem %s5160_s7, %s2793_s8 }
  0x10   : > { %333 = vmatpush.msra.mxu0 %v324_v2  ;;  %2935 = vmatpush.msra.mxu3 %v324_v2  ;;  %v311_v15 = vld [vmem:[%s5154_s1] sm:$0xff]  ;;  %v280_v18 = vld [vmem:[%s3107_s15 + $0x8] sm:$0xff]  ;;  %v281_v20 = vld [vmem:[%s3107_s15 + $0x10] sm:$0xff] }
  0x11   : > { %v279_v16 = vld [vmem:[%s3107_s15] sm:$0xff]  ;;  %v304_v19 = vld [vmem:[%s3107_s15 + $0xc8] sm:$0xff]  ;;  %v305_v21 = vld [vmem:[%s3107_s15 + $0xd0] sm:$0xff] }
  0x12   : > { %334 = vmatpush.msra.mxu0 %v323_v3  ;;  %2936 = vmatpush.msra.mxu3 %v323_v3  ;;  %v303_v17 = vld [vmem:[%s3107_s15 + $0xc0] sm:$0xff]  ;;  %v282_v22 = vld [vmem:[%s3107_s15 + $0x18] sm:$0xff]  ;;  %v284_v26 = vld [vmem:[%s3107_s15 + $0x28] sm:$0xff] }
  0x13   : > { %v306_v23 = vld [vmem:[%s3107_s15 + $0xd8] sm:$0xff]  ;;  %v283_v24 = vld [vmem:[%s3107_s15 + $0x20] sm:$0xff]  ;;  %v308_v27 = vld [vmem:[%s3107_s15 + $0xe8] sm:$0xff] }
  0x14   : > { %335 = vmatpush.msra.mxu0 %v322_v4  ;;  %2937 = vmatpush.msra.mxu3 %v322_v4  ;;  %v307_v25 = vld [vmem:[%s3107_s15 + $0xe0] sm:$0xff]  ;;  %v285_v28 = vld [vmem:[%s3107_s15 + $0x30] sm:$0xff]  ;;  %v286_v30 = vld [vmem:[%s3107_s15 + $0x38] sm:$0xff] }
  0x15   : > { %v309_v29 = vld [vmem:[%s3107_s15 + $0xf0] sm:$0xff]  ;;  %v310_v31 = vld [vmem:[%s3107_s15 + $0xf8] sm:$0xff]  ;;  %v287_v32 = vld [vmem:[%s3107_s15 + $0x40] sm:$0xff] }
  0x16   : > { %336 = vmatpush.msra.mxu0 %v321_v5  ;;  %2938 = vmatpush.msra.mxu3 %v321_v5  ;;  %v3132_v33 = vld [vmem:[%s5156_s3 + $0x278] sm:$0xff]  ;;  %v3140_v35 = vld [vmem:[%s5156_s3 + $0x270] sm:$0xff]  ;;  %v3149_v37 = vld [vmem:[%s5156_s3 + $0x268] sm:$0xff] }
  0x17   : > { %v2710_v34 = vld [vmem:[%s5156_s3 + $0x1f8] sm:$0xff]  ;;  %1218 = vmatpush.msra.mxu2 %v3132_v33  ;;  %v2709_v36 = vld [vmem:[%s5156_s3 + $0x1f0] sm:$0xff]  ;;  %v288_v38 = vld [vmem:[%s3107_s15 + $0x48] sm:$0xff] }
  0x18   : > { %337 = vmatpush.msra.mxu0 %v320_v6  ;;  %2939 = vmatpush.msra.mxu3 %v320_v6  ;;  %v2708_v39 = vld [vmem:[%s5156_s3 + $0x1e8] sm:$0xff]  ;;  %v3160_v40 = vld [vmem:[%s5156_s3 + $0x260] sm:$0xff]  ;;  %v3169_v42 = vld [vmem:[%s5156_s3 + $0x258] sm:$0xff] }
  0x19   : > { %1105 = vmatpush.msra.mxu1 %v2710_v34  ;;  %1219 = vmatpush.msra.mxu2 %v3140_v35  ;;  %v2707_v41 = vld [vmem:[%s5156_s3 + $0x1e0] sm:$0xff]  ;;  %v2706_v43 = vld [vmem:[%s5156_s3 + $0x1d8] sm:$0xff]  ;;  %v3177_v44 = vld [vmem:[%s5156_s3 + $0x250] sm:$0xff] }
  0x1a   : > { %338 = vmatpush.msra.mxu0 %v319_v7  ;;  %2940 = vmatpush.msra.mxu3 %v319_v7  ;;  %v2705_v45 = vld [vmem:[%s5156_s3 + $0x1d0] sm:$0xff]  ;;  %v3186_v46 = vld [vmem:[%s5156_s3 + $0x248] sm:$0xff]  ;;  %v3197_v49 = vld [vmem:[%s5156_s3 + $0x240] sm:$0xff] }
  0x1b   : > { %1106 = vmatpush.msra.mxu1 %v2709_v36  ;;  %1220 = vmatpush.msra.mxu2 %v3149_v37  ;;  %v289_v47 = vld [vmem:[%s3107_s15 + $0x50] sm:$0xff]  ;;  %v2704_v48 = vld [vmem:[%s5156_s3 + $0x1c8] sm:$0xff]  ;;  %v2703_v50 = vld [vmem:[%s5156_s3 + $0x1c0] sm:$0xff] }
  0x1c   : > { %339 = vmatpush.msra.mxu0 %v318_v8  ;;  %2941 = vmatpush.msra.mxu3 %v318_v8  ;;  %v3206_v51 = vld [vmem:[%s5156_s3 + $0x238] sm:$0xff]  ;;  %v3214_v53 = vld [vmem:[%s5156_s3 + $0x230] sm:$0xff]  ;;  %v3223_v55 = vld [vmem:[%s5156_s3 + $0x228] sm:$0xff] }
  0x1d   : > { %1107 = vmatpush.msra.mxu1 %v2708_v39  ;;  %1221 = vmatpush.msra.mxu2 %v3160_v40  ;;  %v2702_v52 = vld [vmem:[%s5156_s3 + $0x1b8] sm:$0xff]  ;;  %v2701_v54 = vld [vmem:[%s5156_s3 + $0x1b0] sm:$0xff]  ;;  %v2700_v57 = vld [vmem:[%s5156_s3 + $0x1a8] sm:$0xff] }
  0x1e   : > { %340 = vmatpush.msra.mxu0 %v317_v9  ;;  %2942 = vmatpush.msra.mxu3 %v317_v9  ;;  %v290_v56 = vld [vmem:[%s3107_s15 + $0x58] sm:$0xff]  ;;  %v2715_v58 = vld [vmem:[%s5156_s3 + $0x220] sm:$0xff]  ;;  %v2713_v62 = vld [vmem:[%s5156_s3 + $0x210] sm:$0xff] }
  0x1f   : > { %1108 = vmatpush.msra.mxu1 %v2707_v41  ;;  %1222 = vmatpush.msra.mxu2 %v3169_v42  ;;  %v2699_v59 = vld [vmem:[%s5156_s3 + $0x1a0] sm:$0xff]  ;;  %v2714_v60 = vld [vmem:[%s5156_s3 + $0x218] sm:$0xff]  ;;  %v2697_v0 = vld [vmem:[%s5156_s3 + $0x190] sm:$0xff] }
  0x20   : > { %341 = vmatpush.msra.mxu0 %v316_v10  ;;  %2943 = vmatpush.msra.mxu3 %v316_v10  ;;  %v2698_v61 = vld [vmem:[%s5156_s3 + $0x198] sm:$0xff]  ;;  %v291_v63 = vld [vmem:[%s3107_s15 + $0x60] sm:$0xff]  ;;  %v2712_v1 = vld [vmem:[%s5156_s3 + $0x208] sm:$0xff] }
  0x21   : > { %1109 = vmatpush.msra.mxu1 %v2706_v43  ;;  %1223 = vmatpush.msra.mxu2 %v3177_v44  ;;  %v2696_v2 = vld [vmem:[%s5156_s3 + $0x188] sm:$0xff]  ;;  %v2711_v3 = vld [vmem:[%s5156_s3 + $0x200] sm:$0xff]  ;;  %v927_v6 = vld [vmem:[%s5156_s3 + $0x78] sm:$0xff] }
  0x22   : > { %342 = vmatpush.msra.mxu0 %v315_v11  ;;  %2944 = vmatpush.msra.mxu3 %v315_v11  ;;  %v2695_v4 = vld [vmem:[%s5156_s3 + $0x180] sm:$0xff]  ;;  %v292_v5 = vld [vmem:[%s3107_s15 + $0x68] sm:$0xff]  ;;  %v943_v7 = vld [vmem:[%s5156_s3 + $0xf8] sm:$0xff] }
  0x23   : > { %1110 = vmatpush.msra.mxu1 %v2705_v45  ;;  %1224 = vmatpush.msra.mxu2 %v3186_v46  ;;  %v293_v8 = vld [vmem:[%s3107_s15 + $0x70] sm:$0xff]  ;;  %v294_v11 = vld [vmem:[%s3107_s15 + $0x78] sm:$0xff]  ;;  %vm3304_vm1 = vmneg %vm508_vm0 }
  0x24   : > { %343 = vmatpush.msra.mxu0 %v314_v12  ;;  %2945 = vmatpush.msra.mxu3 %v314_v12  ;;  %v926_v9 = vld [vmem:[%s5156_s3 + $0x70] sm:$0xff]  ;;  %v3290_v12 = vld [vmem:[%s5155_s2] ss:$0 sm:$0xff] }
  0x25   : > { %1111 = vmatpush.msra.mxu1 %v2704_v48  ;;  %1225 = vmatpush.msra.mxu2 %v3197_v49  ;;  %v942_v10 = vld [vmem:[%s5156_s3 + $0xf0] sm:$0xff] }
  0x26   : > { %344 = vmatpush.msra.mxu0 %v313_v13  ;;  %2946 = vmatpush.msra.mxu3 %v313_v13 }
  0x27   : > { %1112 = vmatpush.msra.mxu1 %v2703_v50  ;;  %1226 = vmatpush.msra.mxu2 %v3206_v51 }
  0x28   : > { %345 = vmatpush.msra.mxu0 %v312_v14  ;;  %2947 = vmatpush.msra.mxu3 %v312_v14  ;;  %v295_v14 = vld [vmem:[%s3107_s15 + $0x80] sm:$0xff] }
  0x29   : > { %1113 = vmatpush.msra.mxu1 %v2702_v52  ;;  %1227 = vmatpush.msra.mxu2 %v3214_v53 }
  0x2a   : > { %346 = vmatpush.msra.mxu0 %v311_v15  ;;  %2948 = vmatpush.msra.mxu3 %v311_v15 }
  0x2b   : > { %347 = vmatmul.f32.vlgmr.msra.gmra.mxu0 %v279_v16  ;;  %419 = vmatmul.f32.vlgmr.msra.gmra.mxu3 %v303_v17  ;;  %v925_v16 = vld [vmem:[%s5156_s3 + $0x68] sm:$0xff] }
  0x2c   : > { %2949 = vmatpush.msrb.mxu3 %v2710_v34  ;;  %1114 = vmatpush.msra.mxu1 %v2701_v54 }
  0x2d   : > { %1228 = vmatpush.msra.mxu2 %v3223_v55  ;;  %1444 = vmatpush.msrb.mxu0 %v927_v6 }
  0x2e   : > { %2950 = vmatpush.msrb.mxu3 %v2709_v36  ;;  %1115 = vmatpush.msra.mxu1 %v2700_v57 }
  0x2f   : > { %1229 = vmatpush.msra.mxu2 %v2715_v58  ;;  %1445 = vmatpush.msrb.mxu0 %v926_v9 }
  0x30   : > { %2951 = vmatpush.msrb.mxu3 %v2708_v39  ;;  %1116 = vmatpush.msra.mxu1 %v2699_v59  ;;  %v297_v39 = vld [vmem:[%s3107_s15 + $0x90] sm:$0xff] }
  0x31   : > { %1230 = vmatpush.msra.mxu2 %v2714_v60  ;;  %1446 = vmatpush.msrb.mxu0 %v925_v16 }
  0x32   : > { %2952 = vmatpush.msrb.mxu3 %v2707_v41  ;;  %1117 = vmatpush.msra.mxu1 %v2698_v61 }
  0x33   : > { %350 = vmatmul.f32.gmra.mxu0 %v280_v18  ;;  %422 = vmatmul.f32.gmra.mxu3 %v304_v19  ;;  %v941_v18 = vld [vmem:[%s5156_s3 + $0xe8] sm:$0xff] }
  0x34   : > { %2953 = vmatpush.msrb.mxu3 %v2706_v43  ;;  %1231 = vmatpush.msra.mxu2 %v2713_v62 }
  0x35   : > { %1118 = vmatpush.msra.mxu1 %v2697_v0 }
  0x36   : > { %2954 = vmatpush.msrb.mxu3 %v2705_v45  ;;  %1232 = vmatpush.msra.mxu2 %v2712_v1  ;;  %v919_v45 = vld [vmem:[%s5156_s3 + $0x38] sm:$0xff] }
  0x37   : > { %1119 = vmatpush.msra.mxu1 %v2696_v2 }
  0x38   : > { %2955 = vmatpush.msrb.mxu3 %v2704_v48  ;;  %1233 = vmatpush.msra.mxu2 %v2711_v3  ;;  %v918_v48 = vld [vmem:[%s5156_s3 + $0x30] sm:$0xff] }
  0x39   : > { %1120 = vmatpush.msra.mxu1 %v2695_v4 }
  0x3a   : > { %2956 = vmatpush.msrb.mxu3 %v2703_v50 }
  0x3b   : > { %353 = vmatmul.f32.gmra.mxu0 %v281_v20  ;;  %425 = vmatmul.f32.gmra.mxu3 %v305_v21 }
  0x3c   : > { %2957 = vmatpush.msrb.mxu3 %v2702_v52  ;;  %1557 = vmatpush.msrb.mxu1 %v943_v7  ;;  %v912_v7 = vld [vmem:[%s5156_s3] sm:$0xff] }
  0x3e   : > { %2958 = vmatpush.msrb.mxu3 %v2701_v54  ;;  %1558 = vmatpush.msrb.mxu1 %v942_v10  ;;  %v938_v10 = vld [vmem:[%s5156_s3 + $0xd0] sm:$0xff] }
  0x40   : > { %2959 = vmatpush.msrb.mxu3 %v2700_v57  ;;  %1559 = vmatpush.msrb.mxu1 %v941_v18  ;;  %v300_v18 = vld [vmem:[%s3107_s15 + $0xa8] sm:$0xff] }
  0x42   : > { %2960 = vmatpush.msrb.mxu3 %v2699_v59  ;;  %v939_v59 = vld [vmem:[%s5156_s3 + $0xd8] sm:$0xff] }
  0x43   : > { %356 = vmatmul.f32.gmra.mxu0 %v282_v22  ;;  %428 = vmatmul.f32.gmra.mxu3 %v306_v23 }
  0x44   : > { %2961 = vmatpush.msrb.mxu3 %v2698_v61 }
  0x46   : > { %2962 = vmatpush.msrb.mxu3 %v2697_v0 }
  0x48   : > { %2963 = vmatpush.msrb.mxu3 %v2696_v2  ;;  %v913_v2 = vld [vmem:[%s5156_s3 + $0x8] sm:$0xff] }
  0x4a   : > { %2964 = vmatpush.msrb.mxu3 %v2695_v4  ;;  %v299_v4 = vld [vmem:[%s3107_s15 + $0xa0] sm:$0xff] }
  0x4b   : > { %359 = vmatmul.f32.gmra.mxu0 %v283_v24  ;;  %431 = vmatmul.f32.gmra.mxu3 %v307_v25  ;;  %v296_v24 = vld [vmem:[%s3107_s15 + $0x88] sm:$0xff] }
  0x4c   : > { %2965 = vmatpush.msra.mxu3 %v3132_v33  ;;  %v922_v33 = vld [vmem:[%s5156_s3 + $0x50] sm:$0xff] }
  0x4e   : > { %2966 = vmatpush.msra.mxu3 %v3140_v35 }
  0x50   : > { %2967 = vmatpush.msra.mxu3 %v3149_v37  ;;  %v921_v37 = vld [vmem:[%s5156_s3 + $0x48] sm:$0xff] }
  0x52   : > { %2968 = vmatpush.msra.mxu3 %v3160_v40 }
  0x53   : > { %362 = vmatmul.f32.gmra.mxu0 %v284_v26  ;;  %434 = vmatmul.f32.gmra.mxu3 %v308_v27  ;;  %v924_v27 = vld [vmem:[%s5156_s3 + $0x60] sm:$0xff] }
  0x54   : > { %2969 = vmatpush.msra.mxu3 %v3169_v42  ;;  %1447 = vmatpush.msrb.mxu0 %v924_v27  ;;  %v920_v42 = vld [vmem:[%s5156_s3 + $0x40] sm:$0xff] }
  0x56   : > { %2970 = vmatpush.msra.mxu3 %v3177_v44 }
  0x58   : > { %2971 = vmatpush.msra.mxu3 %v3186_v46 }
  0x5a   : > { %2972 = vmatpush.msra.mxu3 %v3197_v49 }
  0x5b   : > { %365 = vmatmul.f32.gmra.mxu0 %v285_v28  ;;  %437 = vmatmul.f32.gmra.mxu3 %v309_v29 }
  0x5c   : > { %2973 = vmatpush.msra.mxu3 %v3206_v51  ;;  %v917_v51 = vld [vmem:[%s5156_s3 + $0x28] sm:$0xff] }
  0x5e   : > { %2974 = vmatpush.msra.mxu3 %v3214_v53  ;;  %v298_v53 = vld [vmem:[%s3107_s15 + $0x98] sm:$0xff] }
  0x60   : > { %2975 = vmatpush.msra.mxu3 %v3223_v55 }
  0x62   : > { %2976 = vmatpush.msra.mxu3 %v2715_v58 }
  0x63   : > { %368 = vmatmul.f32.gmra.mxu0 %v286_v30  ;;  %440 = vmatmul.f32.gmra.mxu3 %v310_v31  ;;  %v923_v30 = vld [vmem:[%s5156_s3 + $0x58] sm:$0xff]  ;;  %v940_v31 = vld [vmem:[%s5156_s3 + $0xe0] sm:$0xff] }
  0x64   : > { %2977 = vmatpush.msra.mxu3 %v2714_v60  ;;  %1448 = vmatpush.msrb.mxu0 %v923_v30  ;;  %v915_v60 = vld [vmem:[%s5156_s3 + $0x18] sm:$0xff] }
  0x65   : > { %1560 = vmatpush.msrb.mxu1 %v940_v31 }
  0x66   : > { %2978 = vmatpush.msra.mxu3 %v2713_v62  ;;  %1449 = vmatpush.msrb.mxu0 %v922_v33  ;;  %v914_v62 = vld [vmem:[%s5156_s3 + $0x10] sm:$0xff] }
  0x67   : > { %1561 = vmatpush.msrb.mxu1 %v939_v59  ;;  %v301_v33 = vld [vmem:[%s3107_s15 + $0xb0] sm:$0xff] }
  0x68   : > { %2979 = vmatpush.msra.mxu3 %v2712_v1  ;;  %1450 = vmatpush.msrb.mxu0 %v921_v37 }
  0x69   : > { %1562 = vmatpush.msrb.mxu1 %v938_v10 }
  0x6a   : > { %2980 = vmatpush.msra.mxu3 %v2711_v3  ;;  %1451 = vmatpush.msrb.mxu0 %v920_v42 }
  0x6b   : > { %371 = vmatmul.f32.gmra.mxu0 %v287_v32 }
  0x6c   : > { %1452 = vmatpush.msrb.mxu0 %v919_v45 }
  0x6e   : > { %1453 = vmatpush.msrb.mxu0 %v918_v48 }
  0x70   : > { %1454 = vmatpush.msrb.mxu0 %v917_v51 }
  0x73   : > { %374 = vmatmul.f32.gmra.mxu0 %v288_v38 }
  0x7b   : > { %377 = vmatmul.f32.gmra.mxu0 %v289_v47 }
  0x83   : > { %380 = vmatmul.f32.gmra.mxu0 %v290_v56  ;;  %v916_v56 = vld [vmem:[%s5156_s3 + $0x20] sm:$0xff] }
  0x84   : > { %1455 = vmatpush.msrb.mxu0 %v916_v56 }
  0x86   : > { %1456 = vmatpush.msrb.mxu0 %v915_v60 }
  0x88   : > { %1457 = vmatpush.msrb.mxu0 %v914_v62 }
  0x8a   : > { %1458 = vmatpush.msrb.mxu0 %v913_v2 }
  0x8b   : > { %383 = vmatmul.f32.gmra.mxu0 %v291_v63 }
  0x8c   : > { %1459 = vmatpush.msrb.mxu0 %v912_v7 }
  0x93   : > { %386 = vmatmul.f32.gmra.mxu0 %v292_v5 }
  0x9b   : > { %389 = vmatmul.f32.gmra.mxu0 %v293_v8 }
  0xa3   : > { %392 = vmatmul.f32.gmra.mxu0 %v294_v11 }
  0xa8   : > { %v348_v13 = vpop.f32.mrf.mxu0 }
  0xa9   : > { %v349_v15 = vadd.f32 %v3290_v12, %v348_v13 }
  0xab   : > { %v3298_v17 = vmax.f32 %v349_v15, 0.0  ;;  %395 = vmatmul.f32.gmra.mxu0 %v295_v14 }
  0xad   : > { %1234 = vmatmul.f32.vlgmr.msra.gmra.mxu2 %v3298_v17  ;;  %v3310_v20 = vrot.slane %v3298_v17, 7 }
  0xae   : > { %v420_v21 = vpop.f32.mrf.mxu3 }
  0xaf   : > { %v421_v22 = vadd.f32 %v3290_v12, %v420_v21  ;;  %2796 = vmatmul.msk.f32.vlgmr.msra.gmra.mxu1 %vm3304_vm1, %v3310_v20 }
  0xb0   : > { %v351_v23 = vpop.f32.mrf.mxu0 }
  0xb1   : > { %v3317_v25 = vmax.f32 %v421_v22, 0.0  ;;  %v352_v26 = vadd.f32 %v3290_v12, %v351_v23 }
  0xb3   : > { %5236 = vst [vmem:[#allocation3_spill] sm:$0xff] %v3317_v25  ;;  %v3323_v28 = vmax.f32 %v352_v26, 0.0  ;;  %398 = vmatmul.f32.gmra.mxu0 %v296_v24  ;;  %v3326_v29 = vrot.slane %v3317_v25, 7 }
  0xb5   : > { %5237 = vst [vmem:[#allocation4_spill] sm:$0xff] %v3326_v29  ;;  %1237 = vmatmul.f32.gmra.mxu2 %v3323_v28  ;;  %2820 = vmatmul.msk.f32.vlgmr.msrb.gmra.mxu3 %vm3304_vm1, %v3326_v29  ;;  %v510_v32 = vrot.slane %v3323_v28, 7 }
  0xb6   : > { %v423_v34 = vpop.f32.mrf.mxu3 }
  0xb7   : > { %v424_v35 = vadd.f32 %v3290_v12, %v423_v34  ;;  %v3345_v36 = vsel %vm508_vm0, %v3310_v20, %v510_v32 }
  0xb8   : > { %v354_v38 = vpop.f32.mrf.mxu0  ;;  %1124 = vmatmul.f32.gmra.mxu1 %v3345_v36 }
  0xb9   : > { %v3352_v40 = vmax.f32 %v424_v35, 0.0  ;;  %v355_v41 = vadd.f32 %v3290_v12, %v354_v38 }
  0xbb   : > { %5238 = vst [vmem:[#allocation5_spill] sm:$0xff] %v3352_v40  ;;  %v3358_v43 = vmax.f32 %v355_v41, 0.0  ;;  %401 = vmatmul.f32.gmra.mxu0 %v297_v39  ;;  %v546_v44 = vrot.slane %v3352_v40, 7  ;;  %v937_v39 = vld [vmem:[%s5156_s3 + $0xc8] sm:$0xff] }
  0xbc   : > { %1563 = vmatpush.msrb.mxu1 %v937_v39 }
  0xbd   : > { %1240 = vmatmul.f32.gmra.mxu2 %v3358_v43  ;;  %v3367_v46 = vsel %vm508_vm0, %v3326_v29, %v546_v44  ;;  %v3370_v47 = vrot.slane %v3358_v43, 7 }
  0xbe   : > { %5239 = vst [vmem:[#allocation6_spill] sm:$0xff] %v3367_v46  ;;  %v426_v49 = vpop.f32.mrf.mxu3  ;;  %1196 = vmatmul.f32.gmra.mxu3 %v3367_v46 }
  0xbf   : > { %5240 = vst [vmem:[#allocation7_spill] sm:$0xff] %v3370_v47  ;;  %v427_v50 = vadd.f32 %v3290_v12, %v426_v49  ;;  %v302_v49 = vld [vmem:[%s3107_s15 + $0xb8] sm:$0xff] }
  0xc0   : > { %v357_v52 = vpop.f32.mrf.mxu0  ;;  %2798 = vmatmul.msk.f32.gmra.mxu1 %vm3304_vm1, %v3370_v47 }
  0xc1   : > { %v3384_v54 = vmax.f32 %v427_v50, 0.0  ;;  %v358_v55 = vadd.f32 %v3290_v12, %v357_v52 }
  0xc3   : > { %5241 = vst [vmem:[#allocation8_spill] sm:$0xff] %v3384_v54  ;;  %v3390_v57 = vmax.f32 %v358_v55, 0.0  ;;  %404 = vmatmul.f32.gmra.mxu0 %v298_v53  ;;  %v3393_v58 = vrot.slane %v3384_v54, 7  ;;  %v936_v55 = vld [vmem:[%s5156_s3 + $0xc0] sm:$0xff] }
  0xc4   : > { %1564 = vmatpush.msrb.mxu1 %v936_v55  ;;  %v2735_v55 = vld [vmem:[%s5156_s3 + $0x2c0] sm:$0xff] }
  0xc5   : > { %5242 = vst [vmem:[#allocation9_spill] sm:$0xff] %v3393_v58  ;;  %1243 = vmatmul.f32.gmra.mxu2 %v3390_v57  ;;  %v513_v61 = vrot.slane %v3390_v57, 7 }
  0xc6   : > { %v429_v63 = vpop.f32.mrf.mxu3  ;;  %2822 = vmatmul.msk.f32.gmra.mxu3 %vm3304_vm1, %v3393_v58 }
  0xc7   : > { %v430_v0 = vadd.f32 %v3290_v12, %v429_v63  ;;  %v3412_v1 = vsel %vm508_vm0, %v3370_v47, %v513_v61 }
  0xc8   : > { %5243 = vst [vmem:[#allocation10_spill] sm:$0xff] %v3412_v1  ;;  %v360_v3 = vpop.f32.mrf.mxu0  ;;  %1130 = vmatmul.f32.gmra.mxu1 %v3412_v1 }
  0xc9   : > { %v3419_v5 = vmax.f32 %v430_v0, 0.0  ;;  %v361_v6 = vadd.f32 %v3290_v12, %v360_v3  ;;  %v5161_v3 = vmov 0.0  }
  0xcb   : > { %5244 = vst [vmem:[#allocation11_spill] sm:$0xff] %v3419_v5  ;;  %v3425_v8 = vmax.f32 %v361_v6, 0.0  ;;  %407 = vmatmul.f32.gmra.mxu0 %v299_v4  ;;  %v549_v9 = vrot.slane %v3419_v5, 7 }
  0xcd   : > { %1246 = vmatmul.f32.gmra.mxu2 %v3425_v8  ;;  %v3434_v11 = vsel %vm508_vm0, %v3393_v58, %v549_v9  ;;  %v3437_v13 = vrot.slane %v3425_v8, 7 }
  0xce   : > { %5245 = vst [vmem:[#allocation12_spill] sm:$0xff] %v3434_v11  ;;  %v432_v14 = vpop.f32.mrf.mxu3  ;;  %1202 = vmatmul.f32.gmra.mxu3 %v3434_v11 }
  0xcf   : > { %5246 = vst [vmem:[#allocation13_spill] sm:$0xff] %v3437_v13  ;;  %v433_v15 = vadd.f32 %v3290_v12, %v432_v14 }
  0xd0   : > { %v363_v16 = vpop.f32.mrf.mxu0  ;;  %2800 = vmatmul.msk.f32.gmra.mxu1 %vm3304_vm1, %v3437_v13 }
  0xd1   : > { %v3445_v21 = vmax.f32 %v433_v15, 0.0  ;;  %v364_v22 = vadd.f32 %v3290_v12, %v363_v16  ;;  %v935_v15 = vld [vmem:[%s5156_s3 + $0xb8] sm:$0xff] }
  0xd2   : > { %1565 = vmatpush.msrb.mxu1 %v935_v15  ;;  %v2731_v15 = vld [vmem:[%s5156_s3 + $0x2a0] sm:$0xff] }
  0xd3   : > { %5247 = vst [vmem:[#allocation14_spill] sm:$0xff] %v3445_v21  ;;  %v3448_v23 = vmax.f32 %v364_v22, 0.0  ;;  %410 = vmatmul.f32.gmra.mxu0 %v300_v18  ;;  %v3451_v24 = vrot.slane %v3445_v21, 7  ;;  %v2742_v18 = vld [vmem:[%s5156_s3 + $0x2f8] sm:$0xff] }
  0xd4   : > { %1331 = vmatpush.msrb.mxu3 %v2742_v18  ;;  %v2730_v18 = vld [vmem:[%s5156_s3 + $0x298] sm:$0xff] }
  0xd5   : > { %5248 = vst [vmem:[#allocation15_spill] sm:$0xff] %v3451_v24  ;;  %1249 = vmatmul.f32.gmra.mxu2 %v3448_v23  ;;  %v516_v26 = vrot.slane %v3448_v23, 7 }
  0xd6   : > { %v435_v27 = vpop.f32.mrf.mxu3  ;;  %2824 = vmatmul.msk.f32.gmra.mxu3 %vm3304_vm1, %v3451_v24 }
  0xd7   : > { %v436_v30 = vadd.f32 %v3290_v12, %v435_v27  ;;  %v3461_v31 = vsel %vm508_vm0, %v3437_v13, %v516_v26  ;;  %v2741_v27 = vld [vmem:[%s5156_s3 + $0x2f0] sm:$0xff] }
  0xd8   : > { %5249 = vst [vmem:[#allocation16_spill] sm:$0xff] %v3461_v31  ;;  %v366_v32 = vpop.f32.mrf.mxu0  ;;  %1136 = vmatmul.f32.gmra.mxu1 %v3461_v31  ;;  %1332 = vmatpush.msrb.mxu3 %v2741_v27  ;;  %v2729_v27 = vld [vmem:[%s5156_s3 + $0x290] sm:$0xff] }
  0xd9   : > { %v3465_v34 = vmax.f32 %v436_v30, 0.0  ;;  %v367_v35 = vadd.f32 %v3290_v12, %v366_v32  ;;  %v2740_v32 = vld [vmem:[%s5156_s3 + $0x2e8] sm:$0xff] }
  0xda   : > { %1333 = vmatpush.msrb.mxu3 %v2740_v32  ;;  %v2728_v32 = vld [vmem:[%s5156_s3 + $0x288] sm:$0xff] }
  0xdb   : > { %5250 = vst [vmem:[#allocation17_spill] sm:$0xff] %v3465_v34  ;;  %v3468_v37 = vmax.f32 %v367_v35, 0.0  ;;  %413 = vmatmul.f32.gmra.mxu0 %v301_v33  ;;  %v552_v38 = vrot.slane %v3465_v34, 7  ;;  %v934_v35 = vld [vmem:[%s5156_s3 + $0xb0] sm:$0xff] }
  0xdc   : > { %1566 = vmatpush.msrb.mxu1 %v934_v35 }
  0xdd   : > { %1252 = vmatmul.f32.gmra.mxu2 %v3468_v37  ;;  %v3477_v41 = vsel %vm508_vm0, %v3451_v24, %v552_v38  ;;  %v3480_v42 = vrot.slane %v3468_v37, 7  ;;  %v2739_v38 = vld [vmem:[%s5156_s3 + $0x2e0] sm:$0xff]  ;;  %v615_v24 = vrot.slane %v3468_v37, 1 }
  0xde   : > { %5251 = vst [vmem:[#allocation18_spill] sm:$0xff] %v3477_v41  ;;  %v438_v44 = vpop.f32.mrf.mxu3  ;;  %1208 = vmatmul.f32.gmra.mxu3 %v3477_v41 }
  0xdf   : > { %5252 = vst [vmem:[#allocation19_spill] sm:$0xff] %v3480_v42  ;;  %v439_v45 = vadd.f32 %v3290_v12, %v438_v44  ;;  %1334 = vmatpush.msrb.mxu3 %v2739_v38  ;;  %v932_v38 = vld [vmem:[%s5156_s3 + $0xa0] sm:$0xff] }
  0xe0   : > { %v369_v48 = vpop.f32.mrf.mxu0  ;;  %2802 = vmatmul.msk.f32.gmra.mxu1 %vm3304_vm1, %v3480_v42 }
  0xe1   : > { %v3488_v50 = vmax.f32 %v439_v45, 0.0  ;;  %v370_v51 = vadd.f32 %v3290_v12, %v369_v48  ;;  %v2737_v45 = vld [vmem:[%s5156_s3 + $0x2d0] sm:$0xff] }
  0xe3   : > { %5253 = vst [vmem:[#allocation20_spill] sm:$0xff] %v3488_v50  ;;  %v3491_v52 = vmax.f32 %v370_v51, 0.0  ;;  %416 = vmatmul.f32.gmra.mxu0 %v302_v49  ;;  %v3494_v53 = vrot.slane %v3488_v50, 7  ;;  %v2736_v49 = vld [vmem:[%s5156_s3 + $0x2c8] sm:$0xff] }
  0xe5   : > { %5254 = vst [vmem:[#allocation21_spill] sm:$0xff] %v3494_v53  ;;  %1255 = vmatmul.f32.gmra.mxu2 %v3491_v52  ;;  %v519_v56 = vrot.slane %v3491_v52, 7  ;;  %v3901_v41 = vrot.slane %v3491_v52, 1 }
  0xe6   : > { %v441_v59 = vpop.f32.mrf.mxu3  ;;  %2826 = vmatmul.msk.f32.gmra.mxu3 %vm3304_vm1, %v3494_v53 }
  0xe7   : > { %v442_v60 = vadd.f32 %v3290_v12, %v441_v59  ;;  %v3507_v61 = vsel %vm508_vm0, %v3480_v42, %v519_v56  ;;  %v2734_v59 = vld [vmem:[%s5156_s3 + $0x2b8] sm:$0xff]  ;;  %5283 = vst [vmem:[#allocation50_spill] sm:$0xff] %v3901_v41 }
  0xe8   : > { %5255 = vst [vmem:[#allocation22_spill] sm:$0xff] %v3507_v61  ;;  %v372_v62 = vpop.f32.mrf.mxu0  ;;  %1142 = vmatmul.f32.gmra.mxu1 %v3507_v61 }
  0xe9   : > { %v3510_v63 = vmax.f32 %v442_v60, 0.0  ;;  %v373_v0 = vadd.f32 %v3290_v12, %v372_v62  ;;  %v2733_v62 = vld [vmem:[%s5156_s3 + $0x2b0] sm:$0xff] }
  0xeb   : > { %5256 = vst [vmem:[#allocation23_spill] sm:$0xff] %v3510_v63  ;;  %v3513_v2 = vmax.f32 %v373_v0, 0.0  ;;  %1460 = vmatmul.f32.vlgmr.msrb.gmra.mxu0 %v5161_v3  ;;  %v555_v4 = vrot.slane %v3510_v63, 7 }
  0xed   : > { %1258 = vmatmul.f32.gmra.mxu2 %v3513_v2  ;;  %v3520_v6 = vsel %vm508_vm0, %v3494_v53, %v555_v4  ;;  %v3523_v7 = vrot.slane %v3513_v2, 7  ;;  %v2732_v4 = vld [vmem:[%s5156_s3 + $0x2a8] sm:$0xff] }
  0xee   : > { %5257 = vst [vmem:[#allocation24_spill] sm:$0xff] %v3520_v6  ;;  %1214 = vmatmul.f32.gmra.mxu3 %v3520_v6 }
  0xef   : > { %5258 = vst [vmem:[#allocation25_spill] sm:$0xff] %v3523_v7 }
  0xf0   : > { %v375_v9 = vpop.f32.mrf.mxu0  ;;  %2804 = vmatmul.msk.f32.gmra.mxu1 %vm3304_vm1, %v3523_v7 }
  0xf1   : > { %v376_v10 = vadd.f32 %v3290_v12, %v375_v9 }
  0xf3   : > { %v3530_v14 = vmax.f32 %v376_v10, 0.0  ;;  %1463 = vmatmul.f32.gmra.mxu0 %v5161_v3  ;;  %v933_v10 = vld [vmem:[%s5156_s3 + $0xa8] sm:$0xff] }
  0xf4   : > { %1567 = vmatpush.msrb.mxu1 %v933_v10  ;;  %v958_v10 = vld [vmem:[%s5156_s3 + $0x170] sm:$0xff] }
  0xf5   : > { %1261 = vmatmul.f32.gmra.mxu2 %v3530_v14  ;;  %v522_v16 = vrot.slane %v3530_v14, 7 }
  0xf6   : > { %1306 = vmatmul.f32.vlgmr.msra.gmra.mxu3 %v3317_v25  ;;  %1568 = vmatpush.msrb.mxu1 %v932_v38 }
  0xf7   : > { %v3544_v22 = vsel %vm508_vm0, %v3523_v7, %v522_v16 }
  0xf8   : > { %5259 = vst [vmem:[#allocation26_spill] sm:$0xff] %v3544_v22  ;;  %v378_v26 = vpop.f32.mrf.mxu0  ;;  %1148 = vmatmul.f32.gmra.mxu1 %v3544_v22 }
  0xf9   : > { %v379_v30 = vadd.f32 %v3290_v12, %v378_v26 }
  0xfb   : > { %v3554_v33 = vmax.f32 %v379_v30, 0.0  ;;  %2844 = vmatmul.msk.f32.gmra.mxu0 %vm3304_vm1, %v3310_v20  ;;  %v2738_v20 = vld [vmem:[%s5156_s3 + $0x2d8] sm:$0xff] }
  0xfc   : > { %1335 = vmatpush.msrb.mxu3 %v2738_v20  ;;  %v2727_v20 = vld [vmem:[%s5156_s3 + $0x280] sm:$0xff] }
  0xfd   : > { %1264 = vmatmul.f32.gmra.mxu2 %v3554_v33  ;;  %v3567_v39 = vrot.slane %v3554_v33, 7 }
  0xfe   : > { %1309 = vmatmul.f32.gmra.mxu3 %v3352_v40 }
  0xff   : > { %5260 = vst [vmem:[#allocation27_spill] sm:$0xff] %v3567_v39  ;;  %1336 = vmatpush.msrb.mxu3 %v2737_v45  ;;  %v959_v45 = vld [vmem:[%s5156_s3 + $0x178] sm:$0xff] }
 0x100   : > { %v381_v44 = vpop.f32.mrf.mxu0  ;;  %2806 = vmatmul.msk.f32.gmra.mxu1 %vm3304_vm1, %v3567_v39  ;;  %1670 = vmatpush.msrb.mxu2 %v959_v45 }
 0x101   : > { %v382_v48 = vadd.f32 %v3290_v12, %v381_v44  ;;  %1337 = vmatpush.msrb.mxu3 %v2736_v49 }
 0x102   : > { %1671 = vmatpush.msrb.mxu2 %v958_v10  ;;  %v606_v10 = vrot.slane %v3298_v17, 1 }
 0x103   : > { %v3583_v51 = vmax.f32 %v382_v48, 0.0  ;;  %1469 = vmatmul.f32.gmra.mxu0 %v3345_v36  ;;  %1338 = vmatpush.msrb.mxu3 %v2735_v55 }
 0x105   : > { %1267 = vmatmul.f32.gmra.mxu2 %v3583_v51  ;;  %v525_v56 = vrot.slane %v3583_v51, 7  ;;  %1339 = vmatpush.msrb.mxu3 %v2734_v59 }
 0x106   : > { %1312 = vmatmul.f32.gmra.mxu3 %v3384_v54 }
 0x107   : > { %v3597_v60 = vsel %vm508_vm0, %v3567_v39, %v525_v56  ;;  %1340 = vmatpush.msrb.mxu3 %v2733_v62 }
 0x108   : > { %5261 = vst [vmem:[#allocation28_spill] sm:$0xff] %v3597_v60  ;;  %v384_v36 = vpop.f32.mrf.mxu0  ;;  %1154 = vmatmul.f32.gmra.mxu1 %v3597_v60 }
 0x109   : > { %v385_v0 = vadd.f32 %v3290_v12, %v384_v36  ;;  %1341 = vmatpush.msrb.mxu3 %v2732_v4  ;;  %v931_v4 = vld [vmem:[%s5156_s3 + $0x98] sm:$0xff] }
 0x10a   : > { %1569 = vmatpush.msrb.mxu1 %v931_v4 }
 0x10b   : > { %v3607_v9 = vmax.f32 %v385_v0, 0.0  ;;  %2846 = vmatmul.msk.f32.gmra.mxu0 %vm3304_vm1, %v3370_v47  ;;  %1342 = vmatpush.msrb.mxu3 %v2731_v15 }
 0x10d   : > { %1270 = vmatmul.f32.gmra.mxu2 %v3607_v9  ;;  %v3620_v16 = vrot.slane %v3607_v9, 7  ;;  %1343 = vmatpush.msrb.mxu3 %v2730_v18 }
 0x10e   : > { %1315 = vmatmul.f32.gmra.mxu3 %v3419_v5 }
 0x10f   : > { %5262 = vst [vmem:[#allocation29_spill] sm:$0xff] %v3620_v16  ;;  %1344 = vmatpush.msrb.mxu3 %v2729_v27 }
 0x110   : > { %v387_v26 = vpop.f32.mrf.mxu0  ;;  %2808 = vmatmul.msk.f32.gmra.mxu1 %vm3304_vm1, %v3620_v16 }
 0x111   : > { %v388_v30 = vadd.f32 %v3290_v12, %v387_v26  ;;  %1345 = vmatpush.msrb.mxu3 %v2728_v32  ;;  %v930_v32 = vld [vmem:[%s5156_s3 + $0x90] sm:$0xff] }
 0x112   : > { %1570 = vmatpush.msrb.mxu1 %v930_v32 }
 0x113   : > { %v3636_v35 = vmax.f32 %v388_v30, 0.0  ;;  %1475 = vmatmul.f32.gmra.mxu0 %v3412_v1  ;;  %1346 = vmatpush.msrb.mxu3 %v2727_v20 }
 0x115   : > { %1273 = vmatmul.f32.gmra.mxu2 %v3636_v35  ;;  %v528_v44 = vrot.slane %v3636_v35, 7 }
 0x116   : > { %1318 = vmatmul.f32.gmra.mxu3 %v3445_v21  ;;  %v612_v21 = vrot.slane %v3425_v8, 1 }
 0x117   : > { %v3653_v48 = vsel %vm508_vm0, %v3620_v16, %v528_v44  ;;  %v957_v44 = vld [vmem:[%s5156_s3 + $0x168] sm:$0xff] }
 0x118   : > { %5263 = vst [vmem:[#allocation30_spill] sm:$0xff] %v3653_v48  ;;  %v390_v49 = vpop.f32.mrf.mxu0  ;;  %1160 = vmatmul.f32.gmra.mxu1 %v3653_v48  ;;  %1672 = vmatpush.msrb.mxu2 %v957_v44 }
 0x119   : > { %v391_v55 = vadd.f32 %v3290_v12, %v390_v49 }
 0x11b   : > { %v3657_v56 = vmax.f32 %v391_v55, 0.0  ;;  %2848 = vmatmul.msk.f32.gmra.mxu0 %vm3304_vm1, %v3437_v13 }
 0x11d   : > { %5264 = vst [vmem:[#allocation31_spill] sm:$0xff] %v3657_v56  ;;  %1276 = vmatmul.f32.gmra.mxu2 %v3657_v56  ;;  %v3664_v59 = vrot.slane %v3657_v56, 7 }
 0x11e   : > { %1321 = vmatmul.f32.gmra.mxu3 %v3465_v34  ;;  %v2790_v34 = vld [vmem:[%s5156_s3 + $0x478] sm:$0xff] }
 0x11f   : > { %5265 = vst [vmem:[#allocation32_spill] sm:$0xff] %v3664_v59 }
 0x120   : > { %v393_v36 = vpop.f32.mrf.mxu0  ;;  %2810 = vmatmul.msk.f32.gmra.mxu1 %vm3304_vm1, %v3664_v59 }
 0x121   : > { %v394_v62 = vadd.f32 %v3290_v12, %v393_v36 }
 0x123   : > { %v3671_v0 = vmax.f32 %v394_v62, 0.0  ;;  %1481 = vmatmul.f32.gmra.mxu0 %v3461_v31  ;;  %v3712_v62 = vrot.slane %v3323_v28, 1 }
 0x125   : > { %1279 = vmatmul.f32.gmra.mxu2 %v3671_v0  ;;  %v531_v15 = vrot.slane %v3671_v0, 7 }
 0x126   : > { %1324 = vmatmul.f32.gmra.mxu3 %v3488_v50  ;;  %v3849_v50 = vrot.slane %v3448_v23, 1 }
 0x127   : > { %v3685_v18 = vsel %vm508_vm0, %v3664_v59, %v531_v15  ;;  %v956_v15 = vld [vmem:[%s5156_s3 + $0x160] sm:$0xff] }
 0x128   : > { %5266 = vst [vmem:[#allocation33_spill] sm:$0xff] %v3685_v18  ;;  %v396_v26 = vpop.f32.mrf.mxu0  ;;  %1166 = vmatmul.f32.gmra.mxu1 %v3685_v18  ;;  %1673 = vmatpush.msrb.mxu2 %v956_v15 }
 0x129   : > { %v397_v27 = vadd.f32 %v3290_v12, %v396_v26  ;;  %5276 = vst [vmem:[#allocation43_spill] sm:$0xff] %v3849_v50 }
 0x12b   : > { %v3689_v30 = vmax.f32 %v397_v27, 0.0  ;;  %2850 = vmatmul.msk.f32.gmra.mxu0 %vm3304_vm1, %v3480_v42  ;;  %v3724_v27 = vsel %vm605_vm2, %v606_v10, %v3712_v62 }
 0x12c   : > { %v1122_v38 = vpop.f32.mrf.mxu1 }
 0x12d   : > { %1282 = vmatmul.f32.gmra.mxu2 %v3689_v30  ;;  %v3699_v20 = vrot.slane %v3689_v30, 7 }
 0x12e   : > { %1327 = vmatmul.f32.gmra.mxu3 %v3510_v63 }
 0x12f   : > { %5267 = vst [vmem:[#allocation34_spill] sm:$0xff] %v3699_v20 }
 0x130   : > { %v399_v45 = vpop.f32.mrf.mxu0  ;;  %2812 = vmatmul.msk.f32.gmra.mxu1 %vm3304_vm1, %v3699_v20  ;;  %v1235_v49 = vpop.f32.mrf.mxu2 }
 0x131   : > { %v400_v55 = vadd.f32 %v3290_v12, %v399_v45  ;;  %v3709_v36 = vadd.f32 %v1235_v49, %v1122_v38  ;;  %v955_v38 = vld [vmem:[%s5156_s3 + $0x158] sm:$0xff]  ;;  %v954_v45 = vld [vmem:[%s5156_s3 + $0x150] sm:$0xff] }
 0x132   : > { %1674 = vmatpush.msrb.mxu2 %v955_v38 }
 0x133   : > { %v3714_v4 = vmax.f32 %v400_v55, 0.0  ;;  %1487 = vmatmul.f32.gmra.mxu0 %v3507_v61  ;;  %v3779_v61 = vrot.slane %v3390_v57, 1 }
 0x134   : > { %1675 = vmatpush.msrb.mxu2 %v954_v45  ;;  %v929_v45 = vld [vmem:[%s5156_s3 + $0x88] sm:$0xff] }
 0x135   : > { %v1125_v26 = vpop.f32.mrf.mxu1  ;;  %1285 = vmatmul.f32.gmra.mxu2 %v3714_v4  ;;  %v534_v32 = vrot.slane %v3714_v4, 7  ;;  %1571 = vmatpush.msrb.mxu1 %v929_v45  ;;  %5270 = vst [vmem:[#allocation37_spill] sm:$0xff] %v3779_v61 }
 0x136   : > { %1347 = vmatmul.f32.vlgmr.msrb.gmra.mxu3 %v3724_v27 }
 0x137   : > { %v3733_v44 = vsel %vm508_vm0, %v3699_v20, %v534_v32  ;;  %v953_v32 = vld [vmem:[%s5156_s3 + $0x148] sm:$0xff] }
 0x138   : > { %5268 = vst [vmem:[#allocation35_spill] sm:$0xff] %v3733_v44  ;;  %v402_v49 = vpop.f32.mrf.mxu0  ;;  %1172 = vmatmul.f32.gmra.mxu1 %v3733_v44  ;;  %v1238_v55 = vpop.f32.mrf.mxu2  ;;  %1676 = vmatpush.msrb.mxu2 %v953_v32  ;;  %v950_v32 = vld [vmem:[%s5156_s3 + $0x130] sm:$0xff] }
 0x139   : > { %v403_v10 = vadd.f32 %v3290_v12, %v402_v49  ;;  %v3740_v15 = vadd.f32 %v1238_v55, %v1125_v26  ;;  %v3742_v3 = vpop.f32.mrf.mxu3  ;;  %v952_v26 = vld [vmem:[%s5156_s3 + $0x140] sm:$0xff] }
 0x13a   : > { %1677 = vmatpush.msrb.mxu2 %v952_v26 }
 0x13b   : > { %v3747_v38 = vmax.f32 %v403_v10, 0.0  ;;  %2852 = vmatmul.msk.f32.gmra.mxu0 %vm3304_vm1, %v3523_v7  ;;  %v951_v10 = vld [vmem:[%s5156_s3 + $0x138] sm:$0xff] }
 0x13c   : > { %1678 = vmatpush.msrb.mxu2 %v951_v10  ;;  %v949_v10 = vld [vmem:[%s5156_s3 + $0x128] sm:$0xff] }
 0x13d   : > { %v1128_v49 = vpop.f32.mrf.mxu1  ;;  %1288 = vmatmul.f32.gmra.mxu2 %v3747_v38  ;;  %v3760_v55 = vrot.slane %v3747_v38, 7 }
 0x13e   : > { %2827 = vmatmul.msk.f32.gmra.mxu3 %vm605_vm2, %v3712_v62  ;;  %1679 = vmatpush.msrb.mxu2 %v950_v32  ;;  %v609_v32 = vrot.slane %v3358_v43, 1 }
 0x13f   : > { %5269 = vst [vmem:[#allocation36_spill] sm:$0xff] %v3760_v55 }
 0x140   : > { %v405_v45 = vpop.f32.mrf.mxu0  ;;  %2814 = vmatmul.msk.f32.gmra.mxu1 %vm3304_vm1, %v3760_v55  ;;  %v1241_v26 = vpop.f32.mrf.mxu2  ;;  %1680 = vmatpush.msrb.mxu2 %v949_v10 }
 0x141   : > { %v406_v6 = vadd.f32 %v3290_v12, %v405_v45  ;;  %v3774_v53 = vadd.f32 %v1241_v26, %v1128_v49  ;;  %v3776_v7 = vpop.f32.mrf.mxu3  ;;  %v928_v49 = vld [vmem:[%s5156_s3 + $0x80] sm:$0xff] }
 0x142   : > { %v948_v45 = vld [vmem:[%s5156_s3 + $0x120] sm:$0xff]  ;;  %1572 = vmatpush.msrb.mxu1 %v928_v49 }
 0x143   : > { %v3784_v42 = vmax.f32 %v406_v6, 0.0  ;;  %1493 = vmatmul.f32.gmra.mxu0 %v3544_v22  ;;  %1681 = vmatpush.msrb.mxu2 %v948_v45  ;;  %v3797_v6 = vsel %vm605_vm2, %v609_v32, %v3779_v61  ;;  %v947_v22 = vld [vmem:[%s5156_s3 + $0x118] sm:$0xff]  ;;  %v946_v45 = vld [vmem:[%s5156_s3 + $0x110] sm:$0xff] }
 0x144   : > { %5271 = vst [vmem:[#allocation38_spill] sm:$0xff] %v3797_v6  ;;  %2157 = vmatpush.msra.mxu1 %v2790_v34 }
 0x145   : > { %v1131_v26 = vpop.f32.mrf.mxu1  ;;  %1291 = vmatmul.f32.gmra.mxu2 %v3784_v42  ;;  %v537_v10 = vrot.slane %v3784_v42, 7 }
 0x146   : > { %1353 = vmatmul.f32.gmra.mxu3 %v3797_v6  ;;  %1682 = vmatpush.msrb.mxu2 %v947_v22  ;;  %v2758_v22 = vld [vmem:[%s5156_s3 + $0x378] sm:$0xff] }
 0x147   : > { %v3806_v49 = vsel %vm508_vm0, %v3760_v55, %v537_v10  ;;  %v945_v10 = vld [vmem:[%s5156_s3 + $0x108] sm:$0xff]  ;;  %1931 = vmatpush.msra.mxu3 %v2758_v22 }
 0x148   : > { %5272 = vst [vmem:[#allocation39_spill] sm:$0xff] %v3806_v49  ;;  %v408_v31 = vpop.f32.mrf.mxu0  ;;  %1178 = vmatmul.f32.gmra.mxu1 %v3806_v49  ;;  %v1244_v32 = vpop.f32.mrf.mxu2  ;;  %1683 = vmatpush.msrb.mxu2 %v946_v45 }
 0x149   : > { %v409_v13 = vadd.f32 %v3290_v12, %v408_v31  ;;  %v3813_v1 = vadd.f32 %v1244_v32, %v1131_v26  ;;  %v3815_v47 = vpop.f32.mrf.mxu3  ;;  %v944_v31 = vld [vmem:[%s5156_s3 + $0x100] sm:$0xff] }
 0x14a   : > { %1684 = vmatpush.msrb.mxu2 %v945_v10 }
 0x14b   : > { %v3823_v63 = vmax.f32 %v409_v13, 0.0  ;;  %2854 = vmatmul.msk.f32.gmra.mxu0 %vm3304_vm1, %v3567_v39  ;;  %v2774_v13 = vld [vmem:[%s5156_s3 + $0x3f8] sm:$0xff] }
 0x14c   : > { %1685 = vmatpush.msrb.mxu2 %v944_v31  ;;  %2044 = vmatpush.msra.mxu0 %v2774_v13 }
 0x14d   : > { %5273 = vst [vmem:[#allocation40_spill] sm:$0xff] %v3823_v63  ;;  %v1134_v26 = vpop.f32.mrf.mxu1  ;;  %1294 = vmatmul.f32.gmra.mxu2 %v3823_v63  ;;  %v3833_v45 = vrot.slane %v3823_v63, 7 }
 0x14e   : > { %2828 = vmatmul.msk.f32.gmra.mxu3 %vm605_vm2, %v3779_v61 }
 0x14f   : > { %5274 = vst [vmem:[#allocation41_spill] sm:$0xff] %v3833_v45 }
 0x150   : > { %v411_v32 = vpop.f32.mrf.mxu0  ;;  %2816 = vmatmul.msk.f32.gmra.mxu1 %vm3304_vm1, %v3833_v45  ;;  %v1247_v22 = vpop.f32.mrf.mxu2 }
 0x151   : > { %v412_v10 = vadd.f32 %v3290_v12, %v411_v32  ;;  %v3844_v31 = vadd.f32 %v1247_v22, %v1134_v26  ;;  %v3846_v39 = vpop.f32.mrf.mxu3  ;;  %v3861_v26 = vsel %vm605_vm2, %v612_v21, %v3849_v50  ;;  %v2757_v21 = vld [vmem:[%s5156_s3 + $0x370] sm:$0xff] }
 0x152   : > { %5277 = vst [vmem:[#allocation44_spill] sm:$0xff] %v3861_v26  ;;  %1932 = vmatpush.msra.mxu3 %v2757_v21 }
 0x153   : > { %5275 = vst [vmem:[#allocation42_spill] sm:$0xff] %v3844_v31  ;;  %v3854_v13 = vmax.f32 %v412_v10, 0.0  ;;  %1499 = vmatmul.f32.gmra.mxu0 %v3597_v60 }
 0x155   : > { %v1137_v5 = vpop.f32.mrf.mxu1  ;;  %1297 = vmatmul.f32.gmra.mxu2 %v3854_v13  ;;  %v540_v32 = vrot.slane %v3854_v13, 7 }
 0x156   : > { %1359 = vmatmul.f32.gmra.mxu3 %v3861_v26 }
 0x157   : > { %v3867_v34 = vsel %vm508_vm0, %v3833_v45, %v540_v32 }
 0x158   : > { %5278 = vst [vmem:[#allocation45_spill] sm:$0xff] %v3867_v34  ;;  %v414_v22 = vpop.f32.mrf.mxu0  ;;  %1184 = vmatmul.f32.gmra.mxu1 %v3867_v34  ;;  %v1250_v10 = vpop.f32.mrf.mxu2 }
 0x159   : > { %v415_v60 = vadd.f32 %v3290_v12, %v414_v22  ;;  %v3871_v54 = vadd.f32 %v1250_v10, %v1137_v5  ;;  %v3873_v40 = vpop.f32.mrf.mxu3  ;;  %v2773_v5 = vld [vmem:[%s5156_s3 + $0x3f0] sm:$0xff] }
 0x15a   : > { %2045 = vmatpush.msra.mxu0 %v2773_v5 }
 0x15b   : > { %5279 = vst [vmem:[#allocation46_spill] sm:$0xff] %v3871_v54  ;;  %v3878_v25 = vmax.f32 %v415_v60, 0.0  ;;  %2856 = vmatmul.msk.f32.gmra.mxu0 %vm3304_vm1, %v3620_v16  ;;  %v2789_v54 = vld [vmem:[%s5156_s3 + $0x470] sm:$0xff] }
 0x15c   : > { %2158 = vmatpush.msra.mxu1 %v2789_v54 }
 0x15d   : > { %5280 = vst [vmem:[#allocation47_spill] sm:$0xff] %v3878_v25  ;;  %v1140_v32 = vpop.f32.mrf.mxu1  ;;  %1300 = vmatmul.f32.gmra.mxu2 %v3878_v25  ;;  %v3885_v22 = vrot.slane %v3878_v25, 7 }
 0x15e   : > { %2829 = vmatmul.msk.f32.gmra.mxu3 %vm605_vm2, %v3849_v50 }
 0x15f   : > { %5281 = vst [vmem:[#allocation48_spill] sm:$0xff] %v3885_v22 }
 0x160   : > { %v417_v60 = vpop.f32.mrf.mxu0  ;;  %2818 = vmatmul.msk.f32.gmra.mxu1 %vm3304_vm1, %v3885_v22  ;;  %v1253_v10 = vpop.f32.mrf.mxu2 }
 0x161   : > { %v418_v21 = vadd.f32 %v3290_v12, %v417_v60  ;;  %v3896_v16 = vadd.f32 %v1253_v10, %v1140_v32  ;;  %v3898_v25 = vpop.f32.mrf.mxu3  ;;  %v3913_v12 = vsel %vm605_vm2, %v615_v24, %v3901_v41  ;;  %v2756_v24 = vld [vmem:[%s5156_s3 + $0x368] sm:$0xff] }
 0x162   : > { %5285 = vst [vmem:[#allocation52_spill] sm:$0xff] %v3913_v12  ;;  %1933 = vmatpush.msra.mxu3 %v2756_v24 }
 0x163   : > { %5282 = vst [vmem:[#allocation49_spill] sm:$0xff] %v3896_v16  ;;  %v3906_v5 = vmax.f32 %v418_v21, 0.0  ;;  %1505 = vmatmul.f32.gmra.mxu0 %v3653_v48  ;;  %v5289_v16 = vmov 0.0  }
 0x165   : > { %5284 = vst [vmem:[#allocation51_spill] sm:$0xff] %v3906_v5  ;;  %v1143_v31 = vpop.f32.mrf.mxu1  ;;  %1303 = vmatmul.f32.gmra.mxu2 %v3906_v5  ;;  %v543_v32 = vrot.slane %v3906_v5, 7  ;;  %v2788_v5 = vld [vmem:[%s5156_s3 + $0x468] sm:$0xff] }
 0x166   : > { %1365 = vmatmul.f32.gmra.mxu3 %v3913_v12  ;;  %2159 = vmatpush.msra.mxu1 %v2788_v5 }
 0x167   : > { %v3919_v54 = vsel %vm508_vm0, %v3885_v22, %v543_v32 }
 0x168   : > { %5286 = vst [vmem:[#allocation53_spill] sm:$0xff] %v3919_v54  ;;  %1190 = vmatmul.f32.gmra.mxu1 %v3919_v54  ;;  %v1256_v60 = vpop.f32.mrf.mxu2  ;;  %v3922_v10 = vpop.f32.mrf.mxu0 }
 0x169   : > { %5287 = vst [vmem:[#allocation54_spill] sm:$0xff] %v3922_v10  ;;  %v3924_v21 = vadd.f32 %v1256_v60, %v1143_v31  ;;  %v3926_v48 = vpop.f32.mrf.mxu3  ;;  %v2772_v31 = vld [vmem:[%s5156_s3 + $0x3e8] sm:$0xff] }
 0x16a   : > { %2046 = vmatpush.msra.mxu0 %v2772_v31  ;;  %v618_v31 = vrot.slane %v3513_v2, 1 }
 0x16b   : > { %5288 = vst [vmem:[#allocation55_spill] sm:$0xff] %v3924_v21  ;;  %2858 = vmatmul.msk.f32.gmra.mxu0 %vm3304_vm1, %v3664_v59  ;;  %v3948_v59 = vrot.slane %v3530_v14, 1 }
 0x16d   : > { %v1146_v32 = vpop.f32.mrf.mxu1  ;;  %1686 = vmatmul.f32.vlgmr.msrb.gmra.mxu2 %v5289_v16  ;;  %5292 = vst [vmem:[#allocation58_spill] sm:$0xff] %v3948_v59 }
 0x16e   : > { %2830 = vmatmul.msk.f32.gmra.mxu3 %vm605_vm2, %v3901_v41 }
 0x170   : > { %v1259_v60 = vpop.f32.mrf.mxu2  ;;  %v3940_v21 = vpop.f32.mrf.mxu0  ;;  %1573 = vmatmul.f32.vlgmr.msrb.gmra.mxu1 %v5289_v16 }
 0x171   : > { %5290 = vst [vmem:[#allocation56_spill] sm:$0xff] %v3940_v21  ;;  %v3943_v24 = vadd.f32 %v1259_v60, %v1146_v32  ;;  %v3945_v10 = vpop.f32.mrf.mxu3  ;;  %v3958_v32 = vsel %vm605_vm2, %v618_v31, %v3948_v59 }
 0x172   : > { %5293 = vst [vmem:[#allocation59_spill] sm:$0xff] %v3958_v32 }
 0x173   : > { %5291 = vst [vmem:[#allocation57_spill] sm:$0xff] %v3943_v24  ;;  %1511 = vmatmul.f32.gmra.mxu0 %v3685_v18  ;;  %v2755_v18 = vld [vmem:[%s5156_s3 + $0x360] sm:$0xff] }
 0x174   : > { %1934 = vmatpush.msra.mxu3 %v2755_v18 }
 0x175   : > { %v1149_v63 = vpop.f32.mrf.mxu1  ;;  %1689 = vmatmul.f32.gmra.mxu2 %v5289_v16 }
 0x176   : > { %1371 = vmatmul.f32.gmra.mxu3 %v3958_v32 }
 0x178   : > { %v1262_v60 = vpop.f32.mrf.mxu2  ;;  %v3961_v24 = vpop.f32.mrf.mxu0  ;;  %1576 = vmatmul.f32.gmra.mxu1 %v5289_v16 }
 0x179   : > { %v3964_v21 = vadd.f32 %v1262_v60, %v1149_v63  ;;  %v1307_v5 = vpop.f32.mrf.mxu3  ;;  %v2771_v63 = vld [vmem:[%s5156_s3 + $0x3e0] sm:$0xff] }
 0x17a   : > { %v3970_v11 = vadd.f32 %v1307_v5, %v3742_v3  ;;  %2047 = vmatpush.msra.mxu0 %v2771_v63  ;;  %v3987_v5 = vrot.slane %v3583_v51, 1  ;;  %v621_v63 = vrot.slane %v3554_v33, 1 }
 0x17b   : > { %2860 = vmatmul.msk.f32.gmra.mxu0 %vm3304_vm1, %v3699_v20 }
 0x17c   : > { %5294 = vst [vmem:[#allocation60_spill] sm:$0xff] %v3970_v11 }
 0x17d   : > { %v1152_v31 = vpop.f32.mrf.mxu1  ;;  %1692 = vmatmul.f32.gmra.mxu2 %v3724_v27  ;;  %5295 = vst [vmem:[#allocation61_spill] sm:$0xff] %v3987_v5  ;;  %v2787_v27 = vld [vmem:[%s5156_s3 + $0x460] sm:$0xff] }
 0x17e   : > { %2831 = vmatmul.msk.f32.gmra.mxu3 %vm605_vm2, %v3948_v59  ;;  %2160 = vmatpush.msra.mxu1 %v2787_v27  ;;  %v2754_v27 = vld [vmem:[%s5156_s3 + $0x358] sm:$0xff] }
 0x17f   : > { %1935 = vmatpush.msra.mxu3 %v2754_v27  ;;  %v4030_v27 = vrot.slane %v3636_v35, 1 }
 0x180   : > { %v1265_v60 = vpop.f32.mrf.mxu2  ;;  %v3981_v16 = vpop.f32.mrf.mxu0  ;;  %1579 = vmatmul.f32.gmra.mxu1 %v3298_v17  ;;  %v4001_v17 = vsel %vm605_vm2, %v621_v63, %v3987_v5 }
 0x181   : > { %v3984_v3 = vadd.f32 %v1265_v60, %v1152_v31  ;;  %v1310_v18 = vpop.f32.mrf.mxu3  ;;  %5297 = vst [vmem:[#allocation63_spill] sm:$0xff] %v4001_v17 }
 0x182   : > { %v3993_v20 = vadd.f32 %v1310_v18, %v3776_v7  ;;  %5299 = vst [vmem:[#allocation65_spill] sm:$0xff] %v4030_v27 }
 0x183   : > { %1517 = vmatmul.f32.gmra.mxu0 %v3733_v44 }
 0x184   : > { %5296 = vst [vmem:[#allocation62_spill] sm:$0xff] %v3993_v20 }
 0x185   : > { %v1155_v11 = vpop.f32.mrf.mxu1  ;;  %2873 = vmatmul.msk.f32.gmra.mxu2 %vm605_vm2, %v3712_v62 }
 0x186   : > { %1377 = vmatmul.f32.gmra.mxu3 %v4001_v17 }
 0x188   : > { %v1268_v31 = vpop.f32.mrf.mxu2  ;;  %v4004_v60 = vpop.f32.mrf.mxu0  ;;  %1582 = vmatmul.f32.gmra.mxu1 %v3323_v28  ;;  %v2770_v28 = vld [vmem:[%s5156_s3 + $0x3d8] sm:$0xff] }
 0x189   : > { %v4007_v7 = vadd.f32 %v1268_v31, %v1155_v11  ;;  %v1313_v18 = vpop.f32.mrf.mxu3  ;;  %2048 = vmatpush.msra.mxu0 %v2770_v28  ;;  %v624_v28 = vrot.slane %v3607_v9, 1 }
 0x18a   : > { %v4013_v62 = vadd.f32 %v1313_v18, %v3815_v47 }
 0x18b   : > { %2862 = vmatmul.msk.f32.gmra.mxu0 %vm3304_vm1, %v3760_v55  ;;  %v2786_v55 = vld [vmem:[%s5156_s3 + $0x458] sm:$0xff] }
 0x18c   : > { %5298 = vst [vmem:[#allocation64_spill] sm:$0xff] %v4013_v62  ;;  %2161 = vmatpush.msra.mxu1 %v2786_v55 }
 0x18d   : > { %v1158_v63 = vpop.f32.mrf.mxu1  ;;  %1698 = vmatmul.f32.gmra.mxu2 %v3797_v6  ;;  %v5324_v6 = vld [vmem:[#allocation46_spill] sm:$0xff] }
 0x18e   : > { %2832 = vmatmul.msk.f32.gmra.mxu3 %vm605_vm2, %v3987_v5 }
 0x190   : > { %v1271_v11 = vpop.f32.mrf.mxu2  ;;  %v4024_v31 = vpop.f32.mrf.mxu0  ;;  %1585 = vmatmul.f32.gmra.mxu1 %v3358_v43 }
 0x191   : > { %v4027_v47 = vadd.f32 %v1271_v11, %v1158_v63  ;;  %v1316_v18 = vpop.f32.mrf.mxu3  ;;  %v4044_v63 = vsel %vm605_vm2, %v624_v28, %v4030_v27 }
 0x192   : > { %v4036_v44 = vadd.f32 %v1316_v18, %v3846_v39  ;;  %5301 = vst [vmem:[#allocation67_spill] sm:$0xff] %v4044_v63 }
 0x193   : > { %1523 = vmatmul.f32.gmra.mxu0 %v3806_v49  ;;  %v2753_v49 = vld [vmem:[%s5156_s3 + $0x350] sm:$0xff] }
 0x194   : > { %5300 = vst [vmem:[#allocation66_spill] sm:$0xff] %v4036_v44  ;;  %1936 = vmatpush.msra.mxu3 %v2753_v49 }
 0x195   : > { %v1161_v62 = vpop.f32.mrf.mxu1  ;;  %2874 = vmatmul.msk.f32.gmra.mxu2 %vm605_vm2, %v3779_v61 }
 0x196   : > { %1383 = vmatmul.f32.gmra.mxu3 %v4044_v63 }
 0x198   : > { %v1274_v11 = vpop.f32.mrf.mxu2  ;;  %1588 = vmatmul.f32.gmra.mxu1 %v3390_v57  ;;  %v4050_v55 = vpop.f32.mrf.mxu0 }
 0x199   : > { %v4048_v39 = vadd.f32 %v1274_v11, %v1161_v62  ;;  %v1319_v18 = vpop.f32.mrf.mxu3  ;;  %v2769_v62 = vld [vmem:[%s5156_s3 + $0x3d0] sm:$0xff] }
 0x19a   : > { %v4056_v44 = vadd.f32 %v1319_v18, %v3873_v40  ;;  %2049 = vmatpush.msra.mxu0 %v2769_v62  ;;  %v4071_v18 = vrot.slane %v3671_v0, 1  ;;  %v627_v62 = vrot.slane %v3657_v56, 1 }
 0x19b   : > { %2864 = vmatmul.msk.f32.gmra.mxu0 %vm3304_vm1, %v3833_v45  ;;  %v2785_v45 = vld [vmem:[%s5156_s3 + $0x450] sm:$0xff] }
 0x19c   : > { %5302 = vst [vmem:[#allocation68_spill] sm:$0xff] %v4056_v44  ;;  %2162 = vmatpush.msra.mxu1 %v2785_v45 }
 0x19d   : > { %v1164_v28 = vpop.f32.mrf.mxu1  ;;  %1704 = vmatmul.f32.gmra.mxu2 %v3861_v26 }
 0x19e   : > { %2833 = vmatmul.msk.f32.gmra.mxu3 %vm605_vm2, %v4030_v27 }
 0x1a0   : > { %v1277_v11 = vpop.f32.mrf.mxu2  ;;  %1591 = vmatmul.f32.gmra.mxu1 %v3425_v8  ;;  %v4079_v20 = vpop.f32.mrf.mxu0 }
 0x1a1   : > { %v4068_v40 = vadd.f32 %v1277_v11, %v1164_v28  ;;  %v1322_v49 = vpop.f32.mrf.mxu3  ;;  %v4087_v11 = vsel %vm605_vm2, %v627_v62, %v4071_v18 }
 0x1a2   : > { %v4077_v44 = vadd.f32 %v1322_v49, %v3898_v25  ;;  %5304 = vst [vmem:[#allocation70_spill] sm:$0xff] %v4087_v11  ;;  %v2752_v49 = vld [vmem:[%s5156_s3 + $0x348] sm:$0xff] }
 0x1a3   : > { %1529 = vmatmul.f32.gmra.mxu0 %v3867_v34  ;;  %1937 = vmatpush.msra.mxu3 %v2752_v49  ;;  %v4114_v49 = vrot.slane %v3714_v4, 1 }
 0x1a4   : > { %5303 = vst [vmem:[#allocation69_spill] sm:$0xff] %v4077_v44 }
 0x1a5   : > { %v1167_v28 = vpop.f32.mrf.mxu1  ;;  %2875 = vmatmul.msk.f32.gmra.mxu2 %vm605_vm2, %v3849_v50  ;;  %v5320_v50 = vld [vmem:[#allocation15_spill] sm:$0xff] }
 0x1a6   : > { %1389 = vmatmul.f32.gmra.mxu3 %v4087_v11 }
 0x1a8   : > { %v1280_v26 = vpop.f32.mrf.mxu2  ;;  %1594 = vmatmul.f32.gmra.mxu1 %v3448_v23  ;;  %v4102_v62 = vpop.f32.mrf.mxu0 }
 0x1a9   : > { %v4091_v25 = vadd.f32 %v1280_v26, %v1167_v28  ;;  %v1325_v45 = vpop.f32.mrf.mxu3  ;;  %5306 = vst [vmem:[#allocation72_spill] sm:$0xff] %v4102_v62  ;;  %v2768_v26 = vld [vmem:[%s5156_s3 + $0x3c8] sm:$0xff] }
 0x1aa   : > { %v4097_v34 = vadd.f32 %v1325_v45, %v3926_v48  ;;  %2050 = vmatpush.msra.mxu0 %v2768_v26  ;;  %v2784_v62 = vld [vmem:[%s5156_s3 + $0x448] sm:$0xff]  ;;  %v630_v26 = vrot.slane %v3689_v30, 1 }
 0x1ab   : > { %2866 = vmatmul.msk.f32.gmra.mxu0 %vm3304_vm1, %v3885_v22  ;;  %2163 = vmatpush.msra.mxu1 %v2784_v62 }
 0x1ac   : > { %5305 = vst [vmem:[#allocation71_spill] sm:$0xff] %v4097_v34 }
 0x1ad   : > { %v1170_v44 = vpop.f32.mrf.mxu1  ;;  %1710 = vmatmul.f32.gmra.mxu2 %v3913_v12 }
 0x1ae   : > { %2834 = vmatmul.msk.f32.gmra.mxu3 %vm605_vm2, %v4071_v18 }
 0x1b0   : > { %v1283_v48 = vpop.f32.mrf.mxu2  ;;  %1597 = vmatmul.f32.gmra.mxu1 %v3468_v37 }
 0x1b1   : > { %v4111_v28 = vadd.f32 %v1283_v48, %v1170_v44  ;;  %v1328_v45 = vpop.f32.mrf.mxu3  ;;  %v4128_v44 = vsel %vm605_vm2, %v630_v26, %v4114_v49  ;;  %v4131_v48 = vpop.f32.mrf.mxu0 }
 0x1b2   : > { %v4120_v22 = vadd.f32 %v1328_v45, %v3945_v10  ;;  %5308 = vst [vmem:[#allocation74_spill] sm:$0xff] %v4131_v48  ;;  %v2751_v45 = vld [vmem:[%s5156_s3 + $0x340] sm:$0xff]  ;;  %v2765_v48 = vld [vmem:[%s5156_s3 + $0x3b0] sm:$0xff] }
 0x1b3   : > { %1535 = vmatmul.f32.gmra.mxu0 %v3919_v54  ;;  %v2767_v54 = vld [vmem:[%s5156_s3 + $0x3c0] sm:$0xff]  ;;  %1938 = vmatpush.msra.mxu3 %v2751_v45 }
 0x1b4   : > { %5307 = vst [vmem:[#allocation73_spill] sm:$0xff] %v4120_v22  ;;  %2051 = vmatpush.msra.mxu0 %v2767_v54  ;;  %v2763_v22 = vld [vmem:[%s5156_s3 + $0x3a0] sm:$0xff] }
 0x1b5   : > { %v1173_v34 = vpop.f32.mrf.mxu1  ;;  %2876 = vmatmul.msk.f32.gmra.mxu2 %vm605_vm2, %v3901_v41 }
 0x1b6   : > { %1395 = vmatmul.f32.gmra.mxu3 %v4128_v44 }
 0x1b8   : > { %v1286_v12 = vpop.f32.mrf.mxu2  ;;  %1600 = vmatmul.f32.gmra.mxu1 %v3491_v52 }
 0x1b9   : > { %v4134_v10 = vadd.f32 %v1286_v12, %v1173_v34  ;;  %v1348_v62 = vpop.f32.mrf.mxu3  ;;  %v2766_v34 = vld [vmem:[%s5156_s3 + $0x3b8] sm:$0xff] }
 0x1ba   : > { %v4143_v26 = vadd.f32 %v1348_v62, %v3709_v36  ;;  %2052 = vmatpush.msra.mxu0 %v2766_v34  ;;  %v2764_v36 = vld [vmem:[%s5156_s3 + $0x3a8] sm:$0xff]  ;;  %v4161_v62 = vpop.f32.mrf.mxu0 }
 0x1bb   : > { %5309 = vst [vmem:[#allocation75_spill] sm:$0xff] %v4134_v10  ;;  %2868 = vmatmul.msk.f32.gmra.mxu0 %vm3304_vm1, %v3326_v29  ;;  %v4166_v29 = vrot.slane %v3784_v42, 1 }
 0x1bc   : > { %2053 = vmatpush.msra.mxu0 %v2765_v48  ;;  %5310 = vst [vmem:[#allocation76_spill] sm:$0xff] %v4161_v62  ;;  %v2783_v48 = vld [vmem:[%s5156_s3 + $0x440] sm:$0xff] }
 0x1bd   : > { %v1176_v12 = vpop.f32.mrf.mxu1  ;;  %1716 = vmatmul.f32.gmra.mxu2 %v3958_v32  ;;  %2164 = vmatpush.msra.mxu1 %v2783_v48 }
 0x1be   : > { %2835 = vmatmul.msk.f32.gmra.mxu3 %vm605_vm2, %v4114_v49  ;;  %2054 = vmatpush.msra.mxu0 %v2764_v36  ;;  %v2762_v36 = vld [vmem:[%s5156_s3 + $0x398] sm:$0xff] }
 0x1c0   : > { %v1289_v54 = vpop.f32.mrf.mxu2  ;;  %1603 = vmatmul.f32.gmra.mxu1 %v3513_v2  ;;  %2055 = vmatpush.msra.mxu0 %v2763_v22  ;;  %v2760_v22 = vld [vmem:[%s5156_s3 + $0x388] sm:$0xff] }
 0x1c1   : > { %v4163_v45 = vadd.f32 %v1289_v54, %v1176_v12  ;;  %v1351_v34 = vpop.f32.mrf.mxu3  ;;  %v633_v12 = vrot.slane %v3747_v38, 1 }
 0x1c2   : > { %v4175_v32 = vadd.f32 %v1351_v34, %v3740_v15  ;;  %2056 = vmatpush.msra.mxu0 %v2762_v36  ;;  %v2761_v15 = vld [vmem:[%s5156_s3 + $0x390] sm:$0xff] }
 0x1c3   : > { %5311 = vst [vmem:[#allocation77_spill] sm:$0xff] %v4163_v45  ;;  %1541 = vmatmul.f32.gmra.mxu0 %v3367_v46  ;;  %v4186_v62 = vsel %vm605_vm2, %v633_v12, %v4166_v29  ;;  %v2750_v12 = vld [vmem:[%s5156_s3 + $0x338] sm:$0xff]  ;;  %v2759_v46 = vld [vmem:[%s5156_s3 + $0x380] sm:$0xff] }
 0x1c4   : > { %2057 = vmatpush.msra.mxu0 %v2761_v15  ;;  %1939 = vmatpush.msra.mxu3 %v2750_v12 }
 0x1c5   : > { %v1179_v54 = vpop.f32.mrf.mxu1  ;;  %2877 = vmatmul.msk.f32.gmra.mxu2 %vm605_vm2, %v3948_v59  ;;  %v4207_v59 = vpop.f32.mrf.mxu0 }
 0x1c6   : > { %1401 = vmatmul.f32.gmra.mxu3 %v4186_v62  ;;  %2058 = vmatpush.msra.mxu0 %v2760_v22  ;;  %5313 = vst [vmem:[#allocation79_spill] sm:$0xff] %v4207_v59  ;;  %v5315_v59 = vld [vmem:[#allocation12_spill] sm:$0xff] }
 0x1c8   : > { %v1292_v34 = vpop.f32.mrf.mxu2  ;;  %1606 = vmatmul.f32.gmra.mxu1 %v3530_v14  ;;  %2059 = vmatpush.msra.mxu0 %v2759_v46  ;;  %v4219_v46 = vrot.slane %v3854_v13, 1 }
 0x1c9   : > { %v4196_v48 = vadd.f32 %v1292_v34, %v1179_v54  ;;  %v1354_v36 = vpop.f32.mrf.mxu3 }
 0x1ca   : > { %v4205_v15 = vadd.f32 %v1354_v36, %v3774_v53  ;;  %v2782_v36 = vld [vmem:[%s5156_s3 + $0x438] sm:$0xff] }
 0x1cb   : > { %5312 = vst [vmem:[#allocation78_spill] sm:$0xff] %v4196_v48  ;;  %2870 = vmatmul.msk.f32.gmra.mxu0 %vm3304_vm1, %v3393_v58  ;;  %2165 = vmatpush.msra.mxu1 %v2782_v36  ;;  %v5316_v58 = vld [vmem:[#allocation40_spill] sm:$0xff] }
 0x1cd   : > { %v1182_v54 = vpop.f32.mrf.mxu1  ;;  %1722 = vmatmul.f32.gmra.mxu2 %v4001_v17  ;;  %v636_v17 = vrot.slane %v5316_v58, 1  ;;  %v4229_v41 = vpop.f32.mrf.mxu0 }
 0x1ce   : > { %2836 = vmatmul.msk.f32.gmra.mxu3 %vm605_vm2, %v4166_v29  ;;  %5317 = vst [vmem:[#allocation40_spill] sm:$0xff] %v4229_v41 }
 0x1d0   : > { %v1295_v22 = vpop.f32.mrf.mxu2  ;;  %1609 = vmatmul.f32.gmra.mxu1 %v3554_v33 }
 0x1d1   : > { %v4216_v34 = vadd.f32 %v1295_v22, %v1182_v54  ;;  %v1357_v53 = vpop.f32.mrf.mxu3  ;;  %v4235_v22 = vsel %vm605_vm2, %v636_v17, %v4219_v46 }
 0x1d2   : > { %v4225_v12 = vadd.f32 %v1357_v53, %v3813_v1  ;;  %v2385_v1 = vld [vmem:[%s5158_s5 + $0x78] sm:$0xff] }
 0x1d3   : > { %5314 = vst [vmem:[#allocation80_spill] sm:$0xff] %v4216_v34  ;;  %1547 = vmatmul.f32.gmra.mxu0 %v5315_v59  ;;  %2422 = vmatpush.msra.mxu2 %v2385_v1  ;;  %v2749_v59 = vld [vmem:[%s5156_s3 + $0x330] sm:$0xff] }
 0x1d4   : > { %1940 = vmatpush.msra.mxu3 %v2749_v59 }
 0x1d5   : > { %v1185_v54 = vpop.f32.mrf.mxu1  ;;  %2878 = vmatmul.msk.f32.gmra.mxu2 %vm605_vm2, %v3987_v5  ;;  %v5319_v5 = vld [vmem:[#allocation42_spill] sm:$0xff] }
 0x1d6   : > { %1407 = vmatmul.f32.gmra.mxu3 %v4235_v22 }
 0x1d8   : > { %v1298_v53 = vpop.f32.mrf.mxu2  ;;  %1612 = vmatmul.f32.gmra.mxu1 %v3583_v51 }
 0x1d9   : > { %v4242_v36 = vadd.f32 %v1298_v53, %v1185_v54  ;;  %v1360_v41 = vpop.f32.mrf.mxu3  ;;  %v4256_v54 = vpop.f32.mrf.mxu0 }
 0x1da   : > { %v4248_v17 = vadd.f32 %v1360_v41, %v5319_v5  ;;  %5321 = vst [vmem:[#allocation42_spill] sm:$0xff] %v4256_v54  ;;  %v5323_v5 = vld [vmem:[#allocation51_spill] sm:$0xff] }
 0x1db   : > { %5318 = vst [vmem:[#allocation81_spill] sm:$0xff] %v4242_v36  ;;  %2872 = vmatmul.msk.f32.gmra.mxu0 %vm3304_vm1, %v5320_v50  ;;  %v4262_v59 = vrot.slane %v5323_v5, 1  ;;  %v2781_v50 = vld [vmem:[%s5156_s3 + $0x430] sm:$0xff]  ;;  %v5325_v36 = vld [vmem:[#allocation18_spill] sm:$0xff]  ;;  %v5326_v54 = vld [vmem:[#allocation47_spill] sm:$0xff] }
 0x1dc   : > { %2166 = vmatpush.msra.mxu1 %v2781_v50  ;;  %v639_v34 = vrot.slane %v5326_v54, 1 }
 0x1dd   : > { %v1188_v61 = vpop.f32.mrf.mxu1  ;;  %1728 = vmatmul.f32.gmra.mxu2 %v4044_v63 }
 0x1de   : > { %2837 = vmatmul.msk.f32.gmra.mxu3 %vm605_vm2, %v4219_v46 }
 0x1e0   : > { %v1301_v1 = vpop.f32.mrf.mxu2  ;;  %1615 = vmatmul.f32.gmra.mxu1 %v3607_v9 }
 0x1e1   : > { %v4259_v53 = vadd.f32 %v1301_v1, %v1188_v61  ;;  %v1363_v41 = vpop.f32.mrf.mxu3  ;;  %v4276_v61 = vsel %vm605_vm2, %v639_v34, %v4262_v59  ;;  %v4283_v1 = vpop.f32.mrf.mxu0  ;;  %v2748_v34 = vld [vmem:[%s5156_s3 + $0x328] sm:$0xff] }
 0x1e2   : > { %v4268_v63 = vadd.f32 %v1363_v41, %v5324_v6  ;;  %v2384_v6 = vld [vmem:[%s5158_s5 + $0x70] sm:$0xff]  ;;  %5327 = vst [vmem:[#allocation51_spill] sm:$0xff] %v4283_v1  ;;  %1941 = vmatpush.msra.mxu3 %v2748_v34 }
 0x1e3   : > { %5322 = vst [vmem:[#allocation82_spill] sm:$0xff] %v4259_v53  ;;  %1553 = vmatmul.f32.gmra.mxu0 %v5325_v36  ;;  %2423 = vmatpush.msra.mxu2 %v2384_v6  ;;  %v5330_v6 = vld [vmem:[#allocation54_spill] sm:$0xff] }
 0x1e4   : > { %v1462_v45 = vadd.f32 %v5330_v6, %v4143_v26  ;;  %v2780_v26 = vld [vmem:[%s5156_s3 + $0x428] sm:$0xff]  ;;  %v5334_v6 = vld [vmem:[#allocation55_spill] sm:$0xff] }
 0x1e5   : > { %v1191_v48 = vpop.f32.mrf.mxu1  ;;  %2879 = vmatmul.msk.f32.gmra.mxu2 %vm605_vm2, %v4030_v27  ;;  %v5329_v27 = vld [vmem:[#allocation49_spill] sm:$0xff]  ;;  %2167 = vmatpush.msra.mxu1 %v2780_v26 }
 0x1e6   : > { %1413 = vmatmul.f32.gmra.mxu3 %v4276_v61 }
 0x1e8   : > { %v1304_v50 = vpop.f32.mrf.mxu2  ;;  %1618 = vmatmul.f32.gmra.mxu1 %v3636_v35 }
 0x1e9   : > { %v4285_v41 = vadd.f32 %v1304_v50, %v1191_v48  ;;  %v1366_v36 = vpop.f32.mrf.mxu3 }
 0x1ea   : > { %v4291_v53 = vadd.f32 %v1366_v36, %v5329_v27  ;;  %v5332_v36 = vld [vmem:[#allocation3_spill] sm:$0xff] }
 0x1eb   : > { %5328 = vst [vmem:[#allocation46_spill] sm:$0xff] %v4285_v41  ;;  %2060 = vmatmul.f32.vlgmr.msra.gmra.mxu0 %v3358_v43  ;;  %v642_v34 = vrot.slane %v5332_v36, 1  ;;  %v5333_v41 = vld [vmem:[#allocation5_spill] sm:$0xff] }
 0x1ec   : > { %v4304_v43 = vrot.slane %v5333_v41, 1 }
 0x1ed   : > { %v1574_v10 = vpop.f32.mrf.mxu1  ;;  %1734 = vmatmul.f32.gmra.mxu2 %v4087_v11 }
 0x1ee   : > { %v1575_v1 = vadd.f32 %v1574_v10, %v1462_v45  ;;  %2838 = vmatmul.msk.f32.gmra.mxu3 %vm605_vm2, %v4262_v59  ;;  %v4312_v45 = vpop.f32.mrf.mxu0  ;;  %v4321_v11 = vsel %vm605_vm2, %v642_v34, %v4304_v43  ;;  %v5337_v34 = vld [vmem:[#allocation57_spill] sm:$0xff] }
 0x1ef   : > { %5335 = vst [vmem:[#allocation49_spill] sm:$0xff] %v4312_v45  ;;  %v5341_v45 = vld [vmem:[#allocation11_spill] sm:$0xff] }
 0x1f0   : > { %1621 = vmatmul.f32.gmra.mxu1 %v3657_v56  ;;  %v1687_v48 = vpop.f32.mrf.mxu2 }
 0x1f1   : > { %v4300_v50 = vadd.f32 %v1687_v48, %v1575_v1  ;;  %v1369_v27 = vpop.f32.mrf.mxu3  ;;  %v5336_v1 = vld [vmem:[#allocation56_spill] sm:$0xff] }
 0x1f2   : > { %v4310_v10 = vadd.f32 %v1369_v27, %v5334_v6  ;;  %v1465_v48 = vadd.f32 %v5336_v1, %v4175_v32  ;;  %v2383_v27 = vld [vmem:[%s5158_s5 + $0x68] sm:$0xff]  ;;  %v2747_v6 = vld [vmem:[%s5156_s3 + $0x320] sm:$0xff] }
 0x1f3   : > { %5331 = vst [vmem:[#allocation47_spill] sm:$0xff] %v4300_v50  ;;  %2063 = vmatmul.f32.gmra.mxu0 %v3390_v57  ;;  %2424 = vmatpush.msra.mxu2 %v2383_v27 }
 0x1f4   : > { %1942 = vmatpush.msra.mxu3 %v2747_v6 }
 0x1f5   : > { %v1577_v50 = vpop.f32.mrf.mxu1  ;;  %2880 = vmatmul.msk.f32.gmra.mxu2 %vm605_vm2, %v4071_v18 }
 0x1f6   : > { %v1578_v56 = vadd.f32 %v1577_v50, %v1465_v48  ;;  %1419 = vmatmul.f32.gmra.mxu3 %v4321_v11  ;;  %v1468_v50 = vadd.f32 %v3961_v24, %v4205_v15  ;;  %v4339_v48 = vpop.f32.mrf.mxu0  ;;  %v2779_v24 = vld [vmem:[%s5156_s3 + $0x420] sm:$0xff] }
 0x1f7   : > { %5339 = vst [vmem:[#allocation3_spill] sm:$0xff] %v4339_v48  ;;  %2168 = vmatpush.msra.mxu1 %v2779_v24 }
 0x1f8   : > { %1624 = vmatmul.f32.gmra.mxu1 %v3671_v0  ;;  %v1690_v57 = vpop.f32.mrf.mxu2 }
 0x1f9   : > { %v4328_v32 = vadd.f32 %v1690_v57, %v1578_v56  ;;  %v1372_v26 = vpop.f32.mrf.mxu3 }
 0x1fa   : > { %v4334_v1 = vadd.f32 %v1372_v26, %v5337_v34  ;;  %v5340_v34 = vld [vmem:[#allocation8_spill] sm:$0xff] }
 0x1fb   : > { %2066 = vmatmul.f32.gmra.mxu0 %v3425_v8  ;;  %v645_v8 = vrot.slane %v5340_v34, 1 }
 0x1fc   : > { %5338 = vst [vmem:[#allocation54_spill] sm:$0xff] %v4334_v1  ;;  %v4349_v1 = vrot.slane %v5341_v45, 1 }
 0x1fd   : > { %v1580_v27 = vpop.f32.mrf.mxu1  ;;  %1740 = vmatmul.f32.gmra.mxu2 %v4128_v44 }
 0x1fe   : > { %v1581_v56 = vadd.f32 %v1580_v27, %v1468_v50  ;;  %2839 = vmatmul.msk.f32.gmra.mxu3 %vm605_vm2, %v4304_v43  ;;  %v1471_v50 = vadd.f32 %v3981_v16, %v4225_v12 }
 0x200   : > { %1627 = vmatmul.f32.gmra.mxu1 %v3689_v30  ;;  %v1693_v57 = vpop.f32.mrf.mxu2 }
 0x201   : > { %v4345_v26 = vadd.f32 %v1693_v57, %v1581_v56  ;;  %v1375_v6 = vpop.f32.mrf.mxu3  ;;  %v4364_v56 = vsel %vm605_vm2, %v645_v8, %v4349_v1  ;;  %v2746_v8 = vld [vmem:[%s5156_s3 + $0x318] sm:$0xff] }
 0x202   : > { %v4355_v15 = vadd.f32 %v1375_v6, %v3964_v21  ;;  %v2382_v21 = vld [vmem:[%s5158_s5 + $0x60] sm:$0xff]  ;;  %v4370_v6 = vpop.f32.mrf.mxu0  ;;  %1943 = vmatpush.msra.mxu3 %v2746_v8  ;;  %v5345_v8 = vld [vmem:[#allocation17_spill] sm:$0xff] }
 0x203   : > { %2069 = vmatmul.f32.gmra.mxu0 %v3448_v23  ;;  %5342 = vst [vmem:[#allocation5_spill] sm:$0xff] %v4370_v6  ;;  %2425 = vmatpush.msra.mxu2 %v2382_v21  ;;  %v4397_v6 = vrot.slane %v5345_v8, 1 }
 0x205   : > { %v1583_v27 = vpop.f32.mrf.mxu1  ;;  %2881 = vmatmul.msk.f32.gmra.mxu2 %vm605_vm2, %v4114_v49 }
 0x206   : > { %v1584_v57 = vadd.f32 %v1583_v27, %v1471_v50  ;;  %1425 = vmatmul.f32.gmra.mxu3 %v4364_v56  ;;  %v1474_v50 = vadd.f32 %v4004_v60, %v4248_v17  ;;  %v5344_v60 = vld [vmem:[#allocation14_spill] sm:$0xff] }
 0x207   : > { %v648_v17 = vrot.slane %v5344_v60, 1 }
 0x208   : > { %1630 = vmatmul.f32.gmra.mxu1 %v3714_v4  ;;  %v1696_v23 = vpop.f32.mrf.mxu2 }
 0x209   : > { %v4373_v16 = vadd.f32 %v1696_v23, %v1584_v57  ;;  %v1378_v12 = vpop.f32.mrf.mxu3 }
 0x20a   : > { %v4379_v24 = vadd.f32 %v1378_v12, %v3984_v3  ;;  %v2745_v3 = vld [vmem:[%s5156_s3 + $0x310] sm:$0xff]  ;;  %v4391_v23 = vpop.f32.mrf.mxu0 }
 0x20b   : > { %2072 = vmatmul.f32.gmra.mxu0 %v3468_v37  ;;  %5343 = vst [vmem:[#allocation55_spill] sm:$0xff] %v4391_v23  ;;  %1944 = vmatpush.msra.mxu3 %v2745_v3  ;;  %v2743_v23 = vld [vmem:[%s5156_s3 + $0x300] sm:$0xff] }
 0x20d   : > { %v1586_v27 = vpop.f32.mrf.mxu1  ;;  %1746 = vmatmul.f32.gmra.mxu2 %v4186_v62 }
 0x20e   : > { %v1587_v21 = vadd.f32 %v1586_v27, %v1474_v50  ;;  %2840 = vmatmul.msk.f32.gmra.mxu3 %vm605_vm2, %v4349_v1  ;;  %v2778_v50 = vld [vmem:[%s5156_s3 + $0x418] sm:$0xff] }
 0x20f   : > { %2169 = vmatpush.msra.mxu1 %v2778_v50 }
 0x210   : > { %1633 = vmatmul.f32.gmra.mxu1 %v3747_v38  ;;  %v1699_v57 = vpop.f32.mrf.mxu2 }
 0x211   : > { %v4393_v37 = vadd.f32 %v1699_v57, %v1587_v21  ;;  %v1381_v12 = vpop.f32.mrf.mxu3  ;;  %v2744_v21 = vld [vmem:[%s5156_s3 + $0x308] sm:$0xff]  ;;  %v1477_v57 = vadd.f32 %v4024_v31, %v4268_v63 }
 0x212   : > { %v4403_v27 = vadd.f32 %v1381_v12, %v4007_v7  ;;  %1945 = vmatpush.msra.mxu3 %v2744_v21  ;;  %v4418_v7 = vsel %vm605_vm2, %v648_v17, %v4397_v6  ;;  %v4430_v17 = vpop.f32.mrf.mxu0 }
 0x213   : > { %2075 = vmatmul.f32.gmra.mxu0 %v3491_v52  ;;  %v2381_v52 = vld [vmem:[%s5158_s5 + $0x58] sm:$0xff]  ;;  %5346 = vst [vmem:[#allocation56_spill] sm:$0xff] %v4430_v17 }
 0x214   : > { %1946 = vmatpush.msra.mxu3 %v2743_v23  ;;  %2426 = vmatpush.msra.mxu2 %v2381_v52  ;;  %v5347_v52 = vld [vmem:[#allocation20_spill] sm:$0xff] }
 0x215   : > { %v1589_v48 = vpop.f32.mrf.mxu1  ;;  %2882 = vmatmul.msk.f32.gmra.mxu2 %vm605_vm2, %v4166_v29 }
 0x216   : > { %v1590_v3 = vadd.f32 %v1589_v48, %v1477_v57  ;;  %1431 = vmatmul.f32.gmra.mxu3 %v4418_v7  ;;  %v1480_v48 = vadd.f32 %v4050_v55, %v4291_v53  ;;  %v2777_v55 = vld [vmem:[%s5156_s3 + $0x410] sm:$0xff] }
 0x217   : > { %2170 = vmatpush.msra.mxu1 %v2777_v55 }
 0x218   : > { %1636 = vmatmul.f32.gmra.mxu1 %v3784_v42  ;;  %v1702_v31 = vpop.f32.mrf.mxu2 }
 0x219   : > { %v4425_v63 = vadd.f32 %v1702_v31, %v1590_v3  ;;  %v1384_v12 = vpop.f32.mrf.mxu3  ;;  %v651_v31 = vrot.slane %v5347_v52, 1 }
 0x21a   : > { %v4428_v50 = vadd.f32 %v1384_v12, %v4027_v47  ;;  %v5348_v12 = vld [vmem:[#allocation23_spill] sm:$0xff] }
 0x21b   : > { %2078 = vmatmul.f32.gmra.mxu0 %v3513_v2  ;;  %v4443_v2 = vrot.slane %v5348_v12, 1 }
 0x21d   : > { %v1592_v23 = vpop.f32.mrf.mxu1  ;;  %1752 = vmatmul.f32.gmra.mxu2 %v4235_v22  ;;  %5349 = vst [vmem:[#allocation57_spill] sm:$0xff] %v4443_v2 }
 0x21e   : > { %v1593_v21 = vadd.f32 %v1592_v23, %v1480_v48  ;;  %2841 = vmatmul.msk.f32.gmra.mxu3 %vm605_vm2, %v4397_v6  ;;  %v1483_v48 = vadd.f32 %v4079_v20, %v4310_v10  ;;  %v4454_v23 = vpop.f32.mrf.mxu0 }
 0x21f   : > { %5350 = vst [vmem:[#allocation8_spill] sm:$0xff] %v4454_v23 }
 0x220   : > { %1639 = vmatmul.f32.gmra.mxu1 %v5316_v58  ;;  %v1705_v57 = vpop.f32.mrf.mxu2 }
 0x221   : > { %v4439_v3 = vadd.f32 %v1705_v57, %v1593_v21  ;;  %v1387_v47 = vpop.f32.mrf.mxu3  ;;  %v4460_v57 = vsel %vm605_vm2, %v651_v31, %v4443_v2 }
 0x222   : > { %v4449_v53 = vadd.f32 %v1387_v47, %v4048_v39 }
 0x223   : > { %2081 = vmatmul.f32.gmra.mxu0 %v3530_v14  ;;  %v2380_v14 = vld [vmem:[%s5158_s5 + $0x50] sm:$0xff] }
 0x224   : > { %2427 = vmatpush.msra.mxu2 %v2380_v14  ;;  %v2379_v14 = vld [vmem:[%s5158_s5 + $0x48] sm:$0xff] }
 0x225   : > { %v1595_v21 = vpop.f32.mrf.mxu1  ;;  %2883 = vmatmul.msk.f32.gmra.mxu2 %vm605_vm2, %v4219_v46 }
 0x226   : > { %v1596_v17 = vadd.f32 %v1595_v21, %v1483_v48  ;;  %1437 = vmatmul.f32.gmra.mxu3 %v4460_v57  ;;  %v4478_v55 = vpop.f32.mrf.mxu0  ;;  %v5354_v21 = vld [vmem:[#allocation7_spill] sm:$0xff]  ;;  %2428 = vmatpush.msra.mxu2 %v2379_v14 }
 0x227   : > { %5352 = vst [vmem:[#allocation14_spill] sm:$0xff] %v4478_v55  ;;  %v5358_v14 = vld [vmem:[#allocation75_spill] sm:$0xff] }
 0x228   : > { %1642 = vmatmul.f32.gmra.mxu1 %v3854_v13  ;;  %v1708_v20 = vpop.f32.mrf.mxu2 }
 0x229   : > { %v4467_v39 = vadd.f32 %v1708_v20, %v1596_v17  ;;  %v1390_v10 = vpop.f32.mrf.mxu3  ;;  %v2776_v17 = vld [vmem:[%s5156_s3 + $0x408] sm:$0xff] }
 0x22a   : > { %v4470_v47 = vadd.f32 %v1390_v10, %v4068_v40  ;;  %2171 = vmatpush.msra.mxu1 %v2776_v17 }
 0x22b   : > { %2084 = vmatmul.f32.gmra.mxu0 %v3554_v33 }
 0x22c   : > { %5351 = vst [vmem:[#allocation11_spill] sm:$0xff] %v4470_v47 }
 0x22d   : > { %v4473_v31 = vpop.f32.mrf.mxu1  ;;  %1758 = vmatmul.f32.gmra.mxu2 %v4276_v61 }
 0x22e   : > { %2842 = vmatmul.msk.f32.gmra.mxu3 %vm605_vm2, %v4443_v2  ;;  %v5457_v2 = vld [vmem:[#allocation47_spill] sm:$0xff] }
 0x230   : > { %1645 = vmatmul.f32.gmra.mxu1 %v5326_v54 }
 0x231   : > { %v1393_v48 = vpop.f32.mrf.mxu3 }
 0x232   : > { %v4485_v40 = vadd.f32 %v1393_v48, %v4091_v25  ;;  %v4499_v25 = vpop.f32.mrf.mxu0  ;;  %v5357_v48 = vld [vmem:[#allocation10_spill] sm:$0xff] }
 0x233   : > { %2087 = vmatmul.f32.gmra.mxu0 %v3583_v51  ;;  %5355 = vst [vmem:[#allocation20_spill] sm:$0xff] %v4499_v25 }
 0x234   : > { %5353 = vst [vmem:[#allocation17_spill] sm:$0xff] %v4485_v40  ;;  %v5448_v40 = vld [vmem:[#allocation48_spill] sm:$0xff] }
 0x235   : > { %v4488_v33 = vpop.f32.mrf.mxu1  ;;  %2884 = vmatmul.msk.f32.gmra.mxu2 %vm605_vm2, %v4262_v59 }
 0x236   : > { %2889 = vmatmul.msk.f32.vlgmr.msra.gmra.mxu3 %vm3304_vm1, %v5354_v21  ;;  %v2775_v21 = vld [vmem:[%s5156_s3 + $0x400] sm:$0xff] }
 0x237   : > { %2172 = vmatpush.msra.mxu1 %v2775_v21  ;;  %v5362_v21 = vld [vmem:[#allocation77_spill] sm:$0xff] }
 0x238   : > { %1648 = vmatmul.f32.gmra.mxu1 %v5323_v5 }
 0x239   : > { %v1396_v20 = vpop.f32.mrf.mxu3 }
 0x23a   : > { %v4502_v51 = vadd.f32 %v1396_v20, %v4111_v28  ;;  %v4516_v28 = vpop.f32.mrf.mxu0  ;;  %v5361_v20 = vld [vmem:[#allocation13_spill] sm:$0xff] }
 0x23b   : > { %2090 = vmatmul.f32.gmra.mxu0 %v3607_v9  ;;  %5360 = vst [vmem:[#allocation10_spill] sm:$0xff] %v4516_v28 }
 0x23c   : > { %5356 = vst [vmem:[#allocation23_spill] sm:$0xff] %v4502_v51  ;;  %v5386_v51 = vld [vmem:[#allocation46_spill] sm:$0xff] }
 0x23d   : > { %v4505_v10 = vpop.f32.mrf.mxu1  ;;  %1764 = vmatmul.f32.gmra.mxu2 %v4321_v11 }
 0x23e   : > { %1950 = vmatmul.f32.gmra.mxu3 %v5357_v48  ;;  %v2378_v48 = vld [vmem:[%s5158_s5 + $0x40] sm:$0xff] }
 0x23f   : > { %2429 = vmatpush.msra.mxu2 %v2378_v48  ;;  %v5367_v48 = vld [vmem:[#allocation78_spill] sm:$0xff] }
 0x240   : > { %1651 = vmatmul.f32.gmra.mxu1 %v5332_v36 }
 0x241   : > { %v1399_v17 = vpop.f32.mrf.mxu3 }
 0x242   : > { %v4514_v25 = vadd.f32 %v1399_v17, %v5358_v14  ;;  %v4534_v28 = vpop.f32.mrf.mxu0 }
 0x243   : > { %2093 = vmatmul.f32.gmra.mxu0 %v3636_v35  ;;  %v5364_v35 = vld [vmem:[#allocation31_spill] sm:$0xff]  ;;  %5365 = vst [vmem:[#allocation13_spill] sm:$0xff] %v4534_v28 }
 0x244   : > { %5359 = vst [vmem:[#allocation7_spill] sm:$0xff] %v4514_v25 }
 0x245   : > { %v4519_v9 = vpop.f32.mrf.mxu1  ;;  %2885 = vmatmul.msk.f32.gmra.mxu2 %vm605_vm2, %v4304_v43 }
 0x246   : > { %2891 = vmatmul.msk.f32.gmra.mxu3 %vm3304_vm1, %v5361_v20  ;;  %v5366_v20 = vld [vmem:[#allocation16_spill] sm:$0xff] }
 0x248   : > { %1654 = vmatmul.f32.gmra.mxu1 %v5333_v41 }
 0x249   : > { %v1402_v17 = vpop.f32.mrf.mxu3 }
 0x24a   : > { %v4531_v14 = vadd.f32 %v1402_v17, %v5362_v21  ;;  %v5369_v21 = vld [vmem:[#allocation19_spill] sm:$0xff] }
 0x24b   : > { %2096 = vmatmul.f32.gmra.mxu0 %v5364_v35  ;;  %v2377_v35 = vld [vmem:[%s5158_s5 + $0x38] sm:$0xff] }
 0x24c   : > { %5363 = vst [vmem:[#allocation75_spill] sm:$0xff] %v4531_v14  ;;  %2430 = vmatpush.msra.mxu2 %v2377_v35  ;;  %v5376_v35 = vld [vmem:[#allocation81_spill] sm:$0xff] }
 0x24d   : > { %v4536_v55 = vpop.f32.mrf.mxu1  ;;  %1770 = vmatmul.f32.gmra.mxu2 %v4364_v56 }
 0x24e   : > { %1956 = vmatmul.f32.gmra.mxu3 %v5366_v20  ;;  %v4555_v20 = vpop.f32.mrf.mxu0 }
 0x24f   : > { %5370 = vst [vmem:[#allocation31_spill] sm:$0xff] %v4555_v20 }
 0x250   : > { %1657 = vmatmul.f32.gmra.mxu1 %v5340_v34 }
 0x251   : > { %v1405_v23 = vpop.f32.mrf.mxu3 }
 0x252   : > { %v4542_v25 = vadd.f32 %v1405_v23, %v5367_v48 }
 0x253   : > { %2099 = vmatmul.f32.gmra.mxu0 %v3671_v0  ;;  %v5371_v0 = vld [vmem:[#allocation80_spill] sm:$0xff] }
 0x254   : > { %5368 = vst [vmem:[#allocation77_spill] sm:$0xff] %v4542_v25 }
 0x255   : > { %v4545_v17 = vpop.f32.mrf.mxu1  ;;  %2886 = vmatmul.msk.f32.gmra.mxu2 %vm605_vm2, %v4349_v1 }
 0x256   : > { %2893 = vmatmul.msk.f32.gmra.mxu3 %vm3304_vm1, %v5369_v21  ;;  %v5374_v21 = vld [vmem:[#allocation22_spill] sm:$0xff]  ;;  %v4567_v25 = vpop.f32.mrf.mxu0 }
 0x257   : > { %5375 = vst [vmem:[#allocation19_spill] sm:$0xff] %v4567_v25 }
 0x258   : > { %1660 = vmatmul.f32.gmra.mxu1 %v5341_v45 }
 0x259   : > { %v1408_v23 = vpop.f32.mrf.mxu3 }
 0x25a   : > { %v4559_v48 = vadd.f32 %v1408_v23, %v5371_v0  ;;  %v2376_v0 = vld [vmem:[%s5158_s5 + $0x30] sm:$0xff] }
 0x25b   : > { %2102 = vmatmul.f32.gmra.mxu0 %v3689_v30  ;;  %v5379_v30 = vld [vmem:[#allocation25_spill] sm:$0xff]  ;;  %2431 = vmatpush.msra.mxu2 %v2376_v0 }
 0x25c   : > { %5372 = vst [vmem:[#allocation16_spill] sm:$0xff] %v4559_v48 }
 0x25d   : > { %v4562_v28 = vpop.f32.mrf.mxu1  ;;  %1776 = vmatmul.f32.gmra.mxu2 %v4418_v7 }
 0x25e   : > { %5373 = vst [vmem:[#allocation78_spill] sm:$0xff] %v4562_v28  ;;  %1962 = vmatmul.f32.gmra.mxu3 %v5374_v21  ;;  %v5380_v21 = vld [vmem:[#allocation82_spill] sm:$0xff]  ;;  %v4790_v28 = vld [vmem:[%s5157_s4] ss:$0 sm:$0xff] }
 0x260   : > { %1663 = vmatmul.f32.gmra.mxu1 %v5344_v60 }
 0x261   : > { %v1411_v20 = vpop.f32.mrf.mxu3 }
 0x262   : > { %v4570_v14 = vadd.f32 %v1411_v20, %v5376_v35 }
 0x263   : > { %2105 = vmatmul.f32.gmra.mxu0 %v3714_v4  ;;  %v4587_v4 = vpop.f32.mrf.mxu0 }
 0x264   : > { %5377 = vst [vmem:[#allocation80_spill] sm:$0xff] %v4570_v14  ;;  %v5384_v14 = vld [vmem:[#allocation26_spill] sm:$0xff] }
 0x265   : > { %v4573_v23 = vpop.f32.mrf.mxu1  ;;  %2887 = vmatmul.msk.f32.gmra.mxu2 %vm605_vm2, %v4397_v6  ;;  %5382 = vst [vmem:[#allocation25_spill] sm:$0xff] %v4587_v4 }
 0x266   : > { %5378 = vst [vmem:[#allocation22_spill] sm:$0xff] %v4573_v23  ;;  %2895 = vmatmul.msk.f32.gmra.mxu3 %vm3304_vm1, %v5379_v30  ;;  %v5385_v30 = vld [vmem:[#allocation38_spill] sm:$0xff] }
 0x268   : > { %1666 = vmatmul.f32.gmra.mxu1 %v5345_v8 }
 0x269   : > { %v1414_v20 = vpop.f32.mrf.mxu3 }
 0x26a   : > { %v4585_v35 = vadd.f32 %v1414_v20, %v5380_v21  ;;  %v5390_v21 = vld [vmem:[#allocation27_spill] sm:$0xff] }
 0x26b   : > { %2108 = vmatmul.f32.gmra.mxu0 %v3747_v38  ;;  %v4598_v0 = vpop.f32.mrf.mxu0  ;;  %v2375_v38 = vld [vmem:[%s5158_s5 + $0x28] sm:$0xff] }
 0x26c   : > { %5381 = vst [vmem:[#allocation81_spill] sm:$0xff] %v4585_v35  ;;  %2432 = vmatpush.msra.mxu2 %v2375_v38  ;;  %v5398_v35 = vld [vmem:[#allocation62_spill] sm:$0xff] }
 0x26d   : > { %v4590_v25 = vpop.f32.mrf.mxu1  ;;  %5388 = vst [vmem:[#allocation38_spill] sm:$0xff] %v4598_v0  ;;  %v5395_v0 = vld [vmem:[#allocation28_spill] sm:$0xff] }
 0x26e   : > { %5383 = vst [vmem:[#allocation82_spill] sm:$0xff] %v4590_v25  ;;  %1968 = vmatmul.f32.gmra.mxu3 %v5384_v14  ;;  %v5391_v14 = vld [vmem:[#allocation37_spill] sm:$0xff] }
 0x270   : > { %2173 = vmatmul.f32.vlgmr.msra.gmra.mxu1 %v5385_v30 }
 0x271   : > { %v1417_v48 = vpop.f32.mrf.mxu3 }
 0x272   : > { %v4595_v23 = vadd.f32 %v1417_v48, %v5386_v51  ;;  %v5392_v48 = vld [vmem:[#allocation60_spill] sm:$0xff] }
 0x273   : > { %2111 = vmatmul.f32.gmra.mxu0 %v3784_v42  ;;  %v4617_v4 = vpop.f32.mrf.mxu0 }
 0x274   : > { %5387 = vst [vmem:[#allocation26_spill] sm:$0xff] %v4595_v23 }
 0x275   : > { %v4600_v20 = vpop.f32.mrf.mxu1  ;;  %5396 = vst [vmem:[#allocation60_spill] sm:$0xff] %v4617_v4 }
 0x276   : > { %5389 = vst [vmem:[#allocation46_spill] sm:$0xff] %v4600_v20  ;;  %2897 = vmatmul.msk.f32.gmra.mxu3 %vm3304_vm1, %v5390_v21  ;;  %v5397_v21 = vld [vmem:[#allocation44_spill] sm:$0xff] }
 0x278   : > { %2918 = vmatmul.msk.f32.gmra.mxu1 %vm605_vm2, %v5391_v14 }
 0x279   : > { %v1420_v51 = vpop.f32.mrf.mxu3 }
 0x27a   : > { %v4611_v30 = vadd.f32 %v1420_v51, %v5392_v48  ;;  %v5401_v51 = vld [vmem:[#allocation29_spill] sm:$0xff] }
 0x27b   : > { %2114 = vmatmul.f32.gmra.mxu0 %v5316_v58  ;;  %v2374_v58 = vld [vmem:[%s5158_s5 + $0x20] sm:$0xff]  ;;  %v4634_v48 = vpop.f32.mrf.mxu0 }
 0x27c   : > { %5393 = vst [vmem:[#allocation27_spill] sm:$0xff] %v4611_v30  ;;  %2433 = vmatpush.msra.mxu2 %v2374_v58  ;;  %v5409_v30 = vld [vmem:[#allocation66_spill] sm:$0xff] }
 0x27d   : > { %v4614_v42 = vpop.f32.mrf.mxu1  ;;  %5403 = vst [vmem:[#allocation62_spill] sm:$0xff] %v4634_v48  ;;  %v5413_v48 = vld [vmem:[#allocation32_spill] sm:$0xff] }
 0x27e   : > { %5394 = vst [vmem:[#allocation37_spill] sm:$0xff] %v4614_v42  ;;  %1974 = vmatmul.f32.gmra.mxu3 %v5395_v0  ;;  %v5402_v0 = vld [vmem:[#allocation43_spill] sm:$0xff] }
 0x280   : > { %2179 = vmatmul.f32.gmra.mxu1 %v5397_v21 }
 0x281   : > { %v1423_v23 = vpop.f32.mrf.mxu3 }
 0x282   : > { %v4621_v38 = vadd.f32 %v1423_v23, %v5398_v35  ;;  %v5404_v35 = vld [vmem:[#allocation64_spill] sm:$0xff] }
 0x283   : > { %2117 = vmatmul.f32.gmra.mxu0 %v3854_v13  ;;  %v4639_v13 = vpop.f32.mrf.mxu2 }
 0x284   : > { %5399 = vst [vmem:[#allocation28_spill] sm:$0xff] %v4621_v38  ;;  %v5408_v38 = vld [vmem:[#allocation52_spill] sm:$0xff] }
 0x285   : > { %v4624_v14 = vpop.f32.mrf.mxu1 }
 0x286   : > { %5400 = vst [vmem:[#allocation44_spill] sm:$0xff] %v4624_v14  ;;  %2899 = vmatmul.msk.f32.gmra.mxu3 %vm3304_vm1, %v5401_v51  ;;  %v5407_v51 = vld [vmem:[#allocation30_spill] sm:$0xff] }
 0x288   : > { %2919 = vmatmul.msk.f32.gmra.mxu1 %vm605_vm2, %v5402_v0  ;;  %v4649_v0 = vpop.f32.mrf.mxu0 }
 0x289   : > { %v1426_v23 = vpop.f32.mrf.mxu3  ;;  %5411 = vst [vmem:[#allocation30_spill] sm:$0xff] %v4649_v0 }
 0x28a   : > { %v4637_v21 = vadd.f32 %v1426_v23, %v5404_v35 }
 0x28b   : > { %2120 = vmatmul.f32.gmra.mxu0 %v5326_v54  ;;  %v4652_v23 = vpop.f32.mrf.mxu2  ;;  %v2373_v54 = vld [vmem:[%s5158_s5 + $0x18] sm:$0xff] }
 0x28c   : > { %5405 = vst [vmem:[#allocation29_spill] sm:$0xff] %v4637_v21  ;;  %2434 = vmatpush.msra.mxu2 %v2373_v54  ;;  %v5419_v21 = vld [vmem:[#allocation59_spill] sm:$0xff] }
 0x28d   : > { %v4642_v4 = vpop.f32.mrf.mxu1 }
 0x28e   : > { %5406 = vst [vmem:[#allocation43_spill] sm:$0xff] %v4642_v4  ;;  %1980 = vmatmul.f32.gmra.mxu3 %v5407_v51  ;;  %v5415_v51 = vld [vmem:[#allocation68_spill] sm:$0xff] }
 0x290   : > { %2185 = vmatmul.f32.gmra.mxu1 %v5408_v38  ;;  %v5414_v38 = vld [vmem:[#allocation50_spill] sm:$0xff] }
 0x291   : > { %v1429_v58 = vpop.f32.mrf.mxu3 }
 0x292   : > { %v4647_v14 = vadd.f32 %v1429_v58, %v5409_v30 }
 0x293   : > { %2123 = vmatmul.f32.gmra.mxu0 %v5323_v5  ;;  %v4668_v5 = vpop.f32.mrf.mxu0 }
 0x294   : > { %5410 = vst [vmem:[#allocation64_spill] sm:$0xff] %v4647_v14  ;;  %v5418_v14 = vld [vmem:[#allocation33_spill] sm:$0xff] }
 0x295   : > { %v4654_v35 = vpop.f32.mrf.mxu1 }
 0x296   : > { %5412 = vst [vmem:[#allocation52_spill] sm:$0xff] %v4654_v35  ;;  %2901 = vmatmul.msk.f32.gmra.mxu3 %vm3304_vm1, %v5413_v48  ;;  %v4673_v48 = vpop.f32.mrf.mxu2  ;;  %v5420_v35 = vld [vmem:[#allocation69_spill] sm:$0xff] }
 0x298   : > { %2920 = vmatmul.msk.f32.gmra.mxu1 %vm605_vm2, %v5414_v38 }
 0x299   : > { %v1432_v30 = vpop.f32.mrf.mxu3 }
 0x29a   : > { %v4665_v58 = vadd.f32 %v1432_v30, %v5415_v51  ;;  %v5423_v30 = vld [vmem:[#allocation34_spill] sm:$0xff] }
 0x29b   : > { %2126 = vmatmul.f32.gmra.mxu0 %v5332_v36  ;;  %v2372_v36 = vld [vmem:[%s5158_s5 + $0x10] sm:$0xff] }
 0x29c   : > { %5416 = vst [vmem:[#allocation66_spill] sm:$0xff] %v4665_v58  ;;  %2435 = vmatpush.msra.mxu2 %v2372_v36  ;;  %v5429_v58 = vld [vmem:[#allocation63_spill] sm:$0xff] }
 0x29d   : > { %v4670_v0 = vpop.f32.mrf.mxu1 }
 0x29e   : > { %5417 = vst [vmem:[#allocation32_spill] sm:$0xff] %v4670_v0  ;;  %1986 = vmatmul.f32.gmra.mxu3 %v5418_v14  ;;  %v4688_v14 = vpop.f32.mrf.mxu0  ;;  %v5430_v0 = vld [vmem:[#allocation73_spill] sm:$0xff] }
 0x2a0   : > { %2191 = vmatmul.f32.gmra.mxu1 %v5419_v21  ;;  %v5424_v21 = vld [vmem:[#allocation58_spill] sm:$0xff] }
 0x2a1   : > { %v1435_v54 = vpop.f32.mrf.mxu3 }
 0x2a2   : > { %v4677_v4 = vadd.f32 %v1435_v54, %v5420_v35  ;;  %v4692_v35 = vpop.f32.mrf.mxu2 }
 0x2a3   : > { %2129 = vmatmul.f32.gmra.mxu0 %v5333_v41  ;;  %v5425_v41 = vld [vmem:[#allocation71_spill] sm:$0xff] }
 0x2a4   : > { %5421 = vst [vmem:[#allocation50_spill] sm:$0xff] %v4677_v4 }
 0x2a5   : > { %v4680_v38 = vpop.f32.mrf.mxu1 }
 0x2a6   : > { %5422 = vst [vmem:[#allocation68_spill] sm:$0xff] %v4680_v38  ;;  %2903 = vmatmul.msk.f32.gmra.mxu3 %vm3304_vm1, %v5423_v30  ;;  %v5428_v30 = vld [vmem:[#allocation35_spill] sm:$0xff]  ;;  %v4702_v38 = vpop.f32.mrf.mxu0 }
 0x2a8   : > { %2921 = vmatmul.msk.f32.gmra.mxu1 %vm605_vm2, %v5424_v21 }
 0x2a9   : > { %v1438_v51 = vpop.f32.mrf.mxu3 }
 0x2aa   : > { %v4695_v54 = vadd.f32 %v1438_v51, %v5425_v41  ;;  %v4707_v21 = vpop.f32.mrf.mxu2  ;;  %v5433_v41 = vld [vmem:[#allocation36_spill] sm:$0xff] }
 0x2ab   : > { %2132 = vmatmul.f32.gmra.mxu0 %v5340_v34  ;;  %v2371_v34 = vld [vmem:[%s5158_s5 + $0x8] sm:$0xff] }
 0x2ac   : > { %5426 = vst [vmem:[#allocation33_spill] sm:$0xff] %v4695_v54  ;;  %2436 = vmatpush.msra.mxu2 %v2371_v34 }
 0x2ad   : > { %v4698_v4 = vpop.f32.mrf.mxu1 }
 0x2ae   : > { %5427 = vst [vmem:[#allocation59_spill] sm:$0xff] %v4698_v4  ;;  %1992 = vmatmul.f32.gmra.mxu3 %v5428_v30  ;;  %v4720_v30 = vpop.f32.mrf.mxu0 }
 0x2b0   : > { %2197 = vmatmul.f32.gmra.mxu1 %v5429_v58  ;;  %v5434_v58 = vld [vmem:[#allocation61_spill] sm:$0xff] }
 0x2b1   : > { %v1441_v36 = vpop.f32.mrf.mxu3 }
 0x2b2   : > { %v4705_v42 = vadd.f32 %v1441_v36, %v5430_v0 }
 0x2b3   : > { %2135 = vmatmul.f32.gmra.mxu0 %v5341_v45  ;;  %v4723_v45 = vpop.f32.mrf.mxu2 }
 0x2b4   : > { %5431 = vst [vmem:[#allocation69_spill] sm:$0xff] %v4705_v42  ;;  %v5437_v42 = vld [vmem:[#allocation39_spill] sm:$0xff] }
 0x2b5   : > { %v4710_v51 = vpop.f32.mrf.mxu1  ;;  %5435 = vst [vmem:[#allocation58_spill] sm:$0xff] %v4723_v45  ;;  %v5458_v45 = vld [vmem:[#allocation9_spill] sm:$0xff] }
 0x2b6   : > { %5432 = vst [vmem:[#allocation34_spill] sm:$0xff] %v4710_v51  ;;  %2905 = vmatmul.msk.f32.gmra.mxu3 %vm3304_vm1, %v5433_v41  ;;  %v5438_v41 = vld [vmem:[#allocation67_spill] sm:$0xff]  ;;  %v4730_v34 = vpop.f32.mrf.mxu0 }
 0x2b8   : > { %2922 = vmatmul.msk.f32.gmra.mxu1 %vm605_vm2, %v5434_v58  ;;  %v5440_v58 = vld [vmem:[#allocation41_spill] sm:$0xff] }
 0x2b9   : > { %v1948_v0 = vpop.f32.mrf.mxu3 }
 0x2bb   : > { %2138 = vmatmul.f32.gmra.mxu0 %v5344_v60  ;;  %v2370_v60 = vld [vmem:[%s5158_s5] sm:$0xff] }
 0x2bc   : > { %2437 = vmatpush.msra.mxu2 %v2370_v60 }
 0x2bd   : > { %v4725_v36 = vpop.f32.mrf.mxu1 }
 0x2be   : > { %5436 = vst [vmem:[#allocation71_spill] sm:$0xff] %v4725_v36  ;;  %1998 = vmatmul.f32.gmra.mxu3 %v5437_v42  ;;  %v4740_v36 = vpop.f32.mrf.mxu2  ;;  %v5442_v42 = vld [vmem:[#allocation65_spill] sm:$0xff]  ;;  %v4748_v4 = vpop.f32.mrf.mxu0 }
 0x2bf   : > { %5441 = vst [vmem:[#allocation63_spill] sm:$0xff] %v4740_v36  ;;  %v5455_v36 = vld [vmem:[#allocation4_spill] sm:$0xff] }
 0x2c0   : > { %2203 = vmatmul.f32.gmra.mxu1 %v5438_v41 }
 0x2c1   : > { %v1951_v54 = vpop.f32.mrf.mxu3 }
 0x2c3   : > { %2141 = vmatmul.f32.gmra.mxu0 %v5345_v8 }
 0x2c5   : > { %v4732_v51 = vpop.f32.mrf.mxu1 }
 0x2c6   : > { %5439 = vst [vmem:[#allocation35_spill] sm:$0xff] %v4732_v51  ;;  %2907 = vmatmul.msk.f32.gmra.mxu3 %vm3304_vm1, %v5440_v58  ;;  %v5444_v51 = vld [vmem:[#allocation45_spill] sm:$0xff]  ;;  %v5445_v58 = vld [vmem:[#allocation70_spill] sm:$0xff]  ;;  %v4751_v20 = vpop.f32.mrf.mxu2 }
 0x2c7   : > { %5446 = vst [vmem:[#allocation36_spill] sm:$0xff] %v4751_v20  ;;  %v5452_v20 = vld [vmem:[#allocation53_spill] sm:$0xff] }
 0x2c8   : > { %2923 = vmatmul.msk.f32.gmra.mxu1 %vm605_vm2, %v5442_v42 }
 0x2c9   : > { %v1954_v41 = vpop.f32.mrf.mxu3 }
 0x2cb   : > { %2144 = vmatmul.f32.gmra.mxu0 %v5347_v52  ;;  %v4761_v52 = vpop.f32.mrf.mxu0 }
 0x2cd   : > { %v4745_v8 = vpop.f32.mrf.mxu1 }
 0x2ce   : > { %5443 = vst [vmem:[#allocation73_spill] sm:$0xff] %v4745_v8  ;;  %2004 = vmatmul.f32.gmra.mxu3 %v5444_v51  ;;  %v4763_v42 = vpop.f32.mrf.mxu2 }
 0x2cf   : > { %5449 = vst [vmem:[#allocation39_spill] sm:$0xff] %v4763_v42 }
 0x2d0   : > { %2209 = vmatmul.f32.gmra.mxu1 %v5445_v58  ;;  %v5450_v58 = vmov 0.0  }
 0x2d1   : > { %v1957_v25 = vpop.f32.mrf.mxu3 }
 0x2d3   : > { %2147 = vmatmul.f32.gmra.mxu0 %v5348_v12 }
 0x2d5   : > { %v4754_v60 = vpop.f32.mrf.mxu1 }
 0x2d6   : > { %5447 = vst [vmem:[#allocation61_spill] sm:$0xff] %v4754_v60  ;;  %2909 = vmatmul.msk.f32.gmra.mxu3 %vm3304_vm1, %v5448_v40  ;;  %v4772_v60 = vpop.f32.mrf.mxu0 }
 0x2d8   : > { %2924 = vmatmul.msk.f32.gmra.mxu1 %vm605_vm2, %v4071_v18  ;;  %v4775_v18 = vpop.f32.mrf.mxu2 }
 0x2d9   : > { %v1960_v51 = vpop.f32.mrf.mxu3  ;;  %5453 = vst [vmem:[#allocation41_spill] sm:$0xff] %v4775_v18  ;;  %v5456_v18 = vld [vmem:[#allocation6_spill] sm:$0xff] }
 0x2db   : > { %2150 = vmatmul.f32.gmra.mxu0 %v5450_v58 }
 0x2dd   : > { %v4766_v8 = vpop.f32.mrf.mxu1 }
 0x2de   : > { %5451 = vst [vmem:[#allocation67_spill] sm:$0xff] %v4766_v8  ;;  %2010 = vmatmul.f32.gmra.mxu3 %v5452_v20 }
 0x2e0   : > { %2215 = vmatmul.f32.gmra.mxu1 %v4128_v44  ;;  %v2062_v44 = vadd.f32 %v4668_v5, %v1948_v0  ;;  %v2065_v5 = vadd.f32 %v4688_v14, %v1951_v54  ;;  %v4812_v14 = vpop.f32.mrf.mxu0 }
 0x2e1   : > { %v4770_v12 = vpop.f32.mrf.mxu3 }
 0x2e3   : > { %2153 = vmatmul.f32.gmra.mxu0 %v5450_v58 }
 0x2e5   : > { %v4777_v40 = vpop.f32.mrf.mxu1 }
 0x2e6   : > { %5454 = vst [vmem:[#allocation65_spill] sm:$0xff] %v4777_v40  ;;  %2911 = vmatmul.msk.f32.gmra.mxu3 %vm3304_vm1, %v5455_v36  ;;  %v4793_v40 = vpop.f32.mrf.mxu2 }
 0x2e8   : > { %2925 = vmatmul.msk.f32.gmra.mxu1 %vm605_vm2, %v4114_v49 }
 0x2e9   : > { %v4784_v20 = vpop.f32.mrf.mxu3 }
 0x2ed   : > { %v2174_v8 = vpop.f32.mrf.mxu1 }
 0x2ee   : > { %v2175_v42 = vadd.f32 %v2174_v8, %v2062_v44  ;;  %2016 = vmatmul.f32.gmra.mxu3 %v5456_v18 }
 0x2f0   : > { %v2270_v36 = vadd.f32 %v2175_v42, %v5457_v2  ;;  %2221 = vmatmul.f32.gmra.mxu1 %v4186_v62  ;;  %v4807_v62 = vpop.f32.mrf.mxu2 }
 0x2f1   : > { %v4797_v49 = vpop.f32.mrf.mxu3 }
 0x2f2   : > { %v2306_v47 = vadd.f32 %v4790_v28, %v2270_v36 }
 0x2f4   : > { %v2338_v0 = vmax.f32 %v2306_v47, 0.0  ;;  %v2068_v47 = vadd.f32 %v4702_v38, %v1954_v41  ;;  %v4824_v38 = vpop.f32.mrf.mxu0 }
 0x2f5   : > { %v2177_v8 = vpop.f32.mrf.mxu1 }
 0x2f6   : > { %v2178_v44 = vadd.f32 %v2177_v8, %v2065_v5  ;;  %2913 = vmatmul.msk.f32.gmra.mxu3 %vm3304_vm1, %v5458_v45  ;;  %2438 = vmatmul.f32.vlgmr.msra.gmra.mxu2 %v2338_v0  ;;  %v5459_v45 = vld [vmem:[#allocation12_spill] sm:$0xff]  ;;  %v2071_v8 = vadd.f32 %v4720_v30, %v1957_v25  ;;  %v2074_v25 = vadd.f32 %v4730_v34, %v1960_v51 }
 0x2f7   : > { %v2077_v34 = vadd.f32 %v4748_v4, %v4770_v12  ;;  %v2080_v12 = vadd.f32 %v4761_v52, %v4784_v20  ;;  %v2083_v52 = vadd.f32 %v4772_v60, %v4797_v49 }
 0x2f8   : > { %v2271_v18 = vadd.f32 %v2178_v44, %v4328_v32  ;;  %2926 = vmatmul.msk.f32.gmra.mxu1 %vm605_vm2, %v4166_v29  ;;  %v4819_v0 = vpop.f32.mrf.mxu2 }
 0x2f9   : > { %v4809_v2 = vpop.f32.mrf.mxu3 }
 0x2fa   : > { %v2307_v42 = vadd.f32 %v4790_v28, %v2271_v18  ;;  %v2086_v60 = vadd.f32 %v4812_v14, %v4809_v2 }
 0x2fc   : > { %v2339_v54 = vmax.f32 %v2307_v42, 0.0 }
 0x2fd   : > { %v2180_v36 = vpop.f32.mrf.mxu1 }
 0x2fe   : > { %v2181_v5 = vadd.f32 %v2180_v36, %v2068_v47  ;;  %2022 = vmatmul.f32.gmra.mxu3 %v5459_v45  ;;  %2441 = vmatmul.f32.gmra.mxu2 %v2339_v54  ;;  %v5460_v47 = vld [vmem:[#allocation15_spill] sm:$0xff] }
 0x300   : > { %v2272_v32 = vadd.f32 %v2181_v5, %v4345_v26  ;;  %2227 = vmatmul.f32.gmra.mxu1 %v4235_v22  ;;  %v4834_v54 = vpop.f32.mrf.mxu2 }
 0x301   : > { %v4822_v44 = vpop.f32.mrf.mxu3 }
 0x302   : > { %v2308_v29 = vadd.f32 %v4790_v28, %v2272_v32  ;;  %v5461_v32 = vld [vmem:[#allocation18_spill] sm:$0xff] }
 0x304   : > { %v2340_v18 = vmax.f32 %v2308_v29, 0.0  ;;  %v4839_v29 = vpop.f32.mrf.mxu0 }
 0x305   : > { %v2183_v41 = vpop.f32.mrf.mxu1 }
 0x306   : > { %v2184_v42 = vadd.f32 %v2183_v41, %v2071_v8  ;;  %2915 = vmatmul.msk.f32.gmra.mxu3 %vm3304_vm1, %v5460_v47  ;;  %2444 = vmatmul.f32.gmra.mxu2 %v2340_v18  ;;  %v5462_v41 = vld [vmem:[#allocation21_spill] sm:$0xff] }
 0x308   : > { %v2273_v22 = vadd.f32 %v2184_v42, %v4373_v16  ;;  %2927 = vmatmul.msk.f32.gmra.mxu1 %vm605_vm2, %v4219_v46  ;;  %v4849_v42 = vpop.f32.mrf.mxu2 }
 0x309   : > { %v4836_v5 = vpop.f32.mrf.mxu3 }
 0x30a   : > { %v2309_v26 = vadd.f32 %v4790_v28, %v2273_v22 }
 0x30c   : > { %v2341_v30 = vmax.f32 %v2309_v26, 0.0 }
 0x30d   : > { %v2186_v36 = vpop.f32.mrf.mxu1 }
 0x30e   : > { %v2187_v45 = vadd.f32 %v2186_v36, %v2074_v25  ;;  %2028 = vmatmul.f32.gmra.mxu3 %v5461_v32  ;;  %2447 = vmatmul.f32.gmra.mxu2 %v2341_v30  ;;  %v5463_v25 = vld [vmem:[#allocation24_spill] sm:$0xff] }
 0x310   : > { %v2274_v16 = vadd.f32 %v2187_v45, %v4393_v37  ;;  %2233 = vmatmul.f32.gmra.mxu1 %v4276_v61  ;;  %v4856_v61 = vpop.f32.mrf.mxu0 }
 0x311   : > { %v4851_v47 = vpop.f32.mrf.mxu3 }
 0x312   : > { %v2310_v46 = vadd.f32 %v4790_v28, %v2274_v16 }
 0x314   : > { %v2342_v51 = vmax.f32 %v2310_v46, 0.0  ;;  %v5465_v46 = vld [vmem:[#allocation72_spill] sm:$0xff] }
 0x315   : > { %v2189_v8 = vpop.f32.mrf.mxu1 }
 0x316   : > { %v2190_v18 = vadd.f32 %v2189_v8, %v2077_v34  ;;  %2917 = vmatmul.msk.f32.gmra.mxu3 %vm3304_vm1, %v5462_v41  ;;  %2450 = vmatmul.f32.gmra.mxu2 %v2342_v51 }
 0x318   : > { %v2275_v37 = vadd.f32 %v2190_v18, %v4425_v63  ;;  %2928 = vmatmul.msk.f32.gmra.mxu1 %vm605_vm2, %v4262_v59  ;;  %v4864_v63 = vpop.f32.mrf.mxu2  ;;  %v4869_v45 = vpop.f32.mrf.mxu0 }
 0x319   : > { %v4866_v59 = vpop.f32.mrf.mxu3 }
 0x31a   : > { %v2311_v4 = vadd.f32 %v4790_v28, %v2275_v37 }
 0x31c   : > { %v2343_v22 = vmax.f32 %v2311_v4, 0.0 }
 0x31d   : > { %v2192_v19 = vpop.f32.mrf.mxu1 }
 0x31e   : > { %v2193_v26 = vadd.f32 %v2192_v19, %v2080_v12  ;;  %2034 = vmatmul.f32.gmra.mxu3 %v5463_v25  ;;  %2453 = vmatmul.f32.gmra.mxu2 %v2343_v22  ;;  %v2089_v19 = vadd.f32 %v4824_v38, %v4822_v44  ;;  %v2092_v38 = vadd.f32 %v4839_v29, %v4836_v5 }
 0x31f   : > { %v2095_v29 = vadd.f32 %v4856_v61, %v4851_v47 }
 0x320   : > { %v2276_v30 = vadd.f32 %v2193_v26, %v4439_v3  ;;  %2239 = vmatmul.f32.gmra.mxu1 %v4321_v11  ;;  %v5464_v3 = vld [vmem:[#allocation54_spill] sm:$0xff]  ;;  %v4881_v18 = vpop.f32.mrf.mxu2  ;;  %v4887_v37 = vpop.f32.mrf.mxu0 }
 0x321   : > { %v1486_v11 = vadd.f32 %v5465_v46, %v5464_v3  ;;  %v4885_v49 = vpop.f32.mrf.mxu3 }
 0x322   : > { %v2312_v36 = vadd.f32 %v4790_v28, %v2276_v30 }
 0x323   : > { %v1599_v51 = vadd.f32 %v4473_v31, %v1486_v11 }
 0x324   : > { %v2344_v20 = vmax.f32 %v2312_v36, 0.0 }
 0x325   : > { %v2195_v32 = vpop.f32.mrf.mxu1 }
 0x326   : > { %v2196_v16 = vadd.f32 %v2195_v32, %v2083_v52  ;;  %2456 = vmatmul.f32.gmra.mxu2 %v2344_v20  ;;  %2037 = vmatmul.f32.gmra.mxu3 %v5450_v58  ;;  %v5467_v20 = vld [vmem:[#allocation76_spill] sm:$0xff] }
 0x328   : > { %v2277_v34 = vadd.f32 %v2196_v16, %v4467_v39  ;;  %2929 = vmatmul.msk.f32.gmra.mxu1 %vm605_vm2, %v4304_v43  ;;  %v1712_v39 = vadd.f32 %v4639_v13, %v1599_v51  ;;  %v5466_v43 = vld [vmem:[#allocation74_spill] sm:$0xff]  ;;  %v4898_v25 = vpop.f32.mrf.mxu2 }
 0x329   : > { %v1489_v31 = vadd.f32 %v5466_v43, %v4355_v15  ;;  %v1990_v36 = vpop.f32.mrf.mxu3  ;;  %v2103_v15 = vpop.f32.mrf.mxu0 }
 0x32a   : > { %v2313_v8 = vadd.f32 %v4790_v28, %v2277_v34 }
 0x32b   : > { %v1602_v2 = vadd.f32 %v4488_v33, %v1489_v31 }
 0x32c   : > { %v2345_v41 = vmax.f32 %v2313_v8, 0.0 }
 0x32d   : > { %v2198_v4 = vpop.f32.mrf.mxu1  ;;  %v1715_v30 = vadd.f32 %v4652_v23, %v1602_v2 }
 0x32e   : > { %v2199_v12 = vadd.f32 %v2198_v4, %v2086_v60  ;;  %2459 = vmatmul.f32.gmra.mxu2 %v2345_v41  ;;  %2040 = vmatmul.f32.gmra.mxu3 %v5450_v58 }
 0x330   : > { %v2278_v22 = vadd.f32 %v2199_v12, %v1712_v39  ;;  %2245 = vmatmul.f32.gmra.mxu1 %v4364_v56  ;;  %v1492_v56 = vadd.f32 %v5467_v20, %v4379_v24  ;;  %v4910_v11 = vpop.f32.mrf.mxu2  ;;  %v5468_v24 = vld [vmem:[#allocation79_spill] sm:$0xff]  ;;  %v5471_v20 = vld [vmem:[#allocation58_spill] sm:$0xff] }
 0x331   : > { %v1495_v34 = vadd.f32 %v5468_v24, %v4403_v27  ;;  %v1993_v51 = vpop.f32.mrf.mxu3  ;;  %v5469_v27 = vld [vmem:[#allocation40_spill] sm:$0xff]  ;;  %v5476_v24 = vld [vmem:[#allocation63_spill] sm:$0xff] }
 0x332   : > { %v2314_v14 = vadd.f32 %v4790_v28, %v2278_v22  ;;  %v1605_v33 = vadd.f32 %v4505_v10, %v1492_v56  ;;  %v2106_v10 = vpop.f32.mrf.mxu0  ;;  %v1498_v39 = vadd.f32 %v5469_v27, %v4428_v50 }
 0x333   : > { %v1608_v8 = vadd.f32 %v4519_v9, %v1495_v34 }
 0x334   : > { %v2346_v26 = vmax.f32 %v2314_v14, 0.0  ;;  %v1718_v3 = vadd.f32 %v4673_v48, %v1605_v33  ;;  %v1611_v9 = vadd.f32 %v4536_v55, %v1498_v39  ;;  %v5470_v14 = vld [vmem:[#allocation42_spill] sm:$0xff]  ;;  %v5473_v33 = vld [vmem:[#allocation51_spill] sm:$0xff] }
 0x335   : > { %v2201_v13 = vpop.f32.mrf.mxu1  ;;  %v1721_v41 = vadd.f32 %v4692_v35, %v1608_v8  ;;  %v2098_v35 = vadd.f32 %v4869_v45, %v4866_v59  ;;  %v2101_v59 = vadd.f32 %v4887_v37, %v4885_v49  ;;  %v2104_v49 = vadd.f32 %v2103_v15, %v1990_v36 }
 0x336   : > { %v2202_v52 = vadd.f32 %v2201_v13, %v2089_v19  ;;  %2462 = vmatmul.f32.gmra.mxu2 %v2346_v26  ;;  %v1724_v2 = vadd.f32 %v4707_v21, %v1611_v9  ;;  %v2107_v15 = vadd.f32 %v2106_v10, %v1993_v51  ;;  %v5480_v9 = vld [vmem:[#allocation36_spill] sm:$0xff] }
 0x338   : > { %v2279_v32 = vadd.f32 %v2202_v52, %v1715_v30  ;;  %2930 = vmatmul.msk.f32.gmra.mxu1 %vm605_vm2, %v4349_v1 }
 0x339   : > { %v1996_v43 = vpop.f32.mrf.mxu3 }
 0x33a   : > { %v2315_v44 = vadd.f32 %v4790_v28, %v2279_v32  ;;  %v2109_v61 = vpop.f32.mrf.mxu0 }
 0x33b   : > { %v2110_v10 = vadd.f32 %v2109_v61, %v1996_v43 }
 0x33c   : > { %v2347_v16 = vmax.f32 %v2315_v44, 0.0 }
 0x33d   : > { %v2204_v23 = vpop.f32.mrf.mxu1 }
 0x33e   : > { %v2205_v46 = vadd.f32 %v2204_v23, %v2092_v38  ;;  %2465 = vmatmul.f32.gmra.mxu2 %v2347_v16  ;;  %v5475_v38 = vld [vmem:[#allocation78_spill] sm:$0xff] }
 0x340   : > { %v2280_v1 = vadd.f32 %v2205_v46, %v1718_v3  ;;  %2251 = vmatmul.f32.gmra.mxu1 %v4418_v7  ;;  %v4924_v7 = vpop.f32.mrf.mxu2 }
 0x341   : > { %v1999_v45 = vpop.f32.mrf.mxu3 }
 0x342   : > { %v2316_v5 = vadd.f32 %v4790_v28, %v2280_v1  ;;  %v2112_v21 = vpop.f32.mrf.mxu0 }
 0x343   : > { %v2113_v43 = vadd.f32 %v2112_v21, %v1999_v45 }
 0x344   : > { %v2348_v48 = vmax.f32 %v2316_v5, 0.0 }
 0x345   : > { %v2207_v60 = vpop.f32.mrf.mxu1 }
 0x346   : > { %v2208_v4 = vadd.f32 %v2207_v60, %v2095_v29  ;;  %2468 = vmatmul.f32.gmra.mxu2 %v2348_v48  ;;  %v5477_v29 = vld [vmem:[#allocation17_spill] sm:$0xff] }
 0x347   : > { %v5478_v48 = vld [vmem:[#allocation49_spill] sm:$0xff] }
 0x348   : > { %v2281_v12 = vadd.f32 %v2208_v4, %v1721_v41  ;;  %2931 = vmatmul.msk.f32.gmra.mxu1 %vm605_vm2, %v4397_v6  ;;  %v1501_v6 = vadd.f32 %v5470_v14, %v4449_v53  ;;  %v4936_v13 = vpop.f32.mrf.mxu2  ;;  %v5472_v53 = vld [vmem:[#allocation11_spill] sm:$0xff]  ;;  %v1507_v60 = vadd.f32 %v5478_v48, %v5477_v29  ;;  %v5479_v4 = vld [vmem:[#allocation22_spill] sm:$0xff] }
 0x349   : > { %v2002_v1 = vpop.f32.mrf.mxu3  ;;  %v5490_v29 = vld [vmem:[#allocation55_spill] sm:$0xff] }
 0x34a   : > { %v2317_v47 = vadd.f32 %v4790_v28, %v2281_v12  ;;  %v1614_v55 = vadd.f32 %v4545_v17, %v1501_v6  ;;  %v5474_v17 = vld [vmem:[#allocation57_spill] sm:$0xff]  ;;  %v2115_v5 = vpop.f32.mrf.mxu0  ;;  %v1620_v27 = vadd.f32 %v5479_v4, %v1507_v60 }
 0x34c   : > { %v2349_v31 = vmax.f32 %v2317_v47, 0.0  ;;  %v1727_v56 = vadd.f32 %v5471_v20, %v1614_v55  ;;  %v1733_v47 = vadd.f32 %v5480_v9, %v1620_v27  ;;  %v5483_v55 = vld [vmem:[#allocation82_spill] sm:$0xff]  ;;  %v5491_v27 = vld [vmem:[#allocation37_spill] sm:$0xff] }
 0x34d   : > { %v2210_v22 = vpop.f32.mrf.mxu1 }
 0x34e   : > { %v2211_v50 = vadd.f32 %v2210_v22, %v2098_v35  ;;  %2471 = vmatmul.f32.gmra.mxu2 %v2349_v31  ;;  %v5481_v22 = vld [vmem:[#allocation23_spill] sm:$0xff] }
 0x350   : > { %v2282_v19 = vadd.f32 %v2211_v50, %v1724_v2  ;;  %2257 = vmatmul.f32.gmra.mxu1 %v4460_v57  ;;  %v1504_v57 = vadd.f32 %v5473_v33, %v5472_v53  ;;  %v4947_v3 = vpop.f32.mrf.mxu2  ;;  %v5482_v2 = vld [vmem:[#allocation3_spill] sm:$0xff]  ;;  %v5486_v53 = vld [vmem:[#allocation5_spill] sm:$0xff] }
 0x351   : > { %v1510_v50 = vadd.f32 %v5482_v2, %v5481_v22  ;;  %v2005_v14 = vpop.f32.mrf.mxu3 }
 0x352   : > { %v2318_v26 = vadd.f32 %v4790_v28, %v2282_v19  ;;  %v1617_v16 = vadd.f32 %v5475_v38, %v1504_v57  ;;  %v2118_v19 = vpop.f32.mrf.mxu0 }
 0x354   : > { %v2350_v30 = vmax.f32 %v2318_v26, 0.0  ;;  %v1730_v34 = vadd.f32 %v5476_v24, %v1617_v16  ;;  %v1623_v26 = vadd.f32 %v5483_v55, %v1510_v50  ;;  %v5493_v55 = vld [vmem:[#allocation56_spill] sm:$0xff] }
 0x355   : > { %v2213_v52 = vpop.f32.mrf.mxu1 }
 0x356   : > { %v2214_v32 = vadd.f32 %v2213_v52, %v2101_v59  ;;  %2474 = vmatmul.f32.gmra.mxu2 %v2350_v30  ;;  %v5484_v52 = vld [vmem:[#allocation39_spill] sm:$0xff] }
 0x357   : > { %v1736_v20 = vadd.f32 %v5484_v52, %v1623_v26  ;;  %v2387_v26 = vld [vmem:[%s3107_s15 + $0x8] sm:$0xff] }
 0x358   : > { %v2283_v44 = vadd.f32 %v2214_v32, %v1727_v56  ;;  %2932 = vmatmul.msk.f32.gmra.mxu1 %vm605_vm2, %v5474_v17  ;;  %v4956_v31 = vpop.f32.mrf.mxu2  ;;  %v5485_v32 = vld [vmem:[#allocation7_spill] sm:$0xff] }
 0x359   : > { %v1513_v33 = vadd.f32 %v5486_v53, %v5485_v32  ;;  %v2008_v38 = vpop.f32.mrf.mxu3 }
 0x35a   : > { %v2319_v23 = vadd.f32 %v4790_v28, %v2283_v44 }
 0x35c   : > { %v2351_v37 = vmax.f32 %v2319_v23, 0.0  ;;  %v2121_v23 = vpop.f32.mrf.mxu0 }
 0x35d   : > { %v2216_v46 = vpop.f32.mrf.mxu1 }
 0x35e   : > { %v2217_v8 = vadd.f32 %v2216_v46, %v2104_v49  ;;  %2477 = vmatmul.f32.gmra.mxu2 %v2351_v37  ;;  %v5488_v37 = vld [vmem:[#allocation41_spill] sm:$0xff] }
 0x360   : > { %v2284_v41 = vadd.f32 %v2217_v8, %v1730_v34  ;;  %2263 = vmatmul.f32.gmra.mxu1 %v5450_v58  ;;  %v4966_v44 = vpop.f32.mrf.mxu2  ;;  %v4974_v34 = vld [vmem:[%s5159_s6] ss:$0 sm:$0xff] }
 0x361   : > { %v5489_v8 = vld [vmem:[#allocation75_spill] sm:$0xff] }
 0x362   : > { %v2320_v36 = vadd.f32 %v4790_v28, %v2284_v41  ;;  %v1516_v48 = vadd.f32 %v5490_v29, %v5489_v8  ;;  %v2386_v41 = vld [vmem:[%s3107_s15] sm:$0xff]  ;;  %v2122_v8 = vadd.f32 %v2121_v23, %v2008_v38  ;;  %v5500_v38 = vld [vmem:[#allocation52_spill] sm:$0xff] }
 0x364   : > { %v2352_v39 = vmax.f32 %v2320_v36, 0.0  ;;  %v1629_v45 = vadd.f32 %v5491_v27, %v1516_v48 }
 0x365   : > { %v2219_v12 = vpop.f32.mrf.mxu1 }
 0x366   : > { %v2220_v35 = vadd.f32 %v2219_v12, %v2107_v15  ;;  %2480 = vmatmul.f32.gmra.mxu2 %v2352_v39  ;;  %v2116_v15 = vadd.f32 %v2115_v5, %v2002_v1  ;;  %v2011_v39 = vpop.f32.mrf.mxu3  ;;  %v1742_v22 = vadd.f32 %v4793_v40, %v1629_v45  ;;  %v5498_v45 = vld [vmem:[#allocation80_spill] sm:$0xff] }
 0x368   : > { %v2285_v6 = vadd.f32 %v2220_v35, %v1733_v47  ;;  %2266 = vmatmul.f32.gmra.mxu1 %v5450_v58  ;;  %v5487_v58 = vld [vmem:[#allocation46_spill] sm:$0xff]  ;;  %v2124_v47 = vpop.f32.mrf.mxu0 }
 0x369   : > { %v1626_v17 = vadd.f32 %v5487_v58, %v1513_v33 }
 0x36a   : > { %v2321_v51 = vadd.f32 %v4790_v28, %v2285_v6  ;;  %v5492_v6 = vld [vmem:[#allocation77_spill] sm:$0xff] }
 0x36b   : > { %v1739_v46 = vadd.f32 %v5488_v37, %v1626_v17  ;;  %v1519_v1 = vadd.f32 %v5493_v55, %v5492_v6  ;;  %v2388_v37 = vld [vmem:[%s3107_s15 + $0x10] sm:$0xff] }
 0x36c   : > { %v2353_v59 = vmax.f32 %v2321_v51, 0.0 }
 0x36d   : > { %v2222_v30 = vpop.f32.mrf.mxu1 }
 0x36e   : > { %v2223_v56 = vadd.f32 %v2222_v30, %v2110_v10  ;;  %2483 = vmatmul.f32.gmra.mxu2 %v2353_v59  ;;  %v5494_v10 = vld [vmem:[#allocation44_spill] sm:$0xff]  ;;  %v2014_v33 = vpop.f32.mrf.mxu3 }
 0x36f   : > { %v1632_v59 = vadd.f32 %v5494_v10, %v1519_v1  ;;  %v5501_v10 = vld [vmem:[#allocation81_spill] sm:$0xff] }
 0x370   : > { %v2286_v57 = vadd.f32 %v2223_v56, %v1736_v20  ;;  %v2119_v20 = vadd.f32 %v2118_v19, %v2005_v14  ;;  %v2127_v17 = vpop.f32.mrf.mxu0 }
 0x371   : > { %v1745_v53 = vadd.f32 %v4807_v62, %v1632_v59  ;;  %v5502_v59 = vld [vmem:[#allocation20_spill] sm:$0xff] }
 0x372   : > { %v2322_v16 = vadd.f32 %v4790_v28, %v2286_v57 }
 0x374   : > { %v2354_v61 = vmax.f32 %v2322_v16, 0.0  ;;  %v5495_v16 = vld [vmem:[#allocation16_spill] sm:$0xff] }
 0x375   : > { %v2225_v49 = vpop.f32.mrf.mxu1 }
 0x376   : > { %v2226_v24 = vadd.f32 %v2225_v49, %v2113_v43  ;;  %2486 = vmatmul.f32.gmra.mxu2 %v2354_v61  ;;  %v5496_v43 = vld [vmem:[#allocation8_spill] sm:$0xff] }
 0x377   : > { %v1522_v61 = vadd.f32 %v5496_v43, %v5495_v16 }
 0x378   : > { %v2287_v60 = vadd.f32 %v2226_v24, %v1739_v46  ;;  %v5497_v24 = vld [vmem:[#allocation43_spill] sm:$0xff] }
 0x379   : > { %v2439_v4 = vpop.f32.mrf.mxu2  ;;  %v1635_v14 = vadd.f32 %v5497_v24, %v1522_v61  ;;  %v5505_v24 = vld [vmem:[#allocation10_spill] sm:$0xff] }
 0x37a   : > { %v2440_v21 = vadd.f32 %v4974_v34, %v2439_v4  ;;  %v2323_v36 = vadd.f32 %v4790_v28, %v2287_v60 }
 0x37c   : > { %v2535_v12 = vadd.f32 %v2440_v21, %v2386_v41  ;;  %v2355_v9 = vmax.f32 %v2323_v36, 0.0  ;;  %v1748_v41 = vadd.f32 %v4819_v0, %v1635_v14  ;;  %v5499_v21 = vld [vmem:[#allocation14_spill] sm:$0xff] }
 0x37d   : > { %v2228_v35 = vpop.f32.mrf.mxu1  ;;  %v1525_v36 = vadd.f32 %v5499_v21, %v5498_v45 }
 0x37e   : > { %v2567_v2 = vmax.f32 %v2535_v12, 0.0  ;;  %v2229_v50 = vadd.f32 %v2228_v35, %v2116_v15  ;;  %2489 = vmatmul.f32.gmra.mxu2 %v2355_v9  ;;  %v2017_v15 = vpop.f32.mrf.mxu3  ;;  %v2130_v9 = vpop.f32.mrf.mxu0  ;;  %v2389_v35 = vld [vmem:[%s3107_s15 + $0x18] sm:$0xff] }
 0x37f   : > { %v1638_v23 = vadd.f32 %v5500_v38, %v1525_v36 }
 0x380   : > { %2599 = vst [vmem:[%s4987_s23] sm:$0xff] %v2567_v2  ;;  %v2288_v5 = vadd.f32 %v2229_v50, %v1742_v22  ;;  %v2125_v50 = vadd.f32 %v2124_v47, %v2011_v39 }
 0x381   : > { %v2442_v51 = vpop.f32.mrf.mxu2 }
 0x382   : > { %v2443_v30 = vadd.f32 %v4974_v34, %v2442_v51  ;;  %v2324_v52 = vadd.f32 %v4790_v28, %v2288_v5  ;;  %v1751_v5 = vadd.f32 %v4834_v54, %v1638_v23 }
 0x384   : > { %v2536_v40 = vadd.f32 %v2443_v30, %v2387_v26  ;;  %v2356_v56 = vmax.f32 %v2324_v52, 0.0  ;;  %v1528_v30 = vadd.f32 %v5502_v59, %v5501_v10 }
 0x385   : > { %v2231_v32 = vpop.f32.mrf.mxu1 }
 0x386   : > { %v2568_v57 = vmax.f32 %v2536_v40, 0.0  ;;  %v2232_v58 = vadd.f32 %v2231_v32, %v2119_v20  ;;  %2492 = vmatmul.f32.gmra.mxu2 %v2356_v56  ;;  %v2390_v20 = vld [vmem:[%s3107_s15 + $0x20] sm:$0xff]  ;;  %v5503_v56 = vld [vmem:[#allocation32_spill] sm:$0xff]  ;;  %v2020_v39 = vpop.f32.mrf.mxu3  ;;  %v2133_v54 = vpop.f32.mrf.mxu0 }
 0x387   : > { %v1641_v32 = vadd.f32 %v5503_v56, %v1528_v30 }
 0x388   : > { %2600 = vst [vmem:[%s4987_s23 + $0x8] sm:$0xff] %v2568_v57  ;;  %v2289_v49 = vadd.f32 %v2232_v58, %v1745_v53  ;;  %v2128_v57 = vadd.f32 %v2127_v17, %v2014_v33 }
 0x389   : > { %v2445_v46 = vpop.f32.mrf.mxu2  ;;  %v1754_v61 = vadd.f32 %v4849_v42, %v1641_v32  ;;  %v2393_v32 = vld [vmem:[%s3107_s15 + $0x38] sm:$0xff] }
 0x38a   : > { %v2446_v19 = vadd.f32 %v4974_v34, %v2445_v46  ;;  %v2325_v62 = vadd.f32 %v4790_v28, %v2289_v49  ;;  %v5504_v46 = vld [vmem:[#allocation26_spill] sm:$0xff] }
 0x38b   : > { %v1531_v14 = vadd.f32 %v5505_v24, %v5504_v46  ;;  %v5513_v46 = vld [vmem:[#allocation29_spill] sm:$0xff]  ;;  %v5514_v24 = vld [vmem:[#allocation19_spill] sm:$0xff] }
 0x38c   : > { %v2537_v29 = vadd.f32 %v2446_v19, %v2388_v37  ;;  %v2357_v48 = vmax.f32 %v2325_v62, 0.0  ;;  %v2391_v62 = vld [vmem:[%s3107_s15 + $0x28] sm:$0xff] }
 0x38d   : > { %v2234_v60 = vpop.f32.mrf.mxu1 }
 0x38e   : > { %v2569_v4 = vmax.f32 %v2537_v29, 0.0  ;;  %v2235_v27 = vadd.f32 %v2234_v60, %v2122_v8  ;;  %2495 = vmatmul.f32.gmra.mxu2 %v2357_v48  ;;  %v5506_v29 = vld [vmem:[#allocation68_spill] sm:$0xff]  ;;  %v2131_v60 = vadd.f32 %v2130_v9, %v2017_v15  ;;  %v2023_v42 = vpop.f32.mrf.mxu3 }
 0x38f   : > { %v1644_v48 = vadd.f32 %v5506_v29, %v1531_v14  ;;  %v1540_v14 = vadd.f32 %v5514_v24, %v5513_v46  ;;  %v2394_v29 = vld [vmem:[%s3107_s15 + $0x40] sm:$0xff]  ;;  %v5523_v46 = vld [vmem:[#allocation60_spill] sm:$0xff] }
 0x390   : > { %2601 = vst [vmem:[%s4987_s23 + $0x10] sm:$0xff] %v2569_v4  ;;  %v2290_v12 = vadd.f32 %v2235_v27, %v1748_v41  ;;  %v2136_v27 = vpop.f32.mrf.mxu0 }
 0x391   : > { %v2448_v22 = vpop.f32.mrf.mxu2  ;;  %v1757_v21 = vadd.f32 %v4864_v63, %v1644_v48 }
 0x392   : > { %v2449_v2 = vadd.f32 %v4974_v34, %v2448_v22  ;;  %v2326_v0 = vadd.f32 %v4790_v28, %v2290_v12  ;;  %v5508_v22 = vld [vmem:[#allocation13_spill] sm:$0xff] }
 0x394   : > { %v2538_v6 = vadd.f32 %v2449_v2, %v2389_v35  ;;  %v2358_v55 = vmax.f32 %v2326_v0, 0.0  ;;  %v5507_v35 = vld [vmem:[#allocation27_spill] sm:$0xff]  ;;  %v2392_v2 = vld [vmem:[%s3107_s15 + $0x30] sm:$0xff] }
 0x395   : > { %v2237_v1 = vpop.f32.mrf.mxu1  ;;  %v1534_v38 = vadd.f32 %v5508_v22, %v5507_v35  ;;  %v5517_v35 = vld [vmem:[#allocation25_spill] sm:$0xff] }
 0x396   : > { %v2570_v26 = vmax.f32 %v2538_v6, 0.0  ;;  %v2238_v51 = vadd.f32 %v2237_v1, %v2125_v50  ;;  %2498 = vmatmul.f32.gmra.mxu2 %v2358_v55  ;;  %v5509_v50 = vld [vmem:[#allocation59_spill] sm:$0xff]  ;;  %v2134_v55 = vadd.f32 %v2133_v54, %v2020_v39 }
 0x397   : > { %v1647_v15 = vadd.f32 %v5509_v50, %v1534_v38 }
 0x398   : > { %2602 = vst [vmem:[%s4987_s23 + $0x18] sm:$0xff] %v2570_v26  ;;  %v2291_v52 = vadd.f32 %v2238_v51, %v1751_v5  ;;  %v2026_v51 = vpop.f32.mrf.mxu3  ;;  %v2139_v30 = vpop.f32.mrf.mxu0 }
 0x399   : > { %v2451_v40 = vpop.f32.mrf.mxu2  ;;  %v1760_v26 = vadd.f32 %v4881_v18, %v1647_v15 }
 0x39a   : > { %v2452_v47 = vadd.f32 %v4974_v34, %v2451_v40  ;;  %v2327_v53 = vadd.f32 %v4790_v28, %v2291_v52  ;;  %v5510_v52 = vld [vmem:[#allocation28_spill] sm:$0xff] }
 0x39c   : > { %v2539_v58 = vadd.f32 %v2452_v47, %v2390_v20  ;;  %v2359_v16 = vmax.f32 %v2327_v53, 0.0  ;;  %v5511_v20 = vld [vmem:[#allocation31_spill] sm:$0xff]  ;;  %v5512_v53 = vld [vmem:[#allocation34_spill] sm:$0xff] }
 0x39d   : > { %v2240_v43 = vpop.f32.mrf.mxu1  ;;  %v1537_v40 = vadd.f32 %v5511_v20, %v5510_v52 }
 0x39e   : > { %v2571_v49 = vmax.f32 %v2539_v58, 0.0  ;;  %v2241_v37 = vadd.f32 %v2240_v43, %v2128_v57  ;;  %2501 = vmatmul.f32.gmra.mxu2 %v2359_v16  ;;  %v2137_v57 = vadd.f32 %v2136_v27, %v2023_v42  ;;  %v2140_v42 = vadd.f32 %v2139_v30, %v2026_v51  ;;  %v5520_v30 = vld [vmem:[#allocation38_spill] sm:$0xff] }
 0x39f   : > { %v1650_v39 = vadd.f32 %v5512_v53, %v1537_v40  ;;  %v2396_v40 = vld [vmem:[%s3107_s15 + $0x50] sm:$0xff] }
 0x3a0   : > { %2603 = vst [vmem:[%s4987_s23 + $0x20] sm:$0xff] %v2571_v49  ;;  %v2292_v19 = vadd.f32 %v2241_v37, %v1754_v61 }
 0x3a1   : > { %v2454_v8 = vpop.f32.mrf.mxu2  ;;  %v1763_v61 = vadd.f32 %v4898_v25, %v1650_v39 }
 0x3a2   : > { %v2455_v33 = vadd.f32 %v4974_v34, %v2454_v8  ;;  %v2328_v17 = vadd.f32 %v4790_v28, %v2292_v19  ;;  %v2029_v19 = vpop.f32.mrf.mxu3  ;;  %v2142_v8 = vpop.f32.mrf.mxu0 }
 0x3a4   : > { %v2540_v41 = vadd.f32 %v2455_v33, %v2391_v62  ;;  %v2360_v4 = vmax.f32 %v2328_v17, 0.0  ;;  %v5515_v33 = vld [vmem:[#allocation71_spill] sm:$0xff] }
 0x3a5   : > { %v2243_v45 = vpop.f32.mrf.mxu1  ;;  %v1653_v17 = vadd.f32 %v5515_v33, %v1540_v14 }
 0x3a6   : > { %v2572_v36 = vmax.f32 %v2540_v41, 0.0  ;;  %v2244_v12 = vadd.f32 %v2243_v45, %v2131_v60  ;;  %2504 = vmatmul.f32.gmra.mxu2 %v2360_v4 }
 0x3a7   : > { %v1766_v45 = vadd.f32 %v4910_v11, %v1653_v17 }
 0x3a8   : > { %2604 = vst [vmem:[%s4987_s23 + $0x28] sm:$0xff] %v2572_v36  ;;  %v2293_v23 = vadd.f32 %v2244_v12, %v1757_v21  ;;  %v5516_v12 = vld [vmem:[#allocation64_spill] sm:$0xff] }
 0x3a9   : > { %v2457_v0 = vpop.f32.mrf.mxu2  ;;  %v1543_v22 = vadd.f32 %v5517_v35, %v5516_v12 }
 0x3aa   : > { %v2458_v9 = vadd.f32 %v4974_v34, %v2457_v0  ;;  %v2329_v6 = vadd.f32 %v4790_v28, %v2293_v23  ;;  %v2395_v23 = vld [vmem:[%s3107_s15 + $0x48] sm:$0xff]  ;;  %v5518_v0 = vld [vmem:[#allocation35_spill] sm:$0xff]  ;;  %v2032_v15 = vpop.f32.mrf.mxu3  ;;  %v2145_v11 = vpop.f32.mrf.mxu0 }
 0x3ab   : > { %v1656_v50 = vadd.f32 %v5518_v0, %v1543_v22  ;;  %v2398_v22 = vld [vmem:[%s3107_s15 + $0x60] sm:$0xff] }
 0x3ac   : > { %v2541_v63 = vadd.f32 %v2458_v9, %v2392_v2  ;;  %v2361_v1 = vmax.f32 %v2329_v6, 0.0 }
 0x3ad   : > { %v2246_v5 = vpop.f32.mrf.mxu1 }
 0x3ae   : > { %v2573_v10 = vmax.f32 %v2541_v63, 0.0  ;;  %v2247_v59 = vadd.f32 %v2246_v5, %v2134_v55  ;;  %2507 = vmatmul.f32.gmra.mxu2 %v2361_v1  ;;  %v2143_v55 = vadd.f32 %v2142_v8, %v2029_v19  ;;  %v2397_v19 = vld [vmem:[%s3107_s15 + $0x58] sm:$0xff]  ;;  %v5524_v8 = vld [vmem:[#allocation61_spill] sm:$0xff] }
 0x3b0   : > { %2605 = vst [vmem:[%s4987_s23 + $0x30] sm:$0xff] %v2573_v10  ;;  %v2294_v56 = vadd.f32 %v2247_v59, %v1760_v26  ;;  %v1769_v26 = vadd.f32 %v4924_v7, %v1656_v50  ;;  %v5519_v59 = vld [vmem:[#allocation66_spill] sm:$0xff] }
 0x3b1   : > { %v2460_v47 = vpop.f32.mrf.mxu2  ;;  %v1546_v52 = vadd.f32 %v5520_v30, %v5519_v59  ;;  %v2399_v30 = vld [vmem:[%s3107_s15 + $0x68] sm:$0xff] }
 0x3b2   : > { %v2461_v54 = vadd.f32 %v4974_v34, %v2460_v47  ;;  %v2330_v18 = vadd.f32 %v4790_v28, %v2294_v56  ;;  %v2035_v7 = vpop.f32.mrf.mxu3 }
 0x3b4   : > { %v2542_v58 = vadd.f32 %v2461_v54, %v2393_v32  ;;  %v2362_v16 = vmax.f32 %v2330_v18, 0.0  ;;  %v5521_v32 = vld [vmem:[#allocation73_spill] sm:$0xff]  ;;  %v2146_v54 = vadd.f32 %v2145_v11, %v2032_v15 }
 0x3b5   : > { %v2249_v43 = vpop.f32.mrf.mxu1  ;;  %v1659_v47 = vadd.f32 %v5521_v32, %v1546_v52 }
 0x3b6   : > { %v2574_v49 = vmax.f32 %v2542_v58, 0.0  ;;  %v2250_v37 = vadd.f32 %v2249_v43, %v2137_v57  ;;  %2510 = vmatmul.f32.gmra.mxu2 %v2362_v16  ;;  %v2148_v58 = vpop.f32.mrf.mxu0 }
 0x3b7   : > { %v1772_v43 = vadd.f32 %v4936_v13, %v1659_v47  ;;  %v2149_v17 = vadd.f32 %v2148_v58, %v2035_v7  ;;  %v2400_v58 = vld [vmem:[%s3107_s15 + $0x70] sm:$0xff] }
 0x3b8   : > { %2606 = vst [vmem:[%s4987_s23 + $0x38] sm:$0xff] %v2574_v49  ;;  %v2295_v62 = vadd.f32 %v2250_v37, %v1763_v61  ;;  %v5522_v37 = vld [vmem:[#allocation50_spill] sm:$0xff] }
 0x3b9   : > { %v2463_v48 = vpop.f32.mrf.mxu2  ;;  %v1549_v24 = vadd.f32 %v5523_v46, %v5522_v37 }
 0x3ba   : > { %v2464_v60 = vadd.f32 %v4974_v34, %v2463_v48  ;;  %v2331_v25 = vadd.f32 %v4790_v28, %v2295_v62 }
 0x3bc   : > { %v2543_v41 = vadd.f32 %v2464_v60, %v2394_v29  ;;  %v2363_v4 = vmax.f32 %v2331_v25, 0.0  ;;  %v1662_v29 = vadd.f32 %v5524_v8, %v1549_v24  ;;  %v2038_v25 = vpop.f32.mrf.mxu3  ;;  %v2402_v8 = vld [vmem:[%s3107_s15 + $0x80] sm:$0xff] }
 0x3bd   : > { %v2252_v27 = vpop.f32.mrf.mxu1 }
 0x3be   : > { %v2575_v21 = vmax.f32 %v2543_v41, 0.0  ;;  %v2253_v36 = vadd.f32 %v2252_v27, %v2140_v42  ;;  %2513 = vmatmul.f32.gmra.mxu2 %v2363_v4  ;;  %v2151_v41 = vpop.f32.mrf.mxu0  ;;  %v1775_v4 = vadd.f32 %v4947_v3, %v1662_v29 }
 0x3bf   : > { %v2152_v50 = vadd.f32 %v2151_v41, %v2038_v25  ;;  %v2404_v41 = vld [vmem:[%s3107_s15 + $0x90] sm:$0xff] }
 0x3c0   : > { %2607 = vst [vmem:[%s4987_s23 + $0x40] sm:$0xff] %v2575_v21  ;;  %v2296_v38 = vadd.f32 %v2253_v36, %v1766_v45  ;;  %v5525_v21 = vld [vmem:[#allocation33_spill] sm:$0xff]  ;;  %v5526_v36 = vld [vmem:[#allocation62_spill] sm:$0xff] }
 0x3c1   : > { %v2466_v2 = vpop.f32.mrf.mxu2  ;;  %v1552_v12 = vadd.f32 %v5526_v36, %v5525_v21  ;;  %v2405_v36 = vld [vmem:[%s3107_s15 + $0x98] sm:$0xff] }
 0x3c2   : > { %v2467_v9 = vadd.f32 %v4974_v34, %v2466_v2  ;;  %v2332_v6 = vadd.f32 %v4790_v28, %v2296_v38 }
 0x3c4   : > { %v2544_v63 = vadd.f32 %v2467_v9, %v2395_v23  ;;  %v2364_v1 = vmax.f32 %v2332_v6, 0.0  ;;  %v5527_v23 = vld [vmem:[#allocation67_spill] sm:$0xff] }
 0x3c5   : > { %v2255_v5 = vpop.f32.mrf.mxu1  ;;  %v1665_v2 = vadd.f32 %v5527_v23, %v1552_v12  ;;  %v2406_v23 = vld [vmem:[%s3107_s15 + $0xa0] sm:$0xff] }
 0x3c6   : > { %v2576_v51 = vmax.f32 %v2544_v63, 0.0  ;;  %v2256_v10 = vadd.f32 %v2255_v5, %v2143_v55  ;;  %2516 = vmatmul.f32.gmra.mxu2 %v2364_v1  ;;  %v2041_v1 = vpop.f32.mrf.mxu3  ;;  %v2154_v5 = vpop.f32.mrf.mxu0 }
 0x3c7   : > { %v1778_v11 = vadd.f32 %v4956_v31, %v1665_v2  ;;  %v2155_v32 = vadd.f32 %v2154_v5, %v2041_v1 }
 0x3c8   : > { %2608 = vst [vmem:[%s4987_s23 + $0x48] sm:$0xff] %v2576_v51  ;;  %v2297_v20 = vadd.f32 %v2256_v10, %v1769_v26  ;;  %v5528_v26 = vld [vmem:[#allocation69_spill] sm:$0xff]  ;;  %v5529_v51 = vld [vmem:[#allocation30_spill] sm:$0xff] }
 0x3c9   : > { %v2469_v56 = vpop.f32.mrf.mxu2  ;;  %v1555_v10 = vadd.f32 %v5529_v51, %v5528_v26 }
 0x3ca   : > { %v2470_v53 = vadd.f32 %v4974_v34, %v2469_v56  ;;  %v2333_v39 = vadd.f32 %v4790_v28, %v2297_v20  ;;  %v5530_v20 = vld [vmem:[#allocation65_spill] sm:$0xff] }
 0x3cc   : > { %v2545_v18 = vadd.f32 %v2470_v53, %v2396_v40  ;;  %v2365_v57 = vmax.f32 %v2333_v39, 0.0  ;;  %v1668_v40 = vadd.f32 %v5530_v20, %v1555_v10  ;;  %v2409_v10 = vld [vmem:[%s3107_s15 + $0xb8] sm:$0xff] }
 0x3cd   : > { %v2258_v16 = vpop.f32.mrf.mxu1 }
 0x3ce   : > { %v2577_v61 = vmax.f32 %v2545_v18, 0.0  ;;  %v2259_v49 = vadd.f32 %v2258_v16, %v2146_v54  ;;  %2519 = vmatmul.f32.gmra.mxu2 %v2365_v57  ;;  %v1781_v54 = vadd.f32 %v4966_v44, %v1668_v40  ;;  %v2401_v44 = vld [vmem:[%s3107_s15 + $0x78] sm:$0xff]  ;;  %v2410_v40 = vld [vmem:[%s3107_s15 + $0xc0] sm:$0xff] }
 0x3d0   : > { %2609 = vst [vmem:[%s4987_s23 + $0x50] sm:$0xff] %v2577_v61  ;;  %v2298_v14 = vadd.f32 %v2259_v49, %v1772_v43 }
 0x3d1   : > { %v2472_v62 = vpop.f32.mrf.mxu2 }
 0x3d2   : > { %v2473_v48 = vadd.f32 %v4974_v34, %v2472_v62  ;;  %v2334_v33 = vadd.f32 %v4790_v28, %v2298_v14 }
 0x3d4   : > { %v2546_v13 = vadd.f32 %v2473_v48, %v2397_v19  ;;  %v2366_v60 = vmax.f32 %v2334_v33, 0.0 }
 0x3d5   : > { %v2261_v42 = vpop.f32.mrf.mxu1 }
 0x3d6   : > { %v2578_v27 = vmax.f32 %v2546_v13, 0.0  ;;  %v2262_v45 = vadd.f32 %v2261_v42, %v2149_v17  ;;  %2522 = vmatmul.f32.gmra.mxu2 %v2366_v60  ;;  %v2403_v17 = vld [vmem:[%s3107_s15 + $0x88] sm:$0xff] }
 0x3d8   : > { %2610 = vst [vmem:[%s4987_s23 + $0x58] sm:$0xff] %v2578_v27  ;;  %v2299_v35 = vadd.f32 %v2262_v45, %v1775_v4 }
 0x3d9   : > { %v2475_v38 = vpop.f32.mrf.mxu2 }
 0x3da   : > { %v2476_v0 = vadd.f32 %v4974_v34, %v2475_v38  ;;  %v2335_v15 = vadd.f32 %v4790_v28, %v2299_v35 }
 0x3dc   : > { %v2547_v3 = vadd.f32 %v2476_v0, %v2398_v22  ;;  %v2367_v9 = vmax.f32 %v2335_v15, 0.0 }
 0x3dd   : > { %v2264_v6 = vpop.f32.mrf.mxu1 }
 0x3de   : > { %v2579_v55 = vmax.f32 %v2547_v3, 0.0  ;;  %v2265_v63 = vadd.f32 %v2264_v6, %v2152_v50  ;;  %2525 = vmatmul.f32.gmra.mxu2 %v2367_v9  ;;  %v2407_v3 = vld [vmem:[%s3107_s15 + $0xa8] sm:$0xff] }
 0x3e0   : > { %2611 = vst [vmem:[%s4987_s23 + $0x60] sm:$0xff] %v2579_v55  ;;  %v2300_v59 = vadd.f32 %v2265_v63, %v1778_v11  ;;  %v2408_v63 = vld [vmem:[%s3107_s15 + $0xb0] sm:$0xff] }
 0x3e1   : > { %v2478_v52 = vpop.f32.mrf.mxu2 }
 0x3e2   : > { %v2479_v56 = vadd.f32 %v4974_v34, %v2478_v52  ;;  %v2336_v31 = vadd.f32 %v4790_v28, %v2300_v59 }
 0x3e4   : > { %v2548_v47 = vadd.f32 %v2479_v56, %v2399_v30  ;;  %v2368_v53 = vmax.f32 %v2336_v31, 0.0 }
 0x3e5   : > { %v2267_v39 = vpop.f32.mrf.mxu1 }
 0x3e6   : > { %v2580_v7 = vmax.f32 %v2548_v47, 0.0  ;;  %v2268_v18 = vadd.f32 %v2267_v39, %v2155_v32  ;;  %2528 = vmatmul.f32.gmra.mxu2 %v2368_v53  ;;  %v2411_v53 = vld [vmem:[%s3107_s15 + $0xc8] sm:$0xff] }
 0x3e8   : > { %2612 = vst [vmem:[%s4987_s23 + $0x68] sm:$0xff] %v2580_v7  ;;  %v2301_v57 = vadd.f32 %v2268_v18, %v1781_v54 }
 0x3e9   : > { %v2481_v16 = vpop.f32.mrf.mxu2 }
 0x3ea   : > { %v2482_v43 = vadd.f32 %v4974_v34, %v2481_v16  ;;  %v2337_v61 = vadd.f32 %v4790_v28, %v2301_v57  ;;  %v2412_v57 = vld [vmem:[%s3107_s15 + $0xd0] sm:$0xff] }
 0x3ec   : > { %v2549_v49 = vadd.f32 %v2482_v43, %v2400_v58  ;;  %v2369_v37 = vmax.f32 %v2337_v61, 0.0 }
 0x3ee   : > { %v2581_v46 = vmax.f32 %v2549_v49, 0.0  ;;  %2531 = vmatmul.f32.gmra.mxu2 %v2369_v37  ;;  %v2413_v49 = vld [vmem:[%s3107_s15 + $0xd8] sm:$0xff] }
 0x3f0   : > { %2613 = vst [vmem:[%s4987_s23 + $0x70] sm:$0xff] %v2581_v46 }
 0x3f1   : > { %v2484_v24 = vpop.f32.mrf.mxu2 }
 0x3f2   : > { %v2485_v14 = vadd.f32 %v4974_v34, %v2484_v24 }
 0x3f4   : > { %v2550_v19 = vadd.f32 %v2485_v14, %v2401_v44  ;;  %v2414_v14 = vld [vmem:[%s3107_s15 + $0xe0] sm:$0xff] }
 0x3f6   : > { %v2582_v62 = vmax.f32 %v2550_v19, 0.0 }
 0x3f8   : > { %2614 = vst [vmem:[%s4987_s23 + $0x78] sm:$0xff] %v2582_v62 }
 0x3f9   : > { %v2487_v29 = vpop.f32.mrf.mxu2 }
 0x3fa   : > { %v2488_v28 = vadd.f32 %v4974_v34, %v2487_v29 }
 0x3fc   : > { %v2551_v48 = vadd.f32 %v2488_v28, %v2402_v8  ;;  %v2415_v28 = vld [vmem:[%s3107_s15 + $0xe8] sm:$0xff] }
 0x3fe   : > { %v2583_v33 = vmax.f32 %v2551_v48, 0.0 }
 0x400   : > { %2615 = vst [vmem:[%s4987_s23 + $0x80] sm:$0xff] %v2583_v33 }
 0x401   : > { %v2490_v13 = vpop.f32.mrf.mxu2 }
 0x402   : > { %v2491_v60 = vadd.f32 %v4974_v34, %v2490_v13 }
 0x404   : > { %v2552_v25 = vadd.f32 %v2491_v60, %v2403_v17  ;;  %v2416_v60 = vld [vmem:[%s3107_s15 + $0xf0] sm:$0xff] }
 0x406   : > { %v2584_v42 = vmax.f32 %v2552_v25, 0.0 }
 0x408   : > { %2616 = vst [vmem:[%s4987_s23 + $0x88] sm:$0xff] %v2584_v42 }
 0x409   : > { %v2493_v4 = vpop.f32.mrf.mxu2 }
 0x40a   : > { %v2494_v27 = vadd.f32 %v4974_v34, %v2493_v4 }
 0x40c   : > { %v2553_v45 = vadd.f32 %v2494_v27, %v2404_v41  ;;  %v2417_v27 = vld [vmem:[%s3107_s15 + $0xf8] sm:$0xff] }
 0x40e   : > { %v2585_v21 = vmax.f32 %v2553_v45, 0.0 }
 0x410   : > { %2617 = vst [vmem:[%s4987_s23 + $0x90] sm:$0xff] %v2585_v21 }
 0x411   : > { %v2496_v12 = vpop.f32.mrf.mxu2 }
 0x412   : > { %v2497_v35 = vadd.f32 %v4974_v34, %v2496_v12 }
 0x414   : > { %v2554_v22 = vadd.f32 %v2497_v35, %v2405_v36 }
 0x416   : > { %v2586_v38 = vmax.f32 %v2554_v22, 0.0 }
 0x418   : > { %2618 = vst [vmem:[%s4987_s23 + $0x98] sm:$0xff] %v2586_v38 }
 0x419   : > { %v2499_v2 = vpop.f32.mrf.mxu2 }
 0x41a   : > { %v2500_v0 = vadd.f32 %v4974_v34, %v2499_v2 }
 0x41c   : > { %v2555_v50 = vadd.f32 %v2500_v0, %v2406_v23 }
 0x41e   : > { %v2587_v15 = vmax.f32 %v2555_v50, 0.0 }
 0x420   : > { %2619 = vst [vmem:[%s4987_s23 + $0xa0] sm:$0xff] %v2587_v15 }
 0x421   : > { %v2502_v9 = vpop.f32.mrf.mxu2 }
 0x422   : > { %v2503_v6 = vadd.f32 %v4974_v34, %v2502_v9 }
 0x424   : > { %v2556_v11 = vadd.f32 %v2503_v6, %v2407_v3 }
 0x426   : > { %v2588_v55 = vmax.f32 %v2556_v11, 0.0 }
 0x428   : > { %2620 = vst [vmem:[%s4987_s23 + $0xa8] sm:$0xff] %v2588_v55 }
 0x429   : > { %v2505_v1 = vpop.f32.mrf.mxu2 }
 0x42a   : > { %v2506_v5 = vadd.f32 %v4974_v34, %v2505_v1 }
 0x42c   : > { %v2557_v26 = vadd.f32 %v2506_v5, %v2408_v63 }
 0x42e   : > { %v2589_v51 = vmax.f32 %v2557_v26, 0.0 }
 0x430   : > { %2621 = vst [vmem:[%s4987_s23 + $0xb0] sm:$0xff] %v2589_v51 }
 0x431   : > { %v2508_v59 = vpop.f32.mrf.mxu2 }
 0x432   : > { %v2509_v30 = vadd.f32 %v4974_v34, %v2508_v59 }
 0x434   : > { %v2558_v52 = vadd.f32 %v2509_v30, %v2409_v10 }
 0x436   : > { %v2590_v20 = vmax.f32 %v2558_v52, 0.0 }
 0x438   : > { %2622 = vst [vmem:[%s4987_s23 + $0xb8] sm:$0xff] %v2590_v20 }
 0x439   : > { %v2511_v56 = vpop.f32.mrf.mxu2 }
 0x43a   : > { %v2512_v32 = vadd.f32 %v4974_v34, %v2511_v56 }
 0x43c   : > { %v2559_v31 = vadd.f32 %v2512_v32, %v2410_v40 }
 0x43e   : > { %v2591_v47 = vmax.f32 %v2559_v31, 0.0 }
 0x440   : > { %2623 = vst [vmem:[%s4987_s23 + $0xc0] sm:$0xff] %v2591_v47 }
 0x441   : > { %v2514_v39 = vpop.f32.mrf.mxu2 }
 0x442   : > { %v2515_v54 = vadd.f32 %v4974_v34, %v2514_v39 }
 0x444   : > { %v2560_v7 = vadd.f32 %v2515_v54, %v2411_v53 }
 0x446   : > { %v2592_v18 = vmax.f32 %v2560_v7, 0.0 }
 0x448   : > { %2624 = vst [vmem:[%s4987_s23 + $0xc8] sm:$0xff] %v2592_v18 }
 0x449   : > { %v2517_v58 = vpop.f32.mrf.mxu2 }
 0x44a   : > { %v2518_v16 = vadd.f32 %v4974_v34, %v2517_v58 }
 0x44c   : > { %v2561_v43 = vadd.f32 %v2518_v16, %v2412_v57 }
 0x44e   : > { %v2593_v61 = vmax.f32 %v2561_v43, 0.0 }
 0x450   : > { %2625 = vst [vmem:[%s4987_s23 + $0xd0] sm:$0xff] %v2593_v61 }
 0x451   : > { %v2520_v37 = vpop.f32.mrf.mxu2 }
 0x452   : > { %v2521_v46 = vadd.f32 %v4974_v34, %v2520_v37 }
 0x454   : > { %v2562_v44 = vadd.f32 %v2521_v46, %v2413_v49 }
 0x456   : > { %v2594_v24 = vmax.f32 %v2562_v44, 0.0 }
 0x458   : > { %2626 = vst [vmem:[%s4987_s23 + $0xd8] sm:$0xff] %v2594_v24 }
 0x459   : > { %v2523_v19 = vpop.f32.mrf.mxu2 }
 0x45a   : > { %v2524_v62 = vadd.f32 %v4974_v34, %v2523_v19 }
 0x45c   : > { %v2563_v8 = vadd.f32 %v2524_v62, %v2414_v14 }
 0x45e   : > { %v2595_v29 = vmax.f32 %v2563_v8, 0.0 }
 0x460   : > { %2627 = vst [vmem:[%s4987_s23 + $0xe0] sm:$0xff] %v2595_v29 }
 0x461   : > { %v2526_v48 = vpop.f32.mrf.mxu2 }
 0x462   : > { %v2527_v33 = vadd.f32 %v4974_v34, %v2526_v48 }
 0x464   : > { %v2564_v17 = vadd.f32 %v2527_v33, %v2415_v28 }
 0x466   : > { %v2596_v13 = vmax.f32 %v2564_v17, 0.0 }
 0x468   : > { %2628 = vst [vmem:[%s4987_s23 + $0xe8] sm:$0xff] %v2596_v13 }
 0x469   : > { %v2529_v25 = vpop.f32.mrf.mxu2 }
 0x46a   : > { %v2530_v42 = vadd.f32 %v4974_v34, %v2529_v25 }
 0x46c   : > { %v2565_v41 = vadd.f32 %v2530_v42, %v2416_v60 }
 0x46e   : > { %v2597_v4 = vmax.f32 %v2565_v41, 0.0 }
 0x470   : > { %2629 = vst [vmem:[%s4987_s23 + $0xf0] sm:$0xff] %v2597_v4 }
 0x471   : > { %v2532_v45 = vpop.f32.mrf.mxu2 }
 0x472   : > { %v2533_v21 = vadd.f32 %v4974_v34, %v2532_v45 }
 0x474   : > { %v2566_v36 = vadd.f32 %v2533_v21, %v2417_v27 }
 0x476   : > { %v2598_v12 = vmax.f32 %v2566_v36, 0.0 }
 0x478   : > { %2630 = vst [vmem:[%s4987_s23 + $0xf8] sm:$0xff] %v2598_v12 }
 0x479 PF: > { %s17_s24 = sadd.s32 1, %s2999_s24  }
 0x47a   : > { %p14_p4 = scmp.ge.s32.totalorder %s17_s24, 4  }
 0x47c   :  { %16 = sbr.rel (!%p14_p4) target bundleno = 1 (0x1), region = 89 }

</bundles_post_ra>
